<compile_context>
chip_gen: v7x
topology: tpu7x:2x2x1
jax: 0.10.0
libtpu: 0.0.40
codegen_flags: <defaults>
</compile_context>

<pallas_src>
import numpy as np
import jax
import jax.numpy as jnp
from jax import lax
from jax.experimental import pallas as pl
from jax.experimental.pallas import tpu as pltpu


def _act(x, kind):
    if kind == "RE":
        return jnp.maximum(x, 0.0)                                 # ReLU
    return x * (jnp.clip(x + 3.0, 0.0, 6.0) * (1.0 / 6.0))         # h_swish


def make_kernel(*, Cin, E, W, HW, HWo, Bblk, k, pad, non_linear, use_se,
                use_connect, need_select, need_masks, mask_all_ones):
    L = Bblk * HW

    def kernel(*refs):
        it = iter(refs)
        x_ref = next(it)                     # (Cin, L)   channel-major input
        w1_ref = next(it)                    # (E, Cin)   expand weight * BN1 scale
        c1_ref = next(it)                    # (E, 1)     BN1 shift
        dwk_ref = next(it)                   # (E, k*k)   depthwise taps * BN2 scale
        dwb_ref = next(it)                   # (E, 1)     dw bias * s2 + BN2 shift
        mask_ref = next(it) if need_masks else None    # (k*k, L) 0/1 boundary masks
        sel_ref = next(it) if need_select else None    # (HW, HWo) one-hot decimation
        if use_se:
            wse1_ref = next(it)              # (Er, E)
            bse1_ref = next(it)              # (Er, 1)
            wse2_ref = next(it)              # (E, Er)
            bse2_ref = next(it)              # (E, 1)
        w3_ref = next(it)                    # (Cout, E)  project weight * BN3 scale
        b3_ref = next(it)                    # (Cout, 1)  proj bias * s3 + BN3 shift
        o_ref = next(it)                     # (Cout, Bblk*HWo)

        x_f = x_ref[...].astype(jnp.float32)                       # (Cin, L)

        # ---- expand 1x1 conv (+ folded BN1) on the VPU (K=Cin is tiny) -------
        t = None
        for c in range(Cin):
            term = w1_ref[:, c:c + 1] * x_f[c:c + 1, :]            # (E, L)
            t = term if t is None else t + term
        t = _act(t + c1_ref[...], non_linear)

        # ---- depthwise kxk conv (+ folded BN2 scale): rolls + masks ----------
        # Running accumulator bounds liveness to ~3 (E, L) tensors (no spills).
        acc = None
        for dh in range(k):
            for dw in range(k):
                off = (dh - pad) * W + (dw - pad)
                src = t if off == 0 else pltpu.roll(t, shift=(-off) % L, axis=1)
                tap = dh * k + dw
                term = src * dwk_ref[:, tap:tap + 1]
                if not mask_all_ones[tap]:
                    term = term * mask_ref[tap:tap + 1, :]
                acc = term if acc is None else acc + term          # (E, L)
        # (depthwise bias / BN2 shift `dwb` is folded into the projection below)

        w3 = w3_ref[...]                                            # (Cout, E)
        b3 = b3_ref[...]                                            # (Cout, 1)
        dwb = dwb_ref[...]                                          # (E, 1)
        if use_se:
            # (E, E) identity mask, hoisted out of the per-image loop; turns the
            # (E,1) SE gate into a (1,E) row via a where + sublane-sum instead of
            # relying on small-shape transpose relayouts.
            eye = (lax.broadcasted_iota(jnp.int32, (E, E), 0) ==
                   lax.broadcasted_iota(jnp.int32, (E, E), 1))

        for b in range(Bblk):                                       # small, unrolled
            d_b = acc[:, b * HW:(b + 1) * HW]                       # (E, HW)
            if need_select:
                # One-hot decimation on the MXU (stride>1 / even k). Exact because
                # every sel column has a single 1 (so folding dwb later commutes).
                d_b = jnp.dot(d_b, sel_ref[...],
                              preferred_element_type=jnp.float32)   # (E, HWo)
            w3_b = w3
            if use_se:
                pooled = jnp.mean(d_b, axis=1, keepdims=True) + dwb          # (E,1)
                h1 = jnp.dot(wse1_ref[...], pooled,
                             preferred_element_type=jnp.float32) + bse1_ref[...]
                h1 = jnp.maximum(h1, 0.0)                                     # (Er,1)
                h2 = jnp.dot(wse2_ref[...], h1,
                             preferred_element_type=jnp.float32) + bse2_ref[...]
                gate = jnp.clip(h2 + 3.0, 0.0, 6.0) * (1.0 / 6.0)             # (E,1)
                gate_row = jnp.sum(jnp.where(eye, gate, 0.0),
                                   axis=0, keepdims=True)                     # (1,E)
                w3_b = w3 * gate_row          # fold SE gate into project weights
            # fold the depthwise shift into the projection bias: w3_b @ dwb + b3
            b3_b = jnp.dot(w3_b, dwb, preferred_element_type=jnp.float32) + b3
            o_b = jnp.dot(w3_b, d_b, preferred_element_type=jnp.float32) + b3_b
            o_b = _act(o_b, non_linear)                                       # (Cout,HWo)
            if use_connect:
                o_b = o_b + x_f[:, b * HW:(b + 1) * HW]
            o_ref[:, b * HWo:(b + 1) * HWo] = o_b.astype(o_ref.dtype)

    return kernel


def mobile_block(x, params, *, k, stride, non_linear, use_se, use_connect,
                 batch_block=None):
    B, H, W, Cin = x.shape
    E = params["w1"].shape[1]
    Cout = params["w3"].shape[1]
    pad = (k - 1) // 2
    Ho = (H + 2 * pad - k) // stride + 1
    Wo = (W + 2 * pad - k) // stride + 1
    HW, HWo = H * W, Ho * Wo
    need_select = (Ho != H) or (Wo != W)

    if use_connect:
        assert stride == 1 and Cin == Cout and Ho == H and Wo == W, (
            "residual connection requires matching input/output shapes")

    # Images per grid step (amortizes ~0.35us/step pipeline overhead).  For large
    # batches this keeps >= 2 grid steps so v7x can shard them across both cores.
    if batch_block is None:
        batch_block = next(d for d in (8, 4, 2, 1) if B % d == 0)
    assert B % batch_block == 0
    Bblk = batch_block
    nsteps = B // Bblk
    if nsteps > 1 and ((Bblk * HW) % 128 != 0 or (Bblk * HWo) % 128 != 0):
        Bblk, nsteps = B, 1            # keep blocks lane-aligned (or full-array)
    L, Lo = Bblk * HW, Bblk * HWo

    # ---- host-side parameter massaging (outside the kernel) ------------------
    f32 = jnp.float32
    w1t = (params["w1"] * params["s1"]).T.astype(f32)                          # (E,Cin)
    c1c = params["c1"].T.astype(f32)                                           # (E,1)
    dwkt = (params["dwk"] * params["s2"][0]).reshape(k * k, E).T.astype(f32)   # (E,k*k)
    dwbc = (params["dwb"] * params["s2"] + params["c2"]).T.astype(f32)         # (E,1)
    w3t = (params["w3"] * params["s3"]).T.astype(f32)                          # (Cout,E)
    b3c = (params["pb3"] * params["s3"] + params["c3"]).T.astype(f32)          # (Cout,1)

    # depthwise boundary masks (one per tap), replicated per image on the lane axis
    ii = np.repeat(np.arange(H, dtype=np.int64), W)
    jj = np.tile(np.arange(W, dtype=np.int64), H)
    masks = np.ones((k * k, HW), np.float32)
    mask_all_ones = []
    for dh in range(k):
        for dw in range(k):
            oi, oj = dh - pad, dw - pad
            m = ((ii + oi >= 0) & (ii + oi < H) & (jj + oj >= 0) & (jj + oj < W))
            masks[dh * k + dw] = m.astype(np.float32)
            mask_all_ones.append(bool(m.all()))
    need_masks = not all(mask_all_ones)

    # input: NHWC -> channel-major flat (Cin, B*H*W): lane-dense blocks
    x_ch = jnp.transpose(x, (3, 0, 1, 2)).reshape(Cin, B * HW)

    args = [x_ch, w1t, c1c, dwkt, dwbc]
    if need_masks:
        args.append(jnp.asarray(np.tile(masks, (1, Bblk))))                   # (k*k, L)
    if need_select:
        sel = np.zeros((HW, HWo), np.float32)
        for io in range(Ho):
            for jo in range(Wo):
                sel[(io * stride) * W + jo * stride, io * Wo + jo] = 1.0
        args.append(jnp.asarray(sel))
    if use_se:
        args += [params["wse1"].T.astype(f32), params["bse1"].T.astype(f32),
                 params["wse2"].T.astype(f32), params["bse2"].T.astype(f32)]
    args += [w3t, b3c]

    def full_spec(a):
        nd = a.ndim
        return pl.BlockSpec(a.shape, lambda s, _nd=nd: (0,) * _nd)

    in_specs = [pl.BlockSpec((Cin, L), lambda s: (0, s))]
    in_specs += [full_spec(a) for a in args[1:]]
    out_spec = pl.BlockSpec((Cout, Lo), lambda s: (0, s))

    kernel = make_kernel(Cin=Cin, E=E, W=W, HW=HW, HWo=HWo, Bblk=Bblk, k=k,
                         pad=pad, non_linear=non_linear, use_se=use_se,
                         use_connect=use_connect, need_select=need_select,
                         need_masks=need_masks,
                         mask_all_ones=tuple(mask_all_ones))

    out = pl.pallas_call(
        kernel,
        out_shape=jax.ShapeDtypeStruct((Cout, B * HWo), x.dtype),
        grid_spec=pltpu.PrefetchScalarGridSpec(
            num_scalar_prefetch=0,
            grid=(nsteps,),
            in_specs=in_specs,
            out_specs=out_spec,
        ),
        # grid steps are independent images -> shardable across v7x's two cores
        compiler_params=pltpu.CompilerParams(dimension_semantics=("parallel",)),
    )(*args)

    # back to NHWC (see layout TODO above for production-shape handling)
    return out.reshape(Cout, B, Ho, Wo).transpose(1, 2, 3, 0)


def init_params(key, Cin, Cout, E, k, divide=4):
    """Deterministic synthetic parameters; BatchNorm folded to scale/shift."""
    ks = jax.random.split(key, 12)
    eps = 1e-5

    def u(kk, shape, scale=0.3):
        return (jax.random.uniform(kk, shape, jnp.float32) - 0.5) * 2.0 * scale

    def bn_fold(kk, C):
        k1, k2, k3, k4 = jax.random.split(kk, 4)
        gamma = 1.0 + u(k1, (1, C), 0.1)
        beta = u(k2, (1, C), 0.1)
        mean = u(k3, (1, C), 0.1)
        var = jax.random.uniform(k4, (1, C), jnp.float32, minval=0.5, maxval=1.5)
        scale = gamma / jnp.sqrt(var + eps)
        shift = beta - mean * scale
        return scale, shift

    Er = E // divide
    s1, c1 = bn_fold(ks[1], E)
    s2, c2 = bn_fold(ks[4], E)
    s3, c3 = bn_fold(ks[11], Cout)
    return dict(
        w1=u(ks[0], (Cin, E)),            # 1x1 expand conv weight (bias=False)
        s1=s1, c1=c1,                     # folded BN1
        dwk=u(ks[2], (k, k, E)),          # depthwise kxk weights
        dwb=u(ks[3], (1, E), 0.1),        # depthwise conv bias
        s2=s2, c2=c2,                     # folded BN2
        wse1=u(ks[5], (E, Er)),           # SE dense 1
        bse1=u(ks[6], (1, Er), 0.1),
        wse2=u(ks[7], (Er, E)),           # SE dense 2
        bse2=u(ks[8], (1, E), 0.1),
        w3=u(ks[9], (E, Cout)),           # 1x1 project conv weight (bias=True)
        pb3=u(ks[10], (1, Cout), 0.1),
        s3=s3, c3=c3,                     # folded BN3
    )


def reference(x, p, *, k, stride, non_linear, use_se, use_connect):
    """Pure-JAX reference (same math as the PyTorch MobileBlock, NHWC)."""
    B, H, W, Cin = x.shape
    pad = (k - 1) // 2
    Ho = (H + 2 * pad - k) // stride + 1
    Wo = (W + 2 * pad - k) // stride + 1

    t = jnp.einsum("bhwc,ce->bhwe", x, p["w1"]) * p["s1"][0] + p["c1"][0]
    t = _act(t, non_linear)
    tp = jnp.pad(t, ((0, 0), (pad, pad), (pad, pad), (0, 0)))
    E = p["w1"].shape[1]
    acc = jnp.zeros((B, Ho, Wo, E), jnp.float32)
    for dh in range(k):
        for dw in range(k):
            win = tp[:, dh:dh + stride * (Ho - 1) + 1:stride,
                     dw:dw + stride * (Wo - 1) + 1:stride, :]
            acc = acc + win * p["dwk"][dh, dw]
    d = (acc + p["dwb"][0]) * p["s2"][0] + p["c2"][0]
    if use_se:
        pooled = jnp.mean(d, axis=(1, 2))                          # (B, E)
        h1 = jnp.maximum(pooled @ p["wse1"] + p["bse1"][0], 0.0)
        gate = jnp.clip(h1 @ p["wse2"] + p["bse2"][0] + 3.0, 0.0, 6.0) / 6.0
        d = d * gate[:, None, None, :]
    o = jnp.einsum("bhwe,eo->bhwo", d, p["w3"]) + p["pb3"][0]
    o = o * p["s3"][0] + p["c3"][0]
    o = _act(o, non_linear)
    if use_connect:
        o = o + x
    return o


def _run_case(key, *, B, Cin, Cout, H, W, E, k, stride, non_linear, use_se,
              use_connect):
    kx, kp = jax.random.split(key)
    x = jax.random.normal(kx, (B, H, W, Cin), jnp.float32)          # NHWC
    params = init_params(kp, Cin, Cout, E, k)
    out = jax.block_until_ready(
        mobile_block(x, params, k=k, stride=stride, non_linear=non_linear,
                     use_se=use_se, use_connect=use_connect))
    ref = reference(x, params, k=k, stride=stride, non_linear=non_linear,
                    use_se=use_se, use_connect=use_connect)
    # tolerance allows the host-side BN/SE/bias folding to reassociate f32 math
    np.testing.assert_allclose(np.asarray(out), np.asarray(ref),
                               atol=2e-3, rtol=2e-3)


if __name__ == "__main__":
    key = jax.random.PRNGKey(0)
    k1, k2 = jax.random.split(key)

    # Case 1: MobileBlock(4, 4, kernal_size=3, stride=1, 'HS', SE=True, exp_size=32)
    _run_case(k1, B=2, Cin=4, Cout=4, H=16, W=16, E=32, k=3, stride=1,
              non_linear="HS", use_se=True, use_connect=True)

    # Case 2: exercises stride=2 decimation, SE off, no residual, ReLU.
    _run_case(k2, B=2, Cin=4, Cout=8, H=16, W=16, E=24, k=3, stride=2,
              non_linear="RE", use_se=False, use_connect=False)

    print("KERNEL_OK")
</pallas_src>

<mosaic_0001>
module attributes {stable_mosaic.version = 11 : i64} {
  func.func @kernel(%arg0: i32, %arg1: memref<4x512xf32, #tpu.memory_space<vmem>>, %arg2: memref<32x4xf32, #tpu.memory_space<vmem>>, %arg3: memref<32x1xf32, #tpu.memory_space<vmem>>, %arg4: memref<32x9xf32, #tpu.memory_space<vmem>>, %arg5: memref<32x1xf32, #tpu.memory_space<vmem>>, %arg6: memref<9x512xf32, #tpu.memory_space<vmem>>, %arg7: memref<8x32xf32, #tpu.memory_space<vmem>>, %arg8: memref<8x1xf32, #tpu.memory_space<vmem>>, %arg9: memref<32x8xf32, #tpu.memory_space<vmem>>, %arg10: memref<32x1xf32, #tpu.memory_space<vmem>>, %arg11: memref<4x32xf32, #tpu.memory_space<vmem>>, %arg12: memref<4x1xf32, #tpu.memory_space<vmem>>, %arg13: memref<4x512xf32, #tpu.memory_space<vmem>>) attributes {dimension_semantics = [#tpu.dimension_semantics<parallel>], iteration_bounds = array<i64: 1>, scalar_prefetch = 0 : i64, scratch_operands = 0 : i64, tpu.core_type = #tpu.core_type<tc>, window_params = [{transform_indices = @transform_0, window_bounds = array<i64: 4, 512>}, {pipeline_mode = #tpu.pipeline_mode<synchronous>, transform_indices = @transform_1, window_bounds = array<i64: 32, 4>}, {pipeline_mode = #tpu.pipeline_mode<synchronous>, transform_indices = @transform_2, window_bounds = array<i64: 32, 1>}, {pipeline_mode = #tpu.pipeline_mode<synchronous>, transform_indices = @transform_3, window_bounds = array<i64: 32, 9>}, {pipeline_mode = #tpu.pipeline_mode<synchronous>, transform_indices = @transform_4, window_bounds = array<i64: 32, 1>}, {pipeline_mode = #tpu.pipeline_mode<synchronous>, transform_indices = @transform_5, window_bounds = array<i64: 9, 512>}, {pipeline_mode = #tpu.pipeline_mode<synchronous>, transform_indices = @transform_6, window_bounds = array<i64: 8, 32>}, {pipeline_mode = #tpu.pipeline_mode<synchronous>, transform_indices = @transform_7, window_bounds = array<i64: 8, 1>}, {pipeline_mode = #tpu.pipeline_mode<synchronous>, transform_indices = @transform_8, window_bounds = array<i64: 32, 8>}, {pipeline_mode = #tpu.pipeline_mode<synchronous>, transform_indices = @transform_9, window_bounds = array<i64: 32, 1>}, {pipeline_mode = #tpu.pipeline_mode<synchronous>, transform_indices = @transform_10, window_bounds = array<i64: 4, 32>}, {pipeline_mode = #tpu.pipeline_mode<synchronous>, transform_indices = @transform_11, window_bounds = array<i64: 4, 1>}, {transform_indices = @transform_12, window_bounds = array<i64: 4, 512>}]} {
    %c0 = arith.constant 0 : index
    %c0_0 = arith.constant 0 : index
    %0 = vector.load %arg1[%c0, %c0_0] : memref<4x512xf32, #tpu.memory_space<vmem>>, vector<4x512xf32>
    %c0_1 = arith.constant 0 : index
    %c0_2 = arith.constant 0 : index
    %1 = vector.load %arg2[%c0_1, %c0_2] : memref<32x4xf32, #tpu.memory_space<vmem>>, vector<32x1xf32>
    %2 = vector.extract_strided_slice %0 {offsets = [0, 0], sizes = [1, 512], strides = [1, 1]} : vector<4x512xf32> to vector<1x512xf32>
    %3 = vector.broadcast %1 : vector<32x1xf32> to vector<32x512xf32>
    %4 = vector.broadcast %2 : vector<1x512xf32> to vector<32x512xf32>
    %5 = arith.mulf %3, %4 : vector<32x512xf32>
    %c0_3 = arith.constant 0 : index
    %c1 = arith.constant 1 : index
    %6 = vector.load %arg2[%c0_3, %c1] : memref<32x4xf32, #tpu.memory_space<vmem>>, vector<32x1xf32>
    %7 = vector.extract_strided_slice %0 {offsets = [1, 0], sizes = [1, 512], strides = [1, 1]} : vector<4x512xf32> to vector<1x512xf32>
    %8 = vector.broadcast %6 : vector<32x1xf32> to vector<32x512xf32>
    %9 = vector.broadcast %7 : vector<1x512xf32> to vector<32x512xf32>
    %10 = arith.mulf %8, %9 : vector<32x512xf32>
    %11 = arith.addf %5, %10 : vector<32x512xf32>
    %c0_4 = arith.constant 0 : index
    %c2 = arith.constant 2 : index
    %12 = vector.load %arg2[%c0_4, %c2] : memref<32x4xf32, #tpu.memory_space<vmem>>, vector<32x1xf32>
    %13 = vector.extract_strided_slice %0 {offsets = [2, 0], sizes = [1, 512], strides = [1, 1]} : vector<4x512xf32> to vector<1x512xf32>
    %14 = vector.broadcast %12 : vector<32x1xf32> to vector<32x512xf32>
    %15 = vector.broadcast %13 : vector<1x512xf32> to vector<32x512xf32>
    %16 = arith.mulf %14, %15 : vector<32x512xf32>
    %17 = arith.addf %11, %16 : vector<32x512xf32>
    %c0_5 = arith.constant 0 : index
    %c3 = arith.constant 3 : index
    %18 = vector.load %arg2[%c0_5, %c3] : memref<32x4xf32, #tpu.memory_space<vmem>>, vector<32x1xf32>
    %19 = vector.extract_strided_slice %0 {offsets = [3, 0], sizes = [1, 512], strides = [1, 1]} : vector<4x512xf32> to vector<1x512xf32>
    %20 = vector.broadcast %18 : vector<32x1xf32> to vector<32x512xf32>
    %21 = vector.broadcast %19 : vector<1x512xf32> to vector<32x512xf32>
    %22 = arith.mulf %20, %21 : vector<32x512xf32>
    %23 = arith.addf %17, %22 : vector<32x512xf32>
    %c0_6 = arith.constant 0 : index
    %c0_7 = arith.constant 0 : index
    %24 = vector.load %arg3[%c0_6, %c0_7] : memref<32x1xf32, #tpu.memory_space<vmem>>, vector<32x1xf32>
    %25 = vector.broadcast %24 : vector<32x1xf32> to vector<32x512xf32>
    %26 = arith.addf %23, %25 : vector<32x512xf32>
    %cst = arith.constant 3.000000e+00 : f32
    %27 = vector.broadcast %cst : f32 to vector<32x512xf32>
    %28 = arith.addf %26, %27 : vector<32x512xf32>
    %cst_8 = arith.constant 0.000000e+00 : f32
    %cst_9 = arith.constant 6.000000e+00 : f32
    %29 = vector.broadcast %cst_8 : f32 to vector<32x512xf32>
    %30 = arith.maximumf %29, %28 : vector<32x512xf32>
    %31 = vector.broadcast %cst_9 : f32 to vector<32x512xf32>
    %32 = arith.minimumf %31, %30 : vector<32x512xf32>
    %cst_10 = arith.constant 0.166666672 : f32
    %33 = vector.broadcast %cst_10 : f32 to vector<32x512xf32>
    %34 = arith.mulf %32, %33 : vector<32x512xf32>
    %35 = arith.mulf %26, %34 : vector<32x512xf32>
    %c17_i32 = arith.constant 17 : i32
    %36 = tpu.dynamic_rotate %35 by %c17_i32 dim 1 : vector<32x512xf32>, i32 -> vector<32x512xf32>
    %c0_11 = arith.constant 0 : index
    %c0_12 = arith.constant 0 : index
    %37 = vector.load %arg4[%c0_11, %c0_12] : memref<32x9xf32, #tpu.memory_space<vmem>>, vector<32x1xf32>
    %38 = vector.broadcast %37 : vector<32x1xf32> to vector<32x512xf32>
    %39 = arith.mulf %36, %38 : vector<32x512xf32>
    %c0_13 = arith.constant 0 : index
    %c0_14 = arith.constant 0 : index
    %40 = vector.load %arg6[%c0_13, %c0_14] : memref<9x512xf32, #tpu.memory_space<vmem>>, vector<1x512xf32>
    %41 = vector.broadcast %40 : vector<1x512xf32> to vector<32x512xf32>
    %42 = arith.mulf %39, %41 : vector<32x512xf32>
    %c16_i32 = arith.constant 16 : i32
    %43 = tpu.dynamic_rotate %35 by %c16_i32 dim 1 : vector<32x512xf32>, i32 -> vector<32x512xf32>
    %c0_15 = arith.constant 0 : index
    %c1_16 = arith.constant 1 : index
    %44 = vector.load %arg4[%c0_15, %c1_16] : memref<32x9xf32, #tpu.memory_space<vmem>>, vector<32x1xf32>
    %45 = vector.broadcast %44 : vector<32x1xf32> to vector<32x512xf32>
    %46 = arith.mulf %43, %45 : vector<32x512xf32>
    %c1_17 = arith.constant 1 : index
    %c0_18 = arith.constant 0 : index
    %47 = vector.load %arg6[%c1_17, %c0_18] : memref<9x512xf32, #tpu.memory_space<vmem>>, vector<1x512xf32>
    %48 = vector.broadcast %47 : vector<1x512xf32> to vector<32x512xf32>
    %49 = arith.mulf %46, %48 : vector<32x512xf32>
    %50 = arith.addf %42, %49 : vector<32x512xf32>
    %c15_i32 = arith.constant 15 : i32
    %51 = tpu.dynamic_rotate %35 by %c15_i32 dim 1 : vector<32x512xf32>, i32 -> vector<32x512xf32>
    %c0_19 = arith.constant 0 : index
    %c2_20 = arith.constant 2 : index
    %52 = vector.load %arg4[%c0_19, %c2_20] : memref<32x9xf32, #tpu.memory_space<vmem>>, vector<32x1xf32>
    %53 = vector.broadcast %52 : vector<32x1xf32> to vector<32x512xf32>
    %54 = arith.mulf %51, %53 : vector<32x512xf32>
    %c2_21 = arith.constant 2 : index
    %c0_22 = arith.constant 0 : index
    %55 = vector.load %arg6[%c2_21, %c0_22] : memref<9x512xf32, #tpu.memory_space<vmem>>, vector<1x512xf32>
    %56 = vector.broadcast %55 : vector<1x512xf32> to vector<32x512xf32>
    %57 = arith.mulf %54, %56 : vector<32x512xf32>
    %58 = arith.addf %50, %57 : vector<32x512xf32>
    %c1_i32 = arith.constant 1 : i32
    %59 = tpu.dynamic_rotate %35 by %c1_i32 dim 1 : vector<32x512xf32>, i32 -> vector<32x512xf32>
    %c0_23 = arith.constant 0 : index
    %c3_24 = arith.constant 3 : index
    %60 = vector.load %arg4[%c0_23, %c3_24] : memref<32x9xf32, #tpu.memory_space<vmem>>, vector<32x1xf32>
    %61 = vector.broadcast %60 : vector<32x1xf32> to vector<32x512xf32>
    %62 = arith.mulf %59, %61 : vector<32x512xf32>
    %c3_25 = arith.constant 3 : index
    %c0_26 = arith.constant 0 : index
    %63 = vector.load %arg6[%c3_25, %c0_26] : memref<9x512xf32, #tpu.memory_space<vmem>>, vector<1x512xf32>
    %64 = vector.broadcast %63 : vector<1x512xf32> to vector<32x512xf32>
    %65 = arith.mulf %62, %64 : vector<32x512xf32>
    %66 = arith.addf %58, %65 : vector<32x512xf32>
    %c0_27 = arith.constant 0 : index
    %c4 = arith.constant 4 : index
    %67 = vector.load %arg4[%c0_27, %c4] : memref<32x9xf32, #tpu.memory_space<vmem>>, vector<32x1xf32>
    %68 = vector.broadcast %67 : vector<32x1xf32> to vector<32x512xf32>
    %69 = arith.mulf %35, %68 : vector<32x512xf32>
    %70 = arith.addf %66, %69 : vector<32x512xf32>
    %c511_i32 = arith.constant 511 : i32
    %71 = tpu.dynamic_rotate %35 by %c511_i32 dim 1 : vector<32x512xf32>, i32 -> vector<32x512xf32>
    %c0_28 = arith.constant 0 : index
    %c5 = arith.constant 5 : index
    %72 = vector.load %arg4[%c0_28, %c5] : memref<32x9xf32, #tpu.memory_space<vmem>>, vector<32x1xf32>
    %73 = vector.broadcast %72 : vector<32x1xf32> to vector<32x512xf32>
    %74 = arith.mulf %71, %73 : vector<32x512xf32>
    %c5_29 = arith.constant 5 : index
    %c0_30 = arith.constant 0 : index
    %75 = vector.load %arg6[%c5_29, %c0_30] : memref<9x512xf32, #tpu.memory_space<vmem>>, vector<1x512xf32>
    %76 = vector.broadcast %75 : vector<1x512xf32> to vector<32x512xf32>
    %77 = arith.mulf %74, %76 : vector<32x512xf32>
    %78 = arith.addf %70, %77 : vector<32x512xf32>
    %c497_i32 = arith.constant 497 : i32
    %79 = tpu.dynamic_rotate %35 by %c497_i32 dim 1 : vector<32x512xf32>, i32 -> vector<32x512xf32>
    %c0_31 = arith.constant 0 : index
    %c6 = arith.constant 6 : index
    %80 = vector.load %arg4[%c0_31, %c6] : memref<32x9xf32, #tpu.memory_space<vmem>>, vector<32x1xf32>
    %81 = vector.broadcast %80 : vector<32x1xf32> to vector<32x512xf32>
    %82 = arith.mulf %79, %81 : vector<32x512xf32>
    %c6_32 = arith.constant 6 : index
    %c0_33 = arith.constant 0 : index
    %83 = vector.load %arg6[%c6_32, %c0_33] : memref<9x512xf32, #tpu.memory_space<vmem>>, vector<1x512xf32>
    %84 = vector.broadcast %83 : vector<1x512xf32> to vector<32x512xf32>
    %85 = arith.mulf %82, %84 : vector<32x512xf32>
    %86 = arith.addf %78, %85 : vector<32x512xf32>
    %c496_i32 = arith.constant 496 : i32
    %87 = tpu.dynamic_rotate %35 by %c496_i32 dim 1 : vector<32x512xf32>, i32 -> vector<32x512xf32>
    %c0_34 = arith.constant 0 : index
    %c7 = arith.constant 7 : index
    %88 = vector.load %arg4[%c0_34, %c7] : memref<32x9xf32, #tpu.memory_space<vmem>>, vector<32x1xf32>
    %89 = vector.broadcast %88 : vector<32x1xf32> to vector<32x512xf32>
    %90 = arith.mulf %87, %89 : vector<32x512xf32>
    %c7_35 = arith.constant 7 : index
    %c0_36 = arith.constant 0 : index
    %91 = vector.load %arg6[%c7_35, %c0_36] : memref<9x512xf32, #tpu.memory_space<vmem>>, vector<1x512xf32>
    %92 = vector.broadcast %91 : vector<1x512xf32> to vector<32x512xf32>
    %93 = arith.mulf %90, %92 : vector<32x512xf32>
    %94 = arith.addf %86, %93 : vector<32x512xf32>
    %c495_i32 = arith.constant 495 : i32
    %95 = tpu.dynamic_rotate %35 by %c495_i32 dim 1 : vector<32x512xf32>, i32 -> vector<32x512xf32>
    %c0_37 = arith.constant 0 : index
    %c8 = arith.constant 8 : index
    %96 = vector.load %arg4[%c0_37, %c8] : memref<32x9xf32, #tpu.memory_space<vmem>>, vector<32x1xf32>
    %97 = vector.broadcast %96 : vector<32x1xf32> to vector<32x512xf32>
    %98 = arith.mulf %95, %97 : vector<32x512xf32>
    %c8_38 = arith.constant 8 : index
    %c0_39 = arith.constant 0 : index
    %99 = vector.load %arg6[%c8_38, %c0_39] : memref<9x512xf32, #tpu.memory_space<vmem>>, vector<1x512xf32>
    %100 = vector.broadcast %99 : vector<1x512xf32> to vector<32x512xf32>
    %101 = arith.mulf %98, %100 : vector<32x512xf32>
    %102 = arith.addf %94, %101 : vector<32x512xf32>
    %c0_40 = arith.constant 0 : index
    %c0_41 = arith.constant 0 : index
    %103 = vector.load %arg11[%c0_40, %c0_41] : memref<4x32xf32, #tpu.memory_space<vmem>>, vector<4x32xf32>
    %c0_42 = arith.constant 0 : index
    %c0_43 = arith.constant 0 : index
    %104 = vector.load %arg12[%c0_42, %c0_43] : memref<4x1xf32, #tpu.memory_space<vmem>>, vector<4x1xf32>
    %c0_44 = arith.constant 0 : index
    %c0_45 = arith.constant 0 : index
    %105 = vector.load %arg5[%c0_44, %c0_45] : memref<32x1xf32, #tpu.memory_space<vmem>>, vector<32x1xf32>
    %106 = tpu.iota {dimensions = array<i32: 0>} : vector<32x32xi32>
    %107 = tpu.iota {dimensions = array<i32: 1>} : vector<32x32xi32>
    %108 = arith.cmpi eq, %106, %107 : vector<32x32xi32>
    %109 = vector.extract_strided_slice %102 {offsets = [0, 0], sizes = [32, 256], strides = [1, 1]} : vector<32x512xf32> to vector<32x256xf32>
    %cst_46 = arith.constant dense<0.000000e+00> : vector<32xf32>
    %110 = vector.multi_reduction <add>, %109, %cst_46 [1] : vector<32x256xf32> to vector<32xf32>
    %111 = vector.shape_cast %110 : vector<32xf32> to vector<32x1xf32>
    %cst_47 = arith.constant 2.560000e+02 : f32
    %112 = vector.broadcast %cst_47 : f32 to vector<32x1xf32>
    %113 = arith.divf %111, %112 : vector<32x1xf32>
    %114 = arith.addf %113, %105 : vector<32x1xf32>
    %c0_48 = arith.constant 0 : index
    %c0_49 = arith.constant 0 : index
    %115 = vector.load %arg7[%c0_48, %c0_49] : memref<8x32xf32, #tpu.memory_space<vmem>>, vector<8x32xf32>
    %cst_50 = arith.constant dense<0.000000e+00> : vector<8x1xf32>
    %116 = tpu.matmul %115, %114, %cst_50 {dimension_numbers = #tpu.dot_dimension_numbers<[1], [0], [0], [1], [0, 0, 1, 1], [], []>} : vector<8x32xf32>, vector<32x1xf32>, vector<8x1xf32> -> vector<8x1xf32>
    %c0_51 = arith.constant 0 : index
    %c0_52 = arith.constant 0 : index
    %117 = vector.load %arg8[%c0_51, %c0_52] : memref<8x1xf32, #tpu.memory_space<vmem>>, vector<8x1xf32>
    %118 = arith.addf %116, %117 : vector<8x1xf32>
    %cst_53 = arith.constant 0.000000e+00 : f32
    %119 = vector.broadcast %cst_53 : f32 to vector<8x1xf32>
    %120 = arith.maximumf %118, %119 : vector<8x1xf32>
    %c0_54 = arith.constant 0 : index
    %c0_55 = arith.constant 0 : index
    %121 = vector.load %arg9[%c0_54, %c0_55] : memref<32x8xf32, #tpu.memory_space<vmem>>, vector<32x8xf32>
    %cst_56 = arith.constant dense<0.000000e+00> : vector<32x1xf32>
    %122 = tpu.matmul %121, %120, %cst_56 {dimension_numbers = #tpu.dot_dimension_numbers<[1], [0], [0], [1], [0, 0, 1, 1], [], []>} : vector<32x8xf32>, vector<8x1xf32>, vector<32x1xf32> -> vector<32x1xf32>
    %c0_57 = arith.constant 0 : index
    %c0_58 = arith.constant 0 : index
    %123 = vector.load %arg10[%c0_57, %c0_58] : memref<32x1xf32, #tpu.memory_space<vmem>>, vector<32x1xf32>
    %124 = arith.addf %122, %123 : vector<32x1xf32>
    %cst_59 = arith.constant 3.000000e+00 : f32
    %125 = vector.broadcast %cst_59 : f32 to vector<32x1xf32>
    %126 = arith.addf %124, %125 : vector<32x1xf32>
    %cst_60 = arith.constant 0.000000e+00 : f32
    %cst_61 = arith.constant 6.000000e+00 : f32
    %127 = vector.broadcast %cst_60 : f32 to vector<32x1xf32>
    %128 = arith.maximumf %127, %126 : vector<32x1xf32>
    %129 = vector.broadcast %cst_61 : f32 to vector<32x1xf32>
    %130 = arith.minimumf %129, %128 : vector<32x1xf32>
    %cst_62 = arith.constant 0.166666672 : f32
    %131 = vector.broadcast %cst_62 : f32 to vector<32x1xf32>
    %132 = arith.mulf %130, %131 : vector<32x1xf32>
    %cst_63 = arith.constant 0.000000e+00 : f32
    %133 = vector.shape_cast %132 : vector<32x1xf32> to vector<32x1xf32>
    %134 = vector.broadcast %133 : vector<32x1xf32> to vector<32x32xf32>
    %135 = vector.broadcast %cst_63 : f32 to vector<32x32xf32>
    %136 = arith.select %108, %134, %135 : vector<32x32xi1>, vector<32x32xf32>
    %cst_64 = arith.constant dense<0.000000e+00> : vector<32xf32>
    %137 = vector.multi_reduction <add>, %136, %cst_64 [0] : vector<32x32xf32> to vector<32xf32>
    %138 = vector.shape_cast %137 : vector<32xf32> to vector<1x32xf32>
    %139 = vector.broadcast %138 : vector<1x32xf32> to vector<4x32xf32>
    %140 = arith.mulf %103, %139 : vector<4x32xf32>
    %cst_65 = arith.constant dense<0.000000e+00> : vector<4x1xf32>
    %141 = tpu.matmul %140, %105, %cst_65 {dimension_numbers = #tpu.dot_dimension_numbers<[1], [0], [0], [1], [0, 0, 1, 1], [], []>} : vector<4x32xf32>, vector<32x1xf32>, vector<4x1xf32> -> vector<4x1xf32>
    %142 = arith.addf %141, %104 : vector<4x1xf32>
    %cst_66 = arith.constant dense<0.000000e+00> : vector<4x256xf32>
    %143 = tpu.matmul %140, %109, %cst_66 {dimension_numbers = #tpu.dot_dimension_numbers<[1], [0], [0], [1], [0, 0, 1, 1], [], []>} : vector<4x32xf32>, vector<32x256xf32>, vector<4x256xf32> -> vector<4x256xf32>
    %144 = vector.broadcast %142 : vector<4x1xf32> to vector<4x256xf32>
    %145 = arith.addf %143, %144 : vector<4x256xf32>
    %cst_67 = arith.constant 3.000000e+00 : f32
    %146 = vector.broadcast %cst_67 : f32 to vector<4x256xf32>
    %147 = arith.addf %145, %146 : vector<4x256xf32>
    %cst_68 = arith.constant 0.000000e+00 : f32
    %cst_69 = arith.constant 6.000000e+00 : f32
    %148 = vector.broadcast %cst_68 : f32 to vector<4x256xf32>
    %149 = arith.maximumf %148, %147 : vector<4x256xf32>
    %150 = vector.broadcast %cst_69 : f32 to vector<4x256xf32>
    %151 = arith.minimumf %150, %149 : vector<4x256xf32>
    %cst_70 = arith.constant 0.166666672 : f32
    %152 = vector.broadcast %cst_70 : f32 to vector<4x256xf32>
    %153 = arith.mulf %151, %152 : vector<4x256xf32>
    %154 = arith.mulf %145, %153 : vector<4x256xf32>
    %155 = vector.extract_strided_slice %0 {offsets = [0, 0], sizes = [4, 256], strides = [1, 1]} : vector<4x512xf32> to vector<4x256xf32>
    %156 = arith.addf %154, %155 : vector<4x256xf32>
    %c0_71 = arith.constant 0 : index
    %c0_72 = arith.constant 0 : index
    %157 = vector.load %arg13[%c0_71, %c0_72] : memref<4x512xf32, #tpu.memory_space<vmem>>, vector<4x256xf32>
    tpu.vector_store %arg13[%c0_71, %c0_72], %156 {strides = array<i32>} : memref<4x512xf32, #tpu.memory_space<vmem>>, vector<4x256xf32>,
    %158 = vector.extract_strided_slice %102 {offsets = [0, 256], sizes = [32, 256], strides = [1, 1]} : vector<32x512xf32> to vector<32x256xf32>
    %cst_73 = arith.constant dense<0.000000e+00> : vector<32xf32>
    %159 = vector.multi_reduction <add>, %158, %cst_73 [1] : vector<32x256xf32> to vector<32xf32>
    %160 = vector.shape_cast %159 : vector<32xf32> to vector<32x1xf32>
    %cst_74 = arith.constant 2.560000e+02 : f32
    %161 = vector.broadcast %cst_74 : f32 to vector<32x1xf32>
    %162 = arith.divf %160, %161 : vector<32x1xf32>
    %163 = arith.addf %162, %105 : vector<32x1xf32>
    %c0_75 = arith.constant 0 : index
    %c0_76 = arith.constant 0 : index
    %164 = vector.load %arg7[%c0_75, %c0_76] : memref<8x32xf32, #tpu.memory_space<vmem>>, vector<8x32xf32>
    %cst_77 = arith.constant dense<0.000000e+00> : vector<8x1xf32>
    %165 = tpu.matmul %164, %163, %cst_77 {dimension_numbers = #tpu.dot_dimension_numbers<[1], [0], [0], [1], [0, 0, 1, 1], [], []>} : vector<8x32xf32>, vector<32x1xf32>, vector<8x1xf32> -> vector<8x1xf32>
    %c0_78 = arith.constant 0 : index
    %c0_79 = arith.constant 0 : index
    %166 = vector.load %arg8[%c0_78, %c0_79] : memref<8x1xf32, #tpu.memory_space<vmem>>, vector<8x1xf32>
    %167 = arith.addf %165, %166 : vector<8x1xf32>
    %cst_80 = arith.constant 0.000000e+00 : f32
    %168 = vector.broadcast %cst_80 : f32 to vector<8x1xf32>
    %169 = arith.maximumf %167, %168 : vector<8x1xf32>
    %c0_81 = arith.constant 0 : index
    %c0_82 = arith.constant 0 : index
    %170 = vector.load %arg9[%c0_81, %c0_82] : memref<32x8xf32, #tpu.memory_space<vmem>>, vector<32x8xf32>
    %cst_83 = arith.constant dense<0.000000e+00> : vector<32x1xf32>
    %171 = tpu.matmul %170, %169, %cst_83 {dimension_numbers = #tpu.dot_dimension_numbers<[1], [0], [0], [1], [0, 0, 1, 1], [], []>} : vector<32x8xf32>, vector<8x1xf32>, vector<32x1xf32> -> vector<32x1xf32>
    %c0_84 = arith.constant 0 : index
    %c0_85 = arith.constant 0 : index
    %172 = vector.load %arg10[%c0_84, %c0_85] : memref<32x1xf32, #tpu.memory_space<vmem>>, vector<32x1xf32>
    %173 = arith.addf %171, %172 : vector<32x1xf32>
    %cst_86 = arith.constant 3.000000e+00 : f32
    %174 = vector.broadcast %cst_86 : f32 to vector<32x1xf32>
    %175 = arith.addf %173, %174 : vector<32x1xf32>
    %cst_87 = arith.constant 0.000000e+00 : f32
    %cst_88 = arith.constant 6.000000e+00 : f32
    %176 = vector.broadcast %cst_87 : f32 to vector<32x1xf32>
    %177 = arith.maximumf %176, %175 : vector<32x1xf32>
    %178 = vector.broadcast %cst_88 : f32 to vector<32x1xf32>
    %179 = arith.minimumf %178, %177 : vector<32x1xf32>
    %cst_89 = arith.constant 0.166666672 : f32
    %180 = vector.broadcast %cst_89 : f32 to vector<32x1xf32>
    %181 = arith.mulf %179, %180 : vector<32x1xf32>
    %cst_90 = arith.constant 0.000000e+00 : f32
    %182 = vector.shape_cast %181 : vector<32x1xf32> to vector<32x1xf32>
    %183 = vector.broadcast %182 : vector<32x1xf32> to vector<32x32xf32>
    %184 = vector.broadcast %cst_90 : f32 to vector<32x32xf32>
    %185 = arith.select %108, %183, %184 : vector<32x32xi1>, vector<32x32xf32>
    %cst_91 = arith.constant dense<0.000000e+00> : vector<32xf32>
    %186 = vector.multi_reduction <add>, %185, %cst_91 [0] : vector<32x32xf32> to vector<32xf32>
    %187 = vector.shape_cast %186 : vector<32xf32> to vector<1x32xf32>
    %188 = vector.broadcast %187 : vector<1x32xf32> to vector<4x32xf32>
    %189 = arith.mulf %103, %188 : vector<4x32xf32>
    %cst_92 = arith.constant dense<0.000000e+00> : vector<4x1xf32>
    %190 = tpu.matmul %189, %105, %cst_92 {dimension_numbers = #tpu.dot_dimension_numbers<[1], [0], [0], [1], [0, 0, 1, 1], [], []>} : vector<4x32xf32>, vector<32x1xf32>, vector<4x1xf32> -> vector<4x1xf32>
    %191 = arith.addf %190, %104 : vector<4x1xf32>
    %cst_93 = arith.constant dense<0.000000e+00> : vector<4x256xf32>
    %192 = tpu.matmul %189, %158, %cst_93 {dimension_numbers = #tpu.dot_dimension_numbers<[1], [0], [0], [1], [0, 0, 1, 1], [], []>} : vector<4x32xf32>, vector<32x256xf32>, vector<4x256xf32> -> vector<4x256xf32>
    %193 = vector.broadcast %191 : vector<4x1xf32> to vector<4x256xf32>
    %194 = arith.addf %192, %193 : vector<4x256xf32>
    %cst_94 = arith.constant 3.000000e+00 : f32
    %195 = vector.broadcast %cst_94 : f32 to vector<4x256xf32>
    %196 = arith.addf %194, %195 : vector<4x256xf32>
    %cst_95 = arith.constant 0.000000e+00 : f32
    %cst_96 = arith.constant 6.000000e+00 : f32
    %197 = vector.broadcast %cst_95 : f32 to vector<4x256xf32>
    %198 = arith.maximumf %197, %196 : vector<4x256xf32>
    %199 = vector.broadcast %cst_96 : f32 to vector<4x256xf32>
    %200 = arith.minimumf %199, %198 : vector<4x256xf32>
    %cst_97 = arith.constant 0.166666672 : f32
    %201 = vector.broadcast %cst_97 : f32 to vector<4x256xf32>
    %202 = arith.mulf %200, %201 : vector<4x256xf32>
    %203 = arith.mulf %194, %202 : vector<4x256xf32>
    %204 = vector.extract_strided_slice %0 {offsets = [0, 256], sizes = [4, 256], strides = [1, 1]} : vector<4x512xf32> to vector<4x256xf32>
    %205 = arith.addf %203, %204 : vector<4x256xf32>
    %c0_98 = arith.constant 0 : index
    %c256 = arith.constant 256 : index
    %206 = vector.load %arg13[%c0_98, %c256] : memref<4x512xf32, #tpu.memory_space<vmem>>, vector<4x256xf32>
    tpu.vector_store %arg13[%c0_98, %c256], %205 {strides = array<i32>} : memref<4x512xf32, #tpu.memory_space<vmem>>, vector<4x256xf32>,
    return
  }
  func.func @transform_0(%arg0: i32) -> (i32, i32) {
    %c0_i32 = arith.constant 0 : i32
    %c0_i32_0 = arith.constant 0 : i32
    return %c0_i32, %arg0 : i32, i32
  }
  func.func @transform_1(%arg0: i32) -> (i32, i32) {
    %c0_i32 = arith.constant 0 : i32
    %c0_i32_0 = arith.constant 0 : i32
    %c0_i32_1 = arith.constant 0 : i32
    return %c0_i32, %c0_i32_0 : i32, i32
  }
  func.func @transform_2(%arg0: i32) -> (i32, i32) {
    %c0_i32 = arith.constant 0 : i32
    %c0_i32_0 = arith.constant 0 : i32
    %c0_i32_1 = arith.constant 0 : i32
    return %c0_i32, %c0_i32_0 : i32, i32
  }
  func.func @transform_3(%arg0: i32) -> (i32, i32) {
    %c0_i32 = arith.constant 0 : i32
    %c0_i32_0 = arith.constant 0 : i32
    %c0_i32_1 = arith.constant 0 : i32
    return %c0_i32, %c0_i32_0 : i32, i32
  }
  func.func @transform_4(%arg0: i32) -> (i32, i32) {
    %c0_i32 = arith.constant 0 : i32
    %c0_i32_0 = arith.constant 0 : i32
    %c0_i32_1 = arith.constant 0 : i32
    return %c0_i32, %c0_i32_0 : i32, i32
  }
  func.func @transform_5(%arg0: i32) -> (i32, i32) {
    %c0_i32 = arith.constant 0 : i32
    %c0_i32_0 = arith.constant 0 : i32
    %c0_i32_1 = arith.constant 0 : i32
    return %c0_i32, %c0_i32_0 : i32, i32
  }
  func.func @transform_6(%arg0: i32) -> (i32, i32) {
    %c0_i32 = arith.constant 0 : i32
    %c0_i32_0 = arith.constant 0 : i32
    %c0_i32_1 = arith.constant 0 : i32
    return %c0_i32, %c0_i32_0 : i32, i32
  }
  func.func @transform_7(%arg0: i32) -> (i32, i32) {
    %c0_i32 = arith.constant 0 : i32
    %c0_i32_0 = arith.constant 0 : i32
    %c0_i32_1 = arith.constant 0 : i32
    return %c0_i32, %c0_i32_0 : i32, i32
  }
  func.func @transform_8(%arg0: i32) -> (i32, i32) {
    %c0_i32 = arith.constant 0 : i32
    %c0_i32_0 = arith.constant 0 : i32
    %c0_i32_1 = arith.constant 0 : i32
    return %c0_i32, %c0_i32_0 : i32, i32
  }
  func.func @transform_9(%arg0: i32) -> (i32, i32) {
    %c0_i32 = arith.constant 0 : i32
    %c0_i32_0 = arith.constant 0 : i32
    %c0_i32_1 = arith.constant 0 : i32
    return %c0_i32, %c0_i32_0 : i32, i32
  }
  func.func @transform_10(%arg0: i32) -> (i32, i32) {
    %c0_i32 = arith.constant 0 : i32
    %c0_i32_0 = arith.constant 0 : i32
    %c0_i32_1 = arith.constant 0 : i32
    return %c0_i32, %c0_i32_0 : i32, i32
  }
  func.func @transform_11(%arg0: i32) -> (i32, i32) {
    %c0_i32 = arith.constant 0 : i32
    %c0_i32_0 = arith.constant 0 : i32
    %c0_i32_1 = arith.constant 0 : i32
    return %c0_i32, %c0_i32_0 : i32, i32
  }
  func.func @transform_12(%arg0: i32) -> (i32, i32) {
    %c0_i32 = arith.constant 0 : i32
    %c0_i32_0 = arith.constant 0 : i32
    return %c0_i32, %arg0 : i32, i32
  }
}

</mosaic_0001>

<bundles_post_ra>
// kernel: tpu_custom_call.1
= control target key start
LH: loop header
LB: loop body
LE: loop exit
PB: predicated region body
PF: predicated region fallthrough
CT: control target
= control target key end

     0   :  { %v2737_v1 = vmov 1   ;;  %v5022_v2 = vmov 0   ;;  %s5008_s0 = inlined_call_operand.vmem [shape: f32[4,512], index: 0, kind: input, shape index: {}]   ;;  %s5009_s1 = inlined_call_operand.vmem [shape: f32[32,4], index: 1, kind: input, shape index: {}]   ;;  %s5010_s2 = inlined_call_operand.vmem [shape: f32[32,1], index: 2, kind: input, shape index: {}]   ;;  %s5011_s3 = inlined_call_operand.vmem [shape: f32[32,9], index: 3, kind: input, shape index: {}]   ;;  %s5012_s4 = inlined_call_operand.vmem [shape: f32[32,1], index: 4, kind: input, shape index: {}]   ;;  %s5013_s5 = inlined_call_operand.vmem [shape: f32[9,512], index: 5, kind: input, shape index: {}]   ;;  %s5014_s6 = inlined_call_operand.vmem [shape: f32[8,32], index: 6, kind: input, shape index: {}]   ;;  %s5015_s7 = inlined_call_operand.vmem [shape: f32[8,1], index: 7, kind: input, shape index: {}]   ;;  %s5016_s8 = inlined_call_operand.vmem [shape: f32[32,8], index: 8, kind: input, shape index: {}]   ;;  %s5017_s9 = inlined_call_operand.vmem [shape: f32[32,1], index: 9, kind: input, shape index: {}]   ;;  %s5018_s10 = inlined_call_operand.vmem [shape: f32[4,32], index: 10, kind: input, shape index: {}]   ;;  %s5019_s11 = inlined_call_operand.vmem [shape: f32[4,1], index: 11, kind: input, shape index: {}]   ;;  %s5020_s12 = inlined_call_operand.hbm [shape: f32[4,512], index: 12, kind: output, shape index: {}]  }
   0x1   :  { %v44_v0 = vld [vmem:[%s5009_s1] sm:$0xff]  ;;  %2674 = vset.pattern.permute.xlu1 %v2737_v1  ;;  %2673 = vset.pattern.permute.xlu0 %v5022_v2  ;;  %v45_v3 = vld [vmem:[%s5009_s1 + $0x8] sm:$0xff] }
   0x2   :  { %123 = vperm.xlu1 %2674, %v44_v0   ;;  %50 = vperm.xlu0 %2673, %v44_v0  }
   0x3   :  { %17 = vsyncpa [#allocation3], 0  ;;  %v47_v4 = vld [vmem:[%s5009_s1 + $0x18] sm:$0xff]  ;;  %v2739_v5 = vmov 2   ;;  %v374_v6 = vld [vmem:[%s5010_s2] sm:$0xff]  ;;  %v2740_v11 = vmov 3   ;;  %v5021_v27 = vlaneseq }
   0x4   :  { %v46_v7 = vld [vmem:[%s5009_s1 + $0x10] sm:$0xff]  ;;  %v377_v8 = vld [vmem:[%s5010_s2 + $0x18] sm:$0xff]  ;;  %v2846_v9 = vld [vmem:[%s5011_s3 + $0x8] sm:$0xff]  ;;  %v5026_v15 = vmov 4   ;;  %v5027_v17 = vmov 5   ;;  %v5024_v25 = vmov 6  }
   0x5   :  { %5231 = vst [vmem:[#allocation5_spill] sm:$0xff] %v2846_v9  ;;  %v2852_v10 = vld [vmem:[%s5011_s3 + $0x18] sm:$0xff]  ;;  %v2858_v12 = vld [vmem:[%s5011_s3 + $0x10] sm:$0xff]  ;;  %v375_v13 = vld [vmem:[%s5010_s2 + $0x8] sm:$0xff]  ;;  %v2913_v30 = vshrl.u32 %v5021_v27, 7  ;;  %s2744_s28 = smov 17  }
   0x6   :  { %127 = vperm.xlu1 %2674, %v45_v3   ;;  %55 = vperm.xlu0 %2673, %v45_v3   ;;  %5232 = vst [vmem:[#allocation6_spill] sm:$0xff] %v2852_v10  ;;  %v376_v14 = vld [vmem:[%s5010_s2 + $0x10] sm:$0xff]  ;;  %v2873_v16 = vld [vmem:[%s5011_s3] sm:$0xff]  ;;  %v2935_v39 = vld [vmem:[%s5008_s0 + $0x8] sm:$0xff]  ;;  %s2745_s29 = smov 16   ;;  %s2746_s30 = smov 15  }
   0x7   :  { %5236 = vst [vmem:[#allocation10_spill] sm:$0xff] %v2913_v30  ;;  %v2920_v33 = vsub.s32 1, %v2913_v30  ;;  %v144_v34 = vsub.s32 5, %v2913_v30  ;;  %v2924_v35 = vsub.s32 0, %v2913_v30  ;;  %v76_v36 = vsub.s32 4, %v2913_v30  ;;  %v42_v38 = vld [vmem:[%s5008_s0] sm:$0xff] }
   0x8   :  { %v2938_v40 = vsub.s32 2, %v2913_v30  ;;  %v228_v41 = vsub.s32 6, %v2913_v30  ;;  %v2952_v53 = vsub.s32 3, %v2913_v30  ;;  %v312_v60 = vsub.s32 7, %v2913_v30  ;;  %s2747_s13 = smov 1   ;;  %s2749_s14 = smov 127  }
   0x9   :  { %v141_v43 = vrot.slane %v42_v38, %v2920_v33  ;;  %v145_v44 = vrot.slane %v42_v38, %v144_v34  ;;  %v73_v45 = vrot.slane %v42_v38, %v2924_v35  ;;  %v77_v46 = vrot.slane %v42_v38, %v76_v36  ;;  %s2750_s15 = smov 113   ;;  %s2752_s16 = smov 112  }
   0xa   :  { %2675 = vset.pattern.permute.xlu1 %v2739_v5  ;;  %65 = vperm.xlu0 %2673, %v47_v4   ;;  %5239 = vst [vmem:[#allocation13_spill] sm:$0xff] %v2938_v40  ;;  %v153_v47 = vrot.slane %v2935_v39, %v144_v34  ;;  %v85_v48 = vrot.slane %v2935_v39, %v76_v36  ;;  %5240 = vst [vmem:[#allocation14_spill] sm:$0xff] %v2952_v53  ;;  %s2753_s1 = smov 111   ;;  %vm2755_vm8 = vmmov 0   ;;  %vm1661_vm9 = vcmask 261120  }
   0xb   :  { %211 = vperm.xlu1 %2675, %v45_v3   ;;  %v225_v50 = vrot.slane %v42_v38, %v2938_v40  ;;  %v229_v51 = vrot.slane %v42_v38, %v228_v41  ;;  %v237_v52 = vrot.slane %v2935_v39, %v228_v41  ;;  %v2955_v54 = vrot.slane %v141_v43, %v2920_v33 }
   0xc   :  { %v2958_v55 = vrot.slane %v145_v44, %v2920_v33  ;;  %v2961_v56 = vrot.slane %v73_v45, %v2924_v35  ;;  %v2964_v57 = vrot.slane %v77_v46, %v2924_v35  ;;  %v2967_v58 = vrot.slane %v153_v47, %v2920_v33 }
   0xd   :  { %v2970_v59 = vrot.slane %v85_v48, %v2924_v35  ;;  %v2978_v63 = vrot.slane %v225_v50, %v2938_v40  ;;  %vm1744_vm10 = vcmask 64512  }
   0xe   :  { %380 = vperm.xlu0 %2673, %v374_v6  }
   0xf   :  { %2676 = vset.pattern.permute.xlu1 %v5022_v2 }
  0x10   :  { %60 = vperm.xlu1 %2676, %v46_v7  }
  0x12   :  { %395 = vperm.xlu0 %2673, %v377_v8  }
  0x14   :  { %2677 = vset.pattern.permute.xlu1 %v2737_v1 }
  0x15   :  { %131 = vperm.xlu1 %2677, %v46_v7  }
  0x16   :  { %2683 = vset.pattern.permute.xlu0 %v2737_v1 }
  0x17   :  { %677 = vperm.xlu0 %2683, %v2846_v9  }
  0x19   :  { %135 = vperm.xlu1 %2677, %v47_v4  }
  0x1b   :  { %685 = vperm.xlu0 %2683, %v2852_v10  }
  0x1d   :  { %2678 = vset.pattern.permute.xlu1 %v2740_v11 }
  0x1e   :  { %295 = vperm.xlu1 %2678, %v45_v3   ;;  %v309_v3 = vrot.slane %v42_v38, %v2952_v53 }
  0x1f   :  { %2687 = vset.pattern.permute.xlu0 %v2739_v5 }
  0x20   :  { %207 = vperm.xlu0 %2687, %v44_v0  }
  0x22   :  { %2679 = vset.pattern.permute.xlu1 %v2739_v5 }
  0x23   :  { %215 = vperm.xlu1 %2679, %v46_v7  }
  0x24   :  { %219 = vperm.xlu0 %2687, %v47_v4  }
  0x27   :  { %2680 = vset.pattern.permute.xlu1 %v2740_v11 }
  0x28   :  { %299 = vperm.xlu1 %2680, %v46_v7   ;;  %817 = vperm.xlu0 %2687, %v2858_v12  }
  0x2c   :  { %303 = vperm.xlu1 %2680, %v47_v4   ;;  %2689 = vset.pattern.permute.xlu0 %v2740_v11 }
  0x2d   :  { %291 = vperm.xlu0 %2689, %v44_v0   ;;  %v2981_v0 = vrot.slane %v229_v51, %v2938_v40 }
  0x30   :  { %2681 = vset.pattern.permute.xlu1 %v5022_v2 }
  0x31   :  { %385 = vperm.xlu1 %2681, %v375_v13   ;;  %957 = vperm.xlu0 %2689, %v2852_v10   ;;  %v313_v13 = vrot.slane %v42_v38, %v312_v60  ;;  %v3011_v38 = vrot.slane %v309_v3, %v2952_v53 }
  0x33   :  { %v3014_v48 = vrot.slane %v313_v13, %v2952_v53 }
  0x35   :  { %390 = vperm.xlu1 %2681, %v376_v14   ;;  %2695 = vset.pattern.permute.xlu0 %v5026_v15  ;;  %v321_v14 = vrot.slane %v2935_v39, %v312_v60 }
  0x37   :  { %v3017_v50 = vrot.slane %v321_v14, %v2952_v53 }
  0x39   :  { %551 = vperm.xlu1 %2681, %v2873_v16  }
  0x3d   :  { %2682 = vset.pattern.permute.xlu1 %v2737_v1 }
  0x3e   :  { %673 = vperm.xlu1 %2682, %v2873_v16  }
  0x42   :  { %2684 = vset.pattern.permute.xlu1 %v2739_v5 }
  0x43   :  { %809 = vperm.xlu1 %2684, %v2873_v16  }
  0x47   :  { %813 = vperm.xlu1 %2684, %v2846_v9  }
  0x4b   :  { %2685 = vset.pattern.permute.xlu1 %v5022_v2 }
  0x4c   :  { %566 = vperm.xlu1 %2685, %v2852_v10  }
  0x50   :  { %2686 = vset.pattern.permute.xlu1 %v2737_v1  ;;  %v2984_v1 = vrot.slane %v237_v52, %v2938_v40 }
  0x51   :  { %681 = vperm.xlu1 %2686, %v2858_v12  }
  0x55   :  { %2688 = vset.pattern.permute.xlu1 %v2740_v11 }
  0x56   :  { %945 = vperm.xlu1 %2688, %v2873_v16  }
  0x5a   :  { %949 = vperm.xlu1 %2688, %v2846_v9  }
  0x5e   :  { %2690 = vset.pattern.permute.xlu1 %v2739_v5 }
  0x5f   :  { %821 = vperm.xlu1 %2690, %v2852_v10  }
  0x63   :  { %2691 = vset.pattern.permute.xlu1 %v2740_v11 }
  0x64   :  { %953 = vperm.xlu1 %2691, %v2858_v12  }
  0x68   :  { %2692 = vset.pattern.permute.xlu1 %v5026_v15 }
  0x69   :  { %1032 = vperm.xlu1 %2692, %v2873_v16  }
  0x6d   :  { %1036 = vperm.xlu1 %2692, %v2846_v9  }
  0x71   :  { %2693 = vset.pattern.permute.xlu1 %v5027_v17 }
  0x72   :  { %1133 = vperm.xlu1 %2693, %v2846_v9  }
  0x76   :  { %2694 = vset.pattern.permute.xlu1 %v5024_v25 }
  0x81   :  { %v2891_v18 = vpop.permute.xlu1 %123  ;;  %v2893_v19 = vpop.permute.xlu0 %50 }
  0x82   :  { %v174_v4 = vmul.f32 %v2955_v54, %v2891_v18  ;;  %v175_v5 = vmul.f32 %v2958_v55, %v2891_v18  ;;  %v106_v6 = vmul.f32 %v2961_v56, %v2893_v19  ;;  %v107_v7 = vmul.f32 %v2964_v57, %v2893_v19 }
  0x83   :  { %v177_v8 = vmul.f32 %v2967_v58, %v2891_v18  ;;  %v109_v11 = vmul.f32 %v2970_v59, %v2893_v19 }
  0x84   :  { %v190_v45 = vadd.f32 %v174_v4, %v106_v6  ;;  %v191_v46 = vadd.f32 %v175_v5, %v107_v7 }
  0x85   :  { %v2895_v20 = vpop.permute.xlu1 %127  ;;  %v2897_v21 = vpop.permute.xlu0 %55  ;;  %v193_v47 = vadd.f32 %v177_v8, %v109_v11 }
  0x86   :  { %5233 = vst [vmem:[#allocation7_spill] sm:$0xff] %v2895_v20  ;;  %5234 = vst [vmem:[#allocation8_spill] sm:$0xff] %v2897_v21  ;;  %v178_v5 = vmul.f32 %v2955_v54, %v2895_v20  ;;  %v179_v6 = vmul.f32 %v2958_v55, %v2895_v20  ;;  %v110_v7 = vmul.f32 %v2961_v56, %v2897_v21 }
  0x87   :  { %v111_v8 = vmul.f32 %v2964_v57, %v2897_v21 }
  0x89   :  { %v2899_v22 = vpop.permute.xlu0 %65 }
  0x8a   :  { %v2901_v23 = vpop.permute.xlu1 %211 }
  0x8d   :  { %v2903_v24 = vpop.permute.xlu0 %380 }
  0x8e   :  { %5235 = vst [vmem:[#allocation9_spill] sm:$0xff] %v2903_v24 }
  0x8f   :  { %v2906_v26 = vpop.permute.xlu1 %60 }
  0x91   :  { %v2908_v28 = vpop.permute.xlu0 %395 }
  0x94   :  { %v2910_v29 = vpop.permute.xlu1 %131 }
  0x96   :  { %v2915_v31 = vpop.permute.xlu0 %677 }
  0x97   :  { %5237 = vst [vmem:[#allocation11_spill] sm:$0xff] %v2915_v31 }
  0x98   :  { %v2917_v32 = vpop.permute.xlu1 %135 }
  0x9a   :  { %v2927_v37 = vpop.permute.xlu0 %685 }
  0x9b   :  { %5238 = vst [vmem:[#allocation12_spill] sm:$0xff] %v2927_v37 }
  0x9d   :  { %v2941_v42 = vpop.permute.xlu1 %295 }
  0x9f   :  { %v2947_v49 = vpop.permute.xlu0 %207 }
  0xa0   :  { %v258_v36 = vmul.f32 %v2978_v63, %v2947_v49  ;;  %v259_v41 = vmul.f32 %v2981_v0, %v2947_v49  ;;  %v261_v43 = vmul.f32 %v2984_v1, %v2947_v49 }
  0xa2   :  { %v2973_v61 = vpop.permute.xlu1 %215  ;;  %v274_v51 = vadd.f32 %v258_v36, %v190_v45  ;;  %v275_v52 = vadd.f32 %v259_v41, %v191_v46  ;;  %v277_v27 = vadd.f32 %v261_v43, %v193_v47  ;;  %v181_v41 = vmul.f32 %v2967_v58, %v2895_v20 }
  0xa3   :  { %v2975_v62 = vpop.permute.xlu0 %219  ;;  %v262_v43 = vmul.f32 %v2978_v63, %v2901_v23  ;;  %v263_v45 = vmul.f32 %v2981_v0, %v2901_v23 }
  0xa7   :  { %v3000_v34 = vpop.permute.xlu0 %817  ;;  %v3008_v44 = vpop.permute.xlu1 %299 }
  0xa8   :  { %5241 = vst [vmem:[#allocation15_spill] sm:$0xff] %v3000_v34 }
  0xab   :  { %v3035_v11 = vpop.permute.xlu1 %303 }
  0xac   :  { %v3019_v60 = vpop.permute.xlu0 %291 }
  0xad   :  { %v342_v2 = vmul.f32 %v3011_v38, %v3019_v60  ;;  %v343_v4 = vmul.f32 %v3014_v48, %v3019_v60  ;;  %v345_v3 = vmul.f32 %v3017_v50, %v3019_v60 }
  0xaf   :  { %v358_v13 = vadd.f32 %v342_v2, %v274_v51  ;;  %v359_v14 = vadd.f32 %v343_v4, %v275_v52  ;;  %v361_v36 = vadd.f32 %v345_v3, %v277_v27  ;;  %v113_v2 = vmul.f32 %v2970_v59, %v2897_v21 }
  0xb0   :  { %v194_v51 = vadd.f32 %v178_v5, %v110_v7  ;;  %v195_v27 = vadd.f32 %v179_v6, %v111_v8  ;;  %v346_v52 = vmul.f32 %v3011_v38, %v2941_v42  ;;  %v347_v4 = vmul.f32 %v3014_v48, %v2941_v42  ;;  %v3054_v34 = vpop.permute.xlu1 %385 }
  0xb1   :  { %v398_v46 = vadd.f32 %v2903_v24, %v358_v13  ;;  %v399_v47 = vadd.f32 %v2903_v24, %v359_v14  ;;  %v401_v25 = vadd.f32 %v2903_v24, %v361_v36  ;;  %v265_v13 = vmul.f32 %v2984_v1, %v2901_v23 }
  0xb2   :  { %v278_v14 = vadd.f32 %v262_v43, %v194_v51  ;;  %v279_v30 = vadd.f32 %v263_v45, %v195_v27  ;;  %v197_v5 = vadd.f32 %v181_v41, %v113_v2  ;;  %v349_v6 = vmul.f32 %v3017_v50, %v2941_v42 }
  0xb3   :  { %v414_v3 = vadd.f32 3.0, %v398_v46  ;;  %v415_v15 = vadd.f32 3.0, %v399_v47  ;;  %v417_v17 = vadd.f32 3.0, %v401_v25 }
  0xb4   :  { %v362_v7 = vadd.f32 %v346_v52, %v278_v14  ;;  %v363_v20 = vadd.f32 %v347_v4, %v279_v30  ;;  %v281_v24 = vadd.f32 %v265_v13, %v197_v5  ;;  %v270_v52 = vmul.f32 %v2978_v63, %v2975_v62 }
  0xb5   :  { %v430_v36 = vmax.f32 %v414_v3, 0.0  ;;  %v431_v37 = vmax.f32 %v415_v15, 0.0  ;;  %v433_v8 = vmax.f32 %v417_v17, 0.0  ;;  %v187_v14 = vmul.f32 %v2958_v55, %v2917_v32 }
  0xb6   :  { %v402_v9 = vadd.f32 %v3054_v34, %v362_v7  ;;  %v403_v43 = vadd.f32 %v3054_v34, %v363_v20  ;;  %v365_v45 = vadd.f32 %v349_v6, %v281_v24 }
  0xb7   :  { %v446_v31 = vmin.f32 %v430_v36, 6.0  ;;  %v447_v21 = vmin.f32 %v431_v37, 6.0  ;;  %v449_v51 = vmin.f32 %v433_v8, 6.0 }
  0xb8   :  { %v405_v41 = vadd.f32 %v3054_v34, %v365_v45  ;;  %v418_v2 = vadd.f32 3.0, %v402_v9  ;;  %v419_v3 = vadd.f32 3.0, %v403_v43  ;;  %v119_v45 = vmul.f32 %v2964_v57, %v2899_v22 }
  0xb9   :  { %v462_v10 = vmul.f32 0.16666667, %v446_v31  ;;  %v463_v15 = vmul.f32 0.16666667, %v447_v21  ;;  %v186_v31 = vmul.f32 %v2955_v54, %v2917_v32  ;;  %v465_v37 = vmul.f32 0.16666667, %v449_v51 }
  0xba   :  { %v421_v17 = vadd.f32 3.0, %v405_v41  ;;  %v434_v30 = vmax.f32 %v418_v2, 0.0  ;;  %v435_v24 = vmax.f32 %v419_v3, 0.0  ;;  %v271_v51 = vmul.f32 %v2981_v0, %v2975_v62 }
  0xbb   :  { %v3060_v27 = vmul.f32 %v462_v10, %v398_v46  ;;  %v3067_v20 = vmul.f32 %v463_v15, %v399_v47  ;;  %v118_v46 = vmul.f32 %v2961_v56, %v2899_v22  ;;  %v354_v47 = vmul.f32 %v3011_v38, %v3035_v11 }
  0xbc   :  { %v437_v21 = vmax.f32 %v421_v17, 0.0  ;;  %v450_v10 = vmin.f32 %v434_v30, 6.0  ;;  %v451_v4 = vmin.f32 %v435_v24, 6.0  ;;  %v3079_v5 = vmul.f32 %v465_v37, %v401_v25 }
  0xbd   :  { %494 = vrot.lane.b32.xlu0 %v3060_v27, %s2744_s28  ;;  %v202_v36 = vadd.f32 %v186_v31, %v118_v46  ;;  %v189_v25 = vmul.f32 %v2967_v58, %v2917_v32  ;;  %v203_v2 = vadd.f32 %v187_v14, %v119_v45  ;;  %v121_v31 = vmul.f32 %v2970_v59, %v2899_v22 }
  0xbe   :  { %v466_v13 = vmul.f32 0.16666667, %v450_v10  ;;  %5242 = vst [vmem:[#allocation16_spill] sm:$0xff] %v3079_v5  ;;  %v453_v6 = vmin.f32 %v437_v21, 6.0  ;;  %v467_v7 = vmul.f32 0.16666667, %v451_v4  ;;  %v273_v37 = vmul.f32 %v2984_v1, %v2975_v62 }
  0xbf   :  { %v286_v15 = vadd.f32 %v270_v52, %v202_v36  ;;  %v287_v24 = vadd.f32 %v271_v51, %v203_v2  ;;  %v182_v21 = vmul.f32 %v2955_v54, %v2910_v29  ;;  %v205_v10 = vadd.f32 %v189_v25, %v121_v31 }
  0xc0   :  { %v3081_v8 = vmul.f32 %v466_v13, %v402_v9  ;;  %v355_v9 = vmul.f32 %v3014_v48, %v3035_v11  ;;  %v469_v17 = vmul.f32 0.16666667, %v453_v6  ;;  %v3095_v30 = vmul.f32 %v467_v7, %v403_v43 }
  0xc1   :  { %502 = vrot.lane.b32.xlu0 %v3067_v20, %s2744_s28  ;;  %v370_v3 = vadd.f32 %v354_v47, %v286_v15  ;;  %v357_v43 = vmul.f32 %v3017_v50, %v3035_v11  ;;  %v114_v4 = vmul.f32 %v2961_v56, %v2906_v26  ;;  %v266_v13 = vmul.f32 %v2978_v63, %v2973_v61  ;;  %v3129_v15 = vpop.permute.xlu1 %390 }
  0xc2   :  { %5243 = vst [vmem:[#allocation17_spill] sm:$0xff] %v3081_v8  ;;  %496 = vrot.lane.b32.xlu1 %v3081_v8, %s2744_s28  ;;  %5244 = vst [vmem:[#allocation18_spill] sm:$0xff] %v3095_v30  ;;  %v371_v46 = vadd.f32 %v355_v9, %v287_v24  ;;  %v3114_v14 = vmul.f32 %v469_v17, %v405_v41  ;;  %v289_v36 = vadd.f32 %v273_v37, %v205_v10 }
  0xc3   :  { %v410_v52 = vadd.f32 %v2908_v28, %v370_v3  ;;  %v183_v54 = vmul.f32 %v2958_v55, %v2910_v29  ;;  %v198_v47 = vadd.f32 %v182_v21, %v114_v4  ;;  %v350_v6 = vmul.f32 %v3011_v38, %v3008_v44 }
  0xc4   :  { %5245 = vst [vmem:[#allocation19_spill] sm:$0xff] %v3114_v14  ;;  %v373_v56 = vadd.f32 %v357_v43, %v289_v36  ;;  %v411_v7 = vadd.f32 %v2908_v28, %v371_v46  ;;  %v115_v41 = vmul.f32 %v2964_v57, %v2906_v26  ;;  %v267_v45 = vmul.f32 %v2981_v0, %v2973_v61 }
  0xc5   :  { %518 = vrot.lane.b32.xlu0 %v3079_v5, %s2744_s28  ;;  %v426_v63 = vadd.f32 3.0, %v410_v52  ;;  %v282_v51 = vadd.f32 %v266_v13, %v198_v47  ;;  %v185_v55 = vmul.f32 %v2967_v58, %v2910_v29  ;;  %v351_v25 = vmul.f32 %v3014_v48, %v3008_v44 }
  0xc6   :  { %504 = vrot.lane.b32.xlu1 %v3095_v30, %s2744_s28  ;;  %v199_v38 = vadd.f32 %v183_v54, %v115_v41  ;;  %v413_v57 = vadd.f32 %v2908_v28, %v373_v56  ;;  %v427_v0 = vadd.f32 3.0, %v411_v7  ;;  %v117_v3 = vmul.f32 %v2970_v59, %v2906_v26 }
  0xc7   :  { %v366_v2 = vadd.f32 %v350_v6, %v282_v51  ;;  %v442_v9 = vmax.f32 %v426_v63, 0.0  ;;  %v269_v17 = vmul.f32 %v2984_v1, %v2973_v61  ;;  %v353_v37 = vmul.f32 %v3017_v50, %v3008_v44 }
  0xc8   :  { %v283_v31 = vadd.f32 %v267_v45, %v199_v38  ;;  %v201_v48 = vadd.f32 %v185_v55, %v117_v3  ;;  %v429_v21 = vadd.f32 3.0, %v413_v57  ;;  %v443_v59 = vmax.f32 %v427_v0, 0.0 }
  0xc9   :  { %623 = vrot.lane.b32.xlu0 %v3060_v27, %s2745_s29  ;;  %v406_v58 = vadd.f32 %v3129_v15, %v366_v2  ;;  %v458_v10 = vmin.f32 %v442_v9, 6.0 }
  0xca   :  { %520 = vrot.lane.b32.xlu1 %v3114_v14, %s2744_s28  ;;  %v367_v24 = vadd.f32 %v351_v25, %v283_v31  ;;  %v285_v43 = vadd.f32 %v269_v17, %v201_v48  ;;  %v445_v13 = vmax.f32 %v429_v21, 0.0  ;;  %v459_v50 = vmin.f32 %v443_v59, 6.0 }
  0xcb   :  { %v422_v46 = vadd.f32 3.0, %v406_v58  ;;  %v474_v36 = vmul.f32 0.16666667, %v458_v10  ;;  %v149_v10 = vrot.slane %v2935_v39, %v2920_v33 }
  0xcc   :  { %v407_v1 = vadd.f32 %v3129_v15, %v367_v24  ;;  %v369_v4 = vadd.f32 %v353_v37, %v285_v43  ;;  %v461_v56 = vmin.f32 %v445_v13, 6.0  ;;  %v475_v63 = vmul.f32 0.16666667, %v459_v50  ;;  %v3185_v37 = vpop.permute.xlu1 %551 }
  0xcd   :  { %631 = vrot.lane.b32.xlu0 %v3067_v20, %s2745_s29  ;;  %v438_v6 = vmax.f32 %v422_v46, 0.0  ;;  %v3161_v41 = vmul.f32 %v474_v36, %v410_v52  ;;  %5251 = vst [vmem:[#allocation25_spill] sm:$0xff] %v3185_v37  ;;  %v81_v43 = vrot.slane %v2935_v39, %v2924_v35  ;;  %v3234_v46 = vrot.slane %v149_v10, %v2920_v33 }
  0xce   :  { %625 = vrot.lane.b32.xlu1 %v3081_v8, %s2745_s29  ;;  %v409_v54 = vadd.f32 %v3129_v15, %v369_v4  ;;  %v423_v47 = vadd.f32 3.0, %v407_v1  ;;  %v477_v38 = vmul.f32 0.16666667, %v461_v56  ;;  %v3167_v25 = vmul.f32 %v475_v63, %v411_v7 }
  0xcf   :  { %5246 = vst [vmem:[#allocation20_spill] sm:$0xff] %v3161_v41  ;;  %v454_v55 = vmin.f32 %v438_v6, 6.0  ;;  %v3237_v4 = vrot.slane %v81_v43, %v2924_v35  ;;  %v233_v13 = vrot.slane %v2935_v39, %v2938_v40  ;;  %v317_v50 = vrot.slane %v2935_v39, %v2952_v53  ;;  %v5268_v43 = vld [vmem:[#allocation7_spill] sm:$0xff] }
  0xd0   :  { %v425_v45 = vadd.f32 3.0, %v409_v54  ;;  %v439_v51 = vmax.f32 %v423_v47, 0.0  ;;  %5247 = vst [vmem:[#allocation21_spill] sm:$0xff] %v3167_v25  ;;  %v3173_v52 = vmul.f32 %v477_v38, %v413_v57  ;;  %v5259_v56 = vmov 5  }
  0xd1   :  { %647 = vrot.lane.b32.xlu0 %v3079_v5, %s2745_s29  ;;  %v470_v9 = vmul.f32 0.16666667, %v454_v55  ;;  %v108_v47 = vmul.f32 %v3237_v4, %v2893_v19  ;;  %v3252_v6 = vrot.slane %v233_v13, %v2938_v40  ;;  %v3259_v39 = vrot.slane %v317_v50, %v2952_v53  ;;  %v5262_v55 = vld [vmem:[#allocation6_spill] sm:$0xff]  ;;  %v5269_v50 = vld [vmem:[#allocation8_spill] sm:$0xff] }
  0xd2   :  { %633 = vrot.lane.b32.xlu1 %v3095_v30, %s2745_s29  ;;  %v441_v2 = vmax.f32 %v425_v45, 0.0  ;;  %v455_v0 = vmin.f32 %v439_v51, 6.0  ;;  %5248 = vst [vmem:[#allocation22_spill] sm:$0xff] %v3173_v52  ;;  %v180_v13 = vmul.f32 %v3234_v46, %v5268_v43 }
  0xd3   :  { %v3175_v31 = vmul.f32 %v470_v9, %v406_v58  ;;  %v3193_v58 = vpop.permute.xlu1 %673  ;;  %v260_v63 = vmul.f32 %v3252_v6, %v2947_v49  ;;  %v344_v19 = vmul.f32 %v3259_v39, %v3019_v60  ;;  %v5264_v49 = vld [vmem:[#allocation5_spill] sm:$0xff] }
  0xd4   :  { %v457_v3 = vmin.f32 %v441_v2, 6.0  ;;  %v471_v17 = vmul.f32 0.16666667, %v455_v0  ;;  %5253 = vst [vmem:[#allocation27_spill] sm:$0xff] %v3193_v58  ;;  %v5263_v0 = vmov 6  }
  0xd5   :  { %761 = vrot.lane.b32.xlu0 %v3081_v8, %s2746_s30  ;;  %5249 = vst [vmem:[#allocation23_spill] sm:$0xff] %v3175_v31 }
  0xd6   :  { %649 = vrot.lane.b32.xlu1 %v3114_v14, %s2745_s29  ;;  %v473_v7 = vmul.f32 0.16666667, %v457_v3  ;;  %v3181_v48 = vmul.f32 %v471_v17, %v407_v1  ;;  %v5266_v3 = vld [vmem:[#allocation9_spill] sm:$0xff] }
  0xd7   :  { %v3201_v24 = vpop.permute.xlu1 %809 }
  0xd8   :  { %5250 = vst [vmem:[#allocation24_spill] sm:$0xff] %v3181_v48  ;;  %v3189_v57 = vmul.f32 %v473_v7, %v409_v54  ;;  %5254 = vst [vmem:[#allocation28_spill] sm:$0xff] %v3201_v24  ;;  %v176_v54 = vmul.f32 %v3234_v46, %v2891_v18  ;;  %v5260_v18 = vmov 4  }
  0xd9   :  { %769 = vrot.lane.b32.xlu0 %v3095_v30, %s2746_s30 }
  0xda   :  { %759 = vrot.lane.b32.xlu1 %v3060_v27, %s2746_s30  ;;  %5252 = vst [vmem:[#allocation26_spill] sm:$0xff] %v3189_v57  ;;  %v192_v45 = vadd.f32 %v176_v54, %v108_v47  ;;  %v112_v54 = vmul.f32 %v3237_v4, %v5269_v50 }
  0xdb   :  { %v3209_v21 = vpop.permute.xlu1 %813 }
  0xdc   :  { %5255 = vst [vmem:[#allocation29_spill] sm:$0xff] %v3209_v21  ;;  %v276_v38 = vadd.f32 %v260_v63, %v192_v45  ;;  %v3299_v45 = vpop.permute.xlu0 %957 }
  0xdd   :  { %785 = vrot.lane.b32.xlu0 %v3114_v14, %s2746_s30  ;;  %5271 = vst [vmem:[#allocation7_spill] sm:$0xff] %v3299_v45 }
  0xde   :  { %767 = vrot.lane.b32.xlu1 %v3067_v20, %s2746_s30  ;;  %v360_v2 = vadd.f32 %v344_v19, %v276_v38  ;;  %v196_v19 = vadd.f32 %v180_v13, %v112_v54  ;;  %v348_v38 = vmul.f32 %v3259_v39, %v2941_v42  ;;  %v188_v13 = vmul.f32 %v3234_v46, %v2917_v32 }
  0xdf   :  { %v3217_v59 = vpop.permute.xlu1 %566 }
  0xe0   :  { %5256 = vst [vmem:[#allocation30_spill] sm:$0xff] %v3217_v59  ;;  %v400_v60 = vadd.f32 %v5266_v3, %v360_v2 }
  0xe1   :  { %500 = vrot.lane.b32.xlu0 %v3161_v41, %s2744_s28 }
  0xe2   :  { %783 = vrot.lane.b32.xlu1 %v3079_v5, %s2746_s30  ;;  %v416_v17 = vadd.f32 3.0, %v400_v60 }
  0xe3   :  { %v3229_v1 = vpop.permute.xlu1 %681 }
  0xe4   :  { %5257 = vst [vmem:[#allocation31_spill] sm:$0xff] %v3229_v1  ;;  %v432_v10 = vmax.f32 %v416_v17, 0.0 }
  0xe5   :  { %508 = vrot.lane.b32.xlu0 %v3167_v25, %s2744_s28 }
  0xe6   :  { %498 = vrot.lane.b32.xlu1 %v3175_v31, %s2744_s28  ;;  %v448_v63 = vmin.f32 %v432_v10, 6.0 }
  0xe7   :  { %v3245_v36 = vpop.permute.xlu1 %945 }
  0xe8   :  { %5258 = vst [vmem:[#allocation32_spill] sm:$0xff] %v3245_v36  ;;  %v464_v2 = vmul.f32 0.16666667, %v448_v63  ;;  %v120_v63 = vmul.f32 %v3237_v4, %v2899_v22 }
  0xe9   :  { %524 = vrot.lane.b32.xlu0 %v3173_v52, %s2744_s28 }
  0xea   :  { %506 = vrot.lane.b32.xlu1 %v3181_v48, %s2744_s28  ;;  %v3314_v43 = vmul.f32 %v464_v2, %v400_v60  ;;  %v204_v32 = vadd.f32 %v188_v13, %v120_v63 }
  0xeb   :  { %v3266_v51 = vpop.permute.xlu1 %949 }
  0xec   :  { %5261 = vst [vmem:[#allocation33_spill] sm:$0xff] %v3266_v51  ;;  %5273 = vst [vmem:[#allocation34_spill] sm:$0xff] %v3314_v43 }
  0xed   :  { %629 = vrot.lane.b32.xlu0 %v3161_v41, %s2745_s29 }
  0xee   :  { %522 = vrot.lane.b32.xlu1 %v3189_v57, %s2744_s28 }
  0xef   :  { %v3275_v9 = vpop.permute.xlu1 %821 }
  0xf0   :  { %5265 = vst [vmem:[#allocation6_spill] sm:$0xff] %v3275_v9 }
  0xf1   :  { %637 = vrot.lane.b32.xlu0 %v3167_v25, %s2745_s29 }
  0xf2   :  { %627 = vrot.lane.b32.xlu1 %v3175_v31, %s2745_s29 }
  0xf3   :  { %v3282_v7 = vpop.permute.xlu1 %953 }
  0xf4   :  { %5267 = vst [vmem:[#allocation5_spill] sm:$0xff] %v3282_v7 }
  0xf5   :  { %653 = vrot.lane.b32.xlu0 %v3173_v52, %s2745_s29 }
  0xf6   :  { %635 = vrot.lane.b32.xlu1 %v3181_v48, %s2745_s29 }
  0xf7   :  { %v3295_v47 = vpop.permute.xlu1 %1032 }
  0xf8   :  { %5270 = vst [vmem:[#allocation9_spill] sm:$0xff] %v3295_v47 }
  0xf9   :  { %897 = vrot.lane.b32.xlu0 %v3081_v8, %s2747_s13 }
  0xfa   :  { %651 = vrot.lane.b32.xlu1 %v3189_v57, %s2745_s29 }
  0xfb   :  { %v3307_v17 = vpop.permute.xlu1 %1036 }
  0xfc   :  { %5272 = vst [vmem:[#allocation8_spill] sm:$0xff] %v3307_v17 }
  0xfd   :  { %905 = vrot.lane.b32.xlu0 %v3095_v30, %s2747_s13 }
  0xfe   :  { %895 = vrot.lane.b32.xlu1 %v3060_v27, %s2747_s13 }
  0xff   :  { %v3319_v50 = vpop.permute.xlu1 %1133 }
 0x100   :  { %5274 = vst [vmem:[#allocation35_spill] sm:$0xff] %v3319_v50 }
 0x101   :  { %921 = vrot.lane.b32.xlu0 %v3114_v14, %s2747_s13 }
 0x102   :  { %903 = vrot.lane.b32.xlu1 %v3067_v20, %s2747_s13 }
 0x105   :  { %771 = vrot.lane.b32.xlu0 %v3181_v48, %s2746_s30 }
 0x106   :  { %919 = vrot.lane.b32.xlu1 %v3079_v5, %s2747_s13  ;;  %v116_v5 = vmul.f32 %v3237_v4, %v2906_v26 }
 0x109   :  { %787 = vrot.lane.b32.xlu0 %v3189_v57, %s2746_s30 }
 0x10a   :  { %1265 = vperm.xlu1 %2694, %v2873_v16  }
 0x10d   :  { %1040 = vperm.xlu0 %2695, %v2858_v12  }
 0x10e   :  { %763 = vrot.lane.b32.xlu1 %v3175_v31, %s2746_s30 }
 0x10f   :  { %2697 = vset.pattern.permute.xlu1 %v5260_v18  ;;  %v264_v18 = vmul.f32 %v3252_v6, %v2901_v23 }
 0x111   :  { %2696 = vset.pattern.permute.xlu0 %v5259_v56  ;;  %v280_v3 = vadd.f32 %v264_v18, %v196_v19  ;;  %v272_v18 = vmul.f32 %v3252_v6, %v2975_v62 }
 0x112   :  { %1129 = vperm.xlu0 %2696, %v2873_v16   ;;  %765 = vrot.lane.b32.xlu1 %v3161_v41, %s2746_s30 }
 0x113   :  { %v364_v10 = vadd.f32 %v348_v38, %v280_v3  ;;  %v288_v38 = vadd.f32 %v272_v18, %v204_v32 }
 0x115   :  { %v404_v42 = vadd.f32 %v3054_v34, %v364_v10  ;;  %v356_v34 = vmul.f32 %v3259_v39, %v3035_v11 }
 0x116   :  { %1141 = vperm.xlu0 %2696, %v5262_v55   ;;  %773 = vrot.lane.b32.xlu1 %v3167_v25, %s2746_s30 }
 0x117   :  { %v420_v60 = vadd.f32 3.0, %v404_v42  ;;  %v372_v22 = vadd.f32 %v356_v34, %v288_v38 }
 0x119   :  { %v436_v62 = vmax.f32 %v420_v60, 0.0  ;;  %v412_v3 = vadd.f32 %v2908_v28, %v372_v22  ;;  %v2751_v22 = vmov 8  }
 0x11a   :  { %2699 = vset.pattern.permute.xlu0 %v5263_v0  ;;  %789 = vrot.lane.b32.xlu1 %v3173_v52, %s2746_s30 }
 0x11b   :  { %1269 = vperm.xlu0 %2699, %v5264_v49   ;;  %v452_v10 = vmin.f32 %v436_v62, 6.0  ;;  %v428_v18 = vadd.f32 3.0, %v412_v3 }
 0x11d   :  { %v468_v32 = vmul.f32 0.16666667, %v452_v10  ;;  %v444_v28 = vmax.f32 %v428_v18, 0.0 }
 0x11e   :  { %1044 = vperm.xlu1 %2697, %v5262_v55  }
 0x11f   :  { %899 = vrot.lane.b32.xlu0 %v3175_v31, %s2747_s13  ;;  %v3366_v38 = vmul.f32 %v468_v32, %v404_v42  ;;  %v460_v10 = vmin.f32 %v444_v28, 6.0  ;;  %v184_v28 = vmul.f32 %v3234_v46, %v2910_v29  ;;  %v352_v29 = vmul.f32 %v3259_v39, %v3008_v44 }
 0x121   :  { %5281 = vst [vmem:[#allocation42_spill] sm:$0xff] %v3366_v38  ;;  %v476_v42 = vmul.f32 0.16666667, %v460_v10  ;;  %v268_v10 = vmul.f32 %v3252_v6, %v2973_v61  ;;  %v200_v45 = vadd.f32 %v184_v28, %v116_v5 }
 0x122   :  { %2698 = vset.pattern.permute.xlu1 %v5259_v56  ;;  %v5041_v56 = vmov 7  }
 0x123   :  { %907 = vrot.lane.b32.xlu0 %v3181_v48, %s2747_s13  ;;  %1137 = vperm.xlu1 %2698, %v2858_v12   ;;  %v284_v26 = vadd.f32 %v268_v10, %v200_v45 }
 0x125   :  { %v368_v4 = vadd.f32 %v352_v29, %v284_v26  ;;  %v5297_v29 = vmov 0  }
 0x127   :  { %923 = vrot.lane.b32.xlu0 %v3189_v57, %s2747_s13  ;;  %2700 = vset.pattern.permute.xlu1 %v5041_v56  ;;  %v3391_v57 = vmul.f32 %v476_v42, %v412_v3  ;;  %v408_v44 = vadd.f32 %v3129_v15, %v368_v4 }
 0x128   :  { %1401 = vperm.xlu1 %2700, %v2873_v16  }
 0x129   :  { %5286 = vst [vmem:[#allocation47_spill] sm:$0xff] %v3391_v57  ;;  %v424_v39 = vadd.f32 3.0, %v408_v44 }
 0x12b   :  { %1079 = vrot.lane.b32.xlu0 %v3060_v27, %s2749_s14  ;;  %v440_v15 = vmax.f32 %v424_v39, 0.0 }
 0x12c   :  { %1405 = vperm.xlu1 %2700, %v5264_v49  }
 0x12d   :  { %v456_v10 = vmin.f32 %v440_v15, 6.0 }
 0x12f   :  { %1087 = vrot.lane.b32.xlu0 %v3067_v20, %s2749_s14  ;;  %v3311_v23 = vpop.permute.xlu0 %494 }
 0x130   :  { %901 = vrot.lane.b32.xlu1 %v3161_v41, %s2747_s13 }
 0x131   :  { %2701 = vset.pattern.permute.xlu1 %v5263_v0 }
 0x133   :  { %1095 = vrot.lane.b32.xlu0 %v3314_v43, %s2749_s14  ;;  %v3323_v54 = vpop.permute.xlu0 %502 }
 0x134   :  { %5275 = vst [vmem:[#allocation36_spill] sm:$0xff] %v3323_v54  ;;  %v3337_v2 = vpop.permute.xlu1 %496  ;;  %909 = vrot.lane.b32.xlu1 %v3167_v25, %s2747_s13 }
 0x137   :  { %1273 = vperm.xlu0 %2699, %v2858_v12   ;;  %v3335_v19 = vpop.permute.xlu0 %518 }
 0x138   :  { %5276 = vst [vmem:[#allocation37_spill] sm:$0xff] %v3335_v19  ;;  %v3345_v11 = vpop.permute.xlu1 %504  ;;  %925 = vrot.lane.b32.xlu1 %v3173_v52, %s2747_s13 }
 0x139   :  { %5277 = vst [vmem:[#allocation38_spill] sm:$0xff] %v3345_v11 }
 0x13b   :  { %1223 = vrot.lane.b32.xlu0 %v3067_v20, %s2750_s15  ;;  %v3343_v0 = vpop.permute.xlu0 %623 }
 0x13c   :  { %2703 = vset.pattern.permute.xlu0 %v5041_v56  ;;  %v3355_v63 = vpop.permute.xlu1 %520  ;;  %1081 = vrot.lane.b32.xlu1 %v3081_v8, %s2749_s14 }
 0x13d   :  { %5279 = vst [vmem:[#allocation40_spill] sm:$0xff] %v3355_v63 }
 0x13f   :  { %1231 = vrot.lane.b32.xlu0 %v3314_v43, %s2750_s15  ;;  %v3353_v13 = vpop.permute.xlu0 %631 }
 0x140   :  { %5278 = vst [vmem:[#allocation39_spill] sm:$0xff] %v3353_v13  ;;  %v3362_v60 = vpop.permute.xlu1 %625  ;;  %1089 = vrot.lane.b32.xlu1 %v3095_v30, %s2749_s14 }
 0x143   :  { %1409 = vperm.xlu0 %2703, %v2858_v12   ;;  %v3360_v34 = vpop.permute.xlu0 %647 }
 0x144   :  { %5280 = vst [vmem:[#allocation41_spill] sm:$0xff] %v3360_v34  ;;  %v3370_v56 = vpop.permute.xlu1 %633  ;;  %1097 = vrot.lane.b32.xlu1 %v3366_v38, %s2749_s14 }
 0x145   :  { %5282 = vst [vmem:[#allocation43_spill] sm:$0xff] %v3370_v56 }
 0x147   :  { %2704 = vset.pattern.permute.xlu0 %v2751_v22  ;;  %v3368_v62 = vpop.permute.xlu0 %761 }
 0x148   :  { %1541 = vperm.xlu0 %2704, %v5264_v49   ;;  %v3377_v40 = vpop.permute.xlu1 %649  ;;  %1277 = vperm.xlu1 %2701, %v5262_v55  }
 0x149   :  { %5284 = vst [vmem:[#allocation45_spill] sm:$0xff] %v3377_v40 }
 0x14b   :  { %v3375_v53 = vpop.permute.xlu0 %769 }
 0x14c   :  { %5283 = vst [vmem:[#allocation44_spill] sm:$0xff] %v3375_v53  ;;  %1085 = vrot.lane.b32.xlu0 %v3161_v41, %s2749_s14  ;;  %2702 = vset.pattern.permute.xlu1 %v2751_v22  ;;  %v3384_v32 = vpop.permute.xlu1 %759 }
 0x14d   :  { %1537 = vperm.xlu1 %2702, %v2873_v16   ;;  %v5289_v16 = vmov 7  }
 0x14f   :  { %v3382_v18 = vpop.permute.xlu0 %785 }
 0x150   :  { %5285 = vst [vmem:[#allocation46_spill] sm:$0xff] %v3382_v18  ;;  %1093 = vrot.lane.b32.xlu0 %v3167_v25, %s2749_s14  ;;  %v3399_v14 = vpop.permute.xlu1 %767 }
 0x151   :  { %5288 = vst [vmem:[#allocation49_spill] sm:$0xff] %v3399_v14  ;;  %1215 = vrot.lane.b32.xlu1 %v3060_v27, %s2750_s15 }
 0x152   :  { %2705 = vset.pattern.permute.xlu1 %v5289_v16  ;;  %v472_v16 = vmul.f32 0.16666667, %v456_v10 }
 0x153   :  { %v3397_v52 = vpop.permute.xlu0 %500 }
 0x154   :  { %5287 = vst [vmem:[#allocation48_spill] sm:$0xff] %v3397_v52  ;;  %1101 = vrot.lane.b32.xlu0 %v3391_v57, %s2749_s14  ;;  %v3410_v61 = vpop.permute.xlu1 %783 }
 0x155   :  { %5291 = vst [vmem:[#allocation51_spill] sm:$0xff] %v3410_v61  ;;  %1217 = vrot.lane.b32.xlu1 %v3081_v8, %s2750_s15 }
 0x157   :  { %v3408_v46 = vpop.permute.xlu0 %508 }
 0x158   :  { %5290 = vst [vmem:[#allocation50_spill] sm:$0xff] %v3408_v46  ;;  %1353 = vrot.lane.b32.xlu0 %v3081_v8, %s2752_s16  ;;  %v3419_v6 = vpop.permute.xlu1 %498 }
 0x159   :  { %1225 = vrot.lane.b32.xlu1 %v3095_v30, %s2750_s15 }
 0x15b   :  { %v3417_v5 = vpop.permute.xlu0 %524 }
 0x15c   :  { %5292 = vst [vmem:[#allocation52_spill] sm:$0xff] %v3417_v5  ;;  %1361 = vrot.lane.b32.xlu0 %v3095_v30, %s2752_s16  ;;  %v3427_v3 = vpop.permute.xlu1 %506 }
 0x15d   :  { %5294 = vst [vmem:[#allocation54_spill] sm:$0xff] %v3427_v3  ;;  %1233 = vrot.lane.b32.xlu1 %v3366_v38, %s2750_s15 }
 0x15f   :  { %v3425_v45 = vpop.permute.xlu0 %629 }
 0x160   :  { %5293 = vst [vmem:[#allocation53_spill] sm:$0xff] %v3425_v45  ;;  %1369 = vrot.lane.b32.xlu0 %v3366_v38, %s2752_s16  ;;  %v3434_v42 = vpop.permute.xlu1 %522 }
 0x161   :  { %5295 = vst [vmem:[#allocation55_spill] sm:$0xff] %v3434_v42  ;;  %1413 = vperm.xlu1 %2705, %v5262_v55  }
 0x163   :  { %v3437_v28 = vpop.permute.xlu0 %637 }
 0x164   :  { %1549 = vperm.xlu0 %2704, %v5262_v55   ;;  %5296 = vst [vmem:[#allocation56_spill] sm:$0xff] %v3437_v28  ;;  %v3443_v26 = vpop.permute.xlu1 %627  ;;  %v3450_v55 = vmul.f32 %v472_v16, %v408_v44 }
 0x165   :  { %1083 = vrot.lane.b32.xlu1 %v3175_v31, %s2749_s14 }
 0x166   :  { %2706 = vset.pattern.permute.xlu1 %v2751_v22  ;;  %5299 = vst [vmem:[#allocation58_spill] sm:$0xff] %v3450_v55 }
 0x167   :  { %v3445_v4 = vpop.permute.xlu0 %653 }
 0x168   :  { %2707 = vset.pattern.permute.xlu0 %v5297_v29  ;;  %5298 = vst [vmem:[#allocation57_spill] sm:$0xff] %v3445_v4  ;;  %v3452_v39 = vpop.permute.xlu1 %635 }
 0x169   :  { %556 = vperm.xlu0 %2707, %v5264_v49   ;;  %1091 = vrot.lane.b32.xlu1 %v3181_v48, %s2749_s14  ;;  %5300 = vst [vmem:[#allocation59_spill] sm:$0xff] %v3452_v39 }
 0x16b   :  { %v3456_v15 = vpop.permute.xlu0 %897 }
 0x16c   :  { %v3464_v49 = vpop.permute.xlu1 %651 }
 0x16d   :  { %561 = vperm.xlu0 %2707, %v2858_v12   ;;  %1099 = vrot.lane.b32.xlu1 %v3450_v55, %s2749_s14  ;;  %5301 = vst [vmem:[#allocation60_spill] sm:$0xff] %v3464_v49 }
 0x16f   :  { %v3466_v22 = vpop.permute.xlu0 %905 }
 0x170   :  { %5302 = vst [vmem:[#allocation61_spill] sm:$0xff] %v3466_v22  ;;  %v3472_v44 = vpop.permute.xlu1 %895 }
 0x171   :  { %1227 = vrot.lane.b32.xlu0 %v3181_v48, %s2750_s15  ;;  %1351 = vrot.lane.b32.xlu1 %v3060_v27, %s2752_s16 }
 0x173   :  { %v3474_v10 = vpop.permute.xlu0 %921 }
 0x174   :  { %5303 = vst [vmem:[#allocation62_spill] sm:$0xff] %v3474_v10  ;;  %v3483_v16 = vpop.permute.xlu1 %903 }
 0x175   :  { %1235 = vrot.lane.b32.xlu0 %v3450_v55, %s2750_s15  ;;  %1359 = vrot.lane.b32.xlu1 %v3067_v20, %s2752_s16  ;;  %5304 = vst [vmem:[#allocation63_spill] sm:$0xff] %v3483_v16 }
 0x177   :  { %v3485_v9 = vpop.permute.xlu0 %771 }
 0x178   :  { %5305 = vst [vmem:[#allocation64_spill] sm:$0xff] %v3485_v9  ;;  %v3492_v59 = vpop.permute.xlu1 %919 }
 0x179   :  { %1487 = vrot.lane.b32.xlu0 %v3060_v27, %s2753_s1  ;;  %1367 = vrot.lane.b32.xlu1 %v3314_v43, %s2752_s16  ;;  %5306 = vst [vmem:[#allocation65_spill] sm:$0xff] %v3492_v59 }
 0x17b   :  { %v3494_v28 = vpop.permute.xlu0 %787 }
 0x17c   :  { %5307 = vst [vmem:[#allocation66_spill] sm:$0xff] %v3494_v28 }
 0x17d   :  { %1495 = vrot.lane.b32.xlu0 %v3067_v20, %s2753_s1  ;;  %1545 = vperm.xlu1 %2706, %v2858_v12  }
 0x181   :  { %1503 = vrot.lane.b32.xlu0 %v3314_v43, %s2753_s1  ;;  %1219 = vrot.lane.b32.xlu1 %v3175_v31, %s2750_s15 }
 0x182   :  { %2708 = vset.pattern.permute.xlu1 %v5297_v29 }
 0x185   :  { %1355 = vrot.lane.b32.xlu0 %v3175_v31, %s2752_s16  ;;  %1221 = vrot.lane.b32.xlu1 %v3161_v41, %s2750_s15 }
 0x189   :  { %1363 = vrot.lane.b32.xlu0 %v3181_v48, %s2752_s16  ;;  %1229 = vrot.lane.b32.xlu1 %v3167_v25, %s2750_s15  ;;  %v3502_v12 = vpop.permute.xlu1 %1265 }
 0x18a   :  { %5308 = vst [vmem:[#allocation67_spill] sm:$0xff] %v3502_v12 }
 0x18c   :  { %v3504_v43 = vpop.permute.xlu0 %1040 }
 0x18d   :  { %5309 = vst [vmem:[#allocation68_spill] sm:$0xff] %v3504_v43  ;;  %1371 = vrot.lane.b32.xlu0 %v3450_v55, %s2752_s16  ;;  %1237 = vrot.lane.b32.xlu1 %v3391_v57, %s2750_s15  ;;  %v3510_v29 = vpop.permute.xlu1 %763 }
 0x18e   :  { %5310 = vst [vmem:[#allocation69_spill] sm:$0xff] %v3510_v29  ;;  %v3702_v29 = vmul.f32 %v3295_v47, %v3067_v20 }
 0x191   :  { %v3512_v5 = vpop.permute.xlu0 %1129  ;;  %1491 = vrot.lane.b32.xlu0 %v3175_v31, %s2753_s1  ;;  %1489 = vrot.lane.b32.xlu1 %v3081_v8, %s2753_s1  ;;  %v3518_v4 = vpop.permute.xlu1 %765 }
 0x192   :  { %5311 = vst [vmem:[#allocation70_spill] sm:$0xff] %v3512_v5  ;;  %5312 = vst [vmem:[#allocation71_spill] sm:$0xff] %v3518_v4 }
 0x195   :  { %v3520_v45 = vpop.permute.xlu0 %1141  ;;  %1499 = vrot.lane.b32.xlu0 %v3181_v48, %s2753_s1  ;;  %1497 = vrot.lane.b32.xlu1 %v3095_v30, %s2753_s1  ;;  %v3526_v52 = vpop.permute.xlu1 %773 }
 0x196   :  { %5313 = vst [vmem:[#allocation72_spill] sm:$0xff] %v3520_v45  ;;  %5314 = vst [vmem:[#allocation73_spill] sm:$0xff] %v3526_v52 }
 0x199   :  { %1507 = vrot.lane.b32.xlu0 %v3450_v55, %s2753_s1  ;;  %1505 = vrot.lane.b32.xlu1 %v3366_v38, %s2753_s1  ;;  %v3534_v31 = vpop.permute.xlu1 %789 }
 0x19a   :  { %v3530_v46 = vpop.permute.xlu0 %1269  ;;  %5316 = vst [vmem:[#allocation75_spill] sm:$0xff] %v3534_v31 }
 0x19b   :  { %5315 = vst [vmem:[#allocation74_spill] sm:$0xff] %v3530_v46 }
 0x19d   :  { %1357 = vrot.lane.b32.xlu1 %v3161_v41, %s2752_s16  ;;  %v3540_v45 = vpop.permute.xlu1 %1044 }
 0x19e   :  { %v3536_v4 = vpop.permute.xlu0 %899  ;;  %5318 = vst [vmem:[#allocation77_spill] sm:$0xff] %v3540_v45 }
 0x19f   :  { %5317 = vst [vmem:[#allocation76_spill] sm:$0xff] %v3536_v4 }
 0x1a1   :  { %1365 = vrot.lane.b32.xlu1 %v3167_v25, %s2752_s16 }
 0x1a2   :  { %v3542_v43 = vpop.permute.xlu0 %907  ;;  %v3546_v55 = vpop.permute.xlu1 %1137 }
 0x1a3   :  { %5319 = vst [vmem:[#allocation78_spill] sm:$0xff] %v3542_v43  ;;  %5320 = vst [vmem:[#allocation79_spill] sm:$0xff] %v3546_v55 }
 0x1a5   :  { %1373 = vrot.lane.b32.xlu1 %v3391_v57, %s2752_s16 }
 0x1a6   :  { %v3548_v52 = vpop.permute.xlu0 %923 }
 0x1a7   :  { %5321 = vst [vmem:[#allocation80_spill] sm:$0xff] %v3548_v52  ;;  %v3554_v31 = vpop.permute.xlu1 %1401 }
 0x1a8   :  { %5323 = vst [vmem:[#allocation82_spill] sm:$0xff] %v3554_v31 }
 0x1a9   :  { %1493 = vrot.lane.b32.xlu1 %v3161_v41, %s2753_s1 }
 0x1aa   :  { %v3552_v38 = vpop.permute.xlu0 %1079 }
 0x1ab   :  { %5322 = vst [vmem:[#allocation81_spill] sm:$0xff] %v3552_v38  ;;  %v3560_v46 = vpop.permute.xlu1 %1405 }
 0x1ac   :  { %5324 = vst [vmem:[#allocation83_spill] sm:$0xff] %v3560_v46 }
 0x1ad   :  { %1501 = vrot.lane.b32.xlu1 %v3167_v25, %s2753_s1 }
 0x1ae   :  { %v3558_v45 = vpop.permute.xlu0 %1087 }
 0x1af   :  { %v3566_v48 = vpop.permute.xlu1 %901 }
 0x1b0   :  { %5326 = vst [vmem:[#allocation85_spill] sm:$0xff] %v3566_v48 }
 0x1b1   :  { %1509 = vrot.lane.b32.xlu1 %v3391_v57, %s2753_s1 }
 0x1b2   :  { %v3564_v55 = vpop.permute.xlu0 %1095 }
 0x1b3   :  { %5325 = vst [vmem:[#allocation84_spill] sm:$0xff] %v3564_v55  ;;  %v3572_v30 = vpop.permute.xlu1 %909 }
 0x1b4   :  { %5328 = vst [vmem:[#allocation87_spill] sm:$0xff] %v3572_v30 }
 0x1b6   :  { %v3570_v50 = vpop.permute.xlu0 %1273 }
 0x1b7   :  { %5327 = vst [vmem:[#allocation86_spill] sm:$0xff] %v3570_v50  ;;  %v3576_v41 = vpop.permute.xlu1 %925 }
 0x1b8   :  { %5329 = vst [vmem:[#allocation88_spill] sm:$0xff] %v3576_v41 }
 0x1ba   :  { %v3574_v17 = vpop.permute.xlu0 %1223 }
 0x1bb   :  { %v3580_v46 = vpop.permute.xlu1 %1081 }
 0x1bc   :  { %5331 = vst [vmem:[#allocation90_spill] sm:$0xff] %v3580_v46 }
 0x1be   :  { %v3578_v8 = vpop.permute.xlu0 %1231 }
 0x1bf   :  { %5330 = vst [vmem:[#allocation89_spill] sm:$0xff] %v3578_v8  ;;  %v3584_v7 = vpop.permute.xlu1 %1089 }
 0x1c0   :  { %5333 = vst [vmem:[#allocation92_spill] sm:$0xff] %v3584_v7 }
 0x1c2   :  { %v3582_v25 = vpop.permute.xlu0 %1409 }
 0x1c3   :  { %5332 = vst [vmem:[#allocation91_spill] sm:$0xff] %v3582_v25  ;;  %v3586_v48 = vpop.permute.xlu1 %1097 }
 0x1c4   :  { %5334 = vst [vmem:[#allocation93_spill] sm:$0xff] %v3586_v48 }
 0x1c7   :  { %v3588_v52 = vpop.permute.xlu0 %1541  ;;  %v3590_v57 = vpop.permute.xlu1 %1277 }
 0x1c8   :  { %5335 = vst [vmem:[#allocation94_spill] sm:$0xff] %v3588_v52  ;;  %5336 = vst [vmem:[#allocation95_spill] sm:$0xff] %v3590_v57  ;;  %v5347_v57 = vlaneseq }
 0x1cb   :  { %v3592_v50 = vpop.permute.xlu0 %1085 }
 0x1cc   :  { %5337 = vst [vmem:[#allocation96_spill] sm:$0xff] %v3592_v50  ;;  %v3596_v22 = vpop.permute.xlu1 %1537  ;;  %v3613_v50 = vand.u32 127, %v5347_v57  ;;  %v3631_v57 = vld [vmem:[%s5013_s5 + $0x1] ss:$8 sm:$0xf] }
 0x1cd   :  { %5339 = vst [vmem:[#allocation98_spill] sm:$0xff] %v3596_v22  ;;  %5352 = vst [vmem:[#allocation110_spill] sm:$0xff] %v3631_v57  ;;  %v3665_v43 = vrot.slane %v3631_v57, %v2920_v33  ;;  %v3679_v28 = vrot.slane %v3631_v57, %v2924_v35 }
 0x1ce   :  { %vm655_vm0 = vcmp.lt.s32.totalorder %v3613_v50, 16  ;;  %vm528_vm1 = vcmp.lt.s32.totalorder %v3613_v50, 17  ;;  %vm791_vm2 = vcmp.lt.s32.totalorder %v3613_v50, 15  ;;  %vm927_vm3 = vcmp.lt.s32.totalorder %v3613_v50, 1 }
 0x1cf   :  { %v3594_v30 = vpop.permute.xlu0 %1093  ;;  %v800_v57 = vsel %vm791_vm2, %v3384_v32, %v3399_v14  ;;  %v936_v20 = vsel %vm927_vm3, %v3472_v44, %v3483_v16  ;;  %vm1111_vm4 = vcmp.lt.s32.totalorder %v3613_v50, 127  ;;  %vm1247_vm5 = vcmp.lt.s32.totalorder %v3613_v50, 113 }
 0x1d0   :  { %5338 = vst [vmem:[#allocation97_spill] sm:$0xff] %v3594_v30  ;;  %v3600_v4 = vpop.permute.xlu1 %1215  ;;  %v825_v16 = vmul.f32 %v3201_v24, %v800_v57  ;;  %v5359_v57 = vld [vmem:[#allocation11_spill] sm:$0xff]  ;;  %v961_v9 = vmul.f32 %v3245_v36, %v936_v20  ;;  %vm1383_vm6 = vcmp.lt.s32.totalorder %v3613_v50, 112  ;;  %vm1519_vm7 = vcmp.lt.s32.totalorder %v3613_v50, 111 }
 0x1d1   :  { %5341 = vst [vmem:[#allocation100_spill] sm:$0xff] %v3600_v4 }
 0x1d3   :  { %v3598_v41 = vpop.permute.xlu0 %1101 }
 0x1d4   :  { %5340 = vst [vmem:[#allocation99_spill] sm:$0xff] %v3598_v41  ;;  %v3604_v25 = vpop.permute.xlu1 %1217 }
 0x1d5   :  { %5343 = vst [vmem:[#allocation102_spill] sm:$0xff] %v3604_v25  ;;  %v668_v25 = vsel %vm655_vm0, %v3360_v34, %v3343_v0 }
 0x1d6   :  { %v688_v51 = vmul.f32 %v3193_v58, %v668_v25  ;;  %v665_v25 = vsel %vm655_vm0, %v3362_v60, %v3370_v56  ;;  %v801_v56 = vsel %vm791_vm2, %v3368_v62, %v3375_v53 }
 0x1d7   :  { %v3602_v46 = vpop.permute.xlu0 %1353 }
 0x1d8   :  { %5342 = vst [vmem:[#allocation101_spill] sm:$0xff] %v3602_v46  ;;  %v3608_v48 = vpop.permute.xlu1 %1225  ;;  %v3624_v46 = vld [vmem:[%s5013_s5] ss:$8 sm:$0xf] }
 0x1d9   :  { %5345 = vst [vmem:[#allocation104_spill] sm:$0xff] %v3608_v48  ;;  %5350 = vst [vmem:[#allocation108_spill] sm:$0xff] %v3624_v46  ;;  %v541_v48 = vsel %vm528_vm1, %v3335_v19, %v3311_v23  ;;  %v3692_v19 = vmul.f32 %v3295_v47, %v3060_v27  ;;  %v804_v27 = vsel %vm791_vm2, %v3410_v61, %v3384_v32  ;;  %v3729_v32 = vld [vmem:[%s5013_s5 + $0x5] ss:$8 sm:$0xf] }
 0x1da   :  { %v727_v47 = vmul.f32 %v3679_v28, %v688_v51  ;;  %v3757_v53 = vrot.slane %v3729_v32, %v2924_v35 }
 0x1db   :  { %v3606_v7 = vpop.permute.xlu0 %1361 }
 0x1dc   :  { %5344 = vst [vmem:[#allocation103_spill] sm:$0xff] %v3606_v7  ;;  %v3615_v30 = vpop.permute.xlu1 %1233 }
 0x1dd   :  { %5348 = vst [vmem:[#allocation106_spill] sm:$0xff] %v3615_v30  ;;  %v3644_v30 = vrot.slane %v3624_v46, %v2920_v33 }
 0x1df   :  { %v3610_v52 = vpop.permute.xlu0 %1369 }
 0x1e0   :  { %5346 = vst [vmem:[#allocation105_spill] sm:$0xff] %v3610_v52  ;;  %v3626_v7 = vpop.permute.xlu1 %1413  ;;  %v664_v52 = vsel %vm655_vm0, %v3343_v0, %v3353_v13  ;;  %v3657_v13 = vrot.slane %v3624_v46, %v2924_v35  ;;  %v3671_v0 = vld [vmem:[%s5013_s5 + $0x3] ss:$8 sm:$0xf] }
 0x1e1   :  { %5351 = vst [vmem:[#allocation109_spill] sm:$0xff] %v3626_v7  ;;  %v537_v7 = vsel %vm528_vm1, %v3311_v23, %v3323_v54  ;;  %v689_v54 = vmul.f32 %v3193_v58, %v664_v52  ;;  %5354 = vst [vmem:[#allocation112_spill] sm:$0xff] %v3671_v0 }
 0x1e3   :  { %v3618_v41 = vpop.permute.xlu0 %1549  ;;  %v728_v14 = vmul.f32 %v3665_v43, %v689_v54  ;;  %v669_v54 = vsel %vm655_vm0, %v3377_v40, %v3362_v60  ;;  %v693_v40 = vmul.f32 %v5359_v57, %v665_v25 }
 0x1e4   :  { %5349 = vst [vmem:[#allocation107_spill] sm:$0xff] %v3618_v41  ;;  %v3640_v41 = vld [vmem:[%s5013_s5 + $0x2] ss:$8 sm:$0xf]  ;;  %v3673_v34 = vpop.permute.xlu1 %1083  ;;  %v692_v51 = vmul.f32 %v5359_v57, %v669_v54 }
 0x1e5   :  { %5353 = vst [vmem:[#allocation111_spill] sm:$0xff] %v3640_v41  ;;  %5355 = vst [vmem:[#allocation113_spill] sm:$0xff] %v3673_v34  ;;  %v3683_v23 = vrot.slane %v3640_v41, %v2920_v33  ;;  %v3687_v52 = vrot.slane %v3640_v41, %v2924_v35  ;;  %v570_v34 = vmul.f32 %v3185_v37, %v537_v7 }
 0x1e6   :  { %v569_v41 = vmul.f32 %v3185_v37, %v541_v48  ;;  %v3711_v7 = vrot.slane %v3671_v0, %v2920_v33  ;;  %v3724_v48 = vrot.slane %v3671_v0, %v2924_v35  ;;  %v940_v37 = vsel %vm927_vm3, %v3492_v59, %v3472_v44 }
 0x1e7   :  { %v608_v0 = vmul.f32 %v3644_v30, %v570_v34  ;;  %v3763_v34 = vsel %vm528_vm1, %v3337_v2, %v3345_v11  ;;  %v829_v44 = vmul.f32 %v3209_v21, %v801_v56  ;;  %v542_v59 = vsel %vm528_vm1, %v3355_v63, %v3337_v2 }
 0x1e8   :  { %v3675_v46 = vpop.permute.xlu0 %556  ;;  %v3731_v61 = vpop.permute.xlu1 %1091  ;;  %v607_v60 = vmul.f32 %v3657_v13, %v569_v41  ;;  %v960_v41 = vmul.f32 %v3245_v36, %v940_v37  ;;  %v864_v54 = vmul.f32 %v3683_v23, %v825_v16  ;;  %v3784_v37 = vrot.slane %v3729_v32, %v2920_v33 }
 0x1e9   :  { %5356 = vst [vmem:[#allocation114_spill] sm:$0xff] %v3675_v46  ;;  %5357 = vst [vmem:[#allocation115_spill] sm:$0xff] %v3731_v61  ;;  %v824_v61 = vmul.f32 %v3201_v24, %v804_v27  ;;  %v3771_v27 = vld [vmem:[%s5013_s5 + $0x6] ss:$8 sm:$0xf]  ;;  %v744_v24 = vadd.f32 %v728_v14, %v608_v0  ;;  %v666_v11 = vsel %vm655_vm0, %v3443_v26, %v3452_v39 }
 0x1ea   :  { %v743_v56 = vadd.f32 %v727_v47, %v607_v60  ;;  %v3793_v57 = vmul.f32 %v3665_v43, %v693_v40  ;;  %v805_v14 = vsel %vm791_vm2, %v3382_v18, %v3368_v62  ;;  %v1000_v2 = vmul.f32 %v3711_v7, %v961_v9 }
 0x1eb   :  { %v863_v36 = vmul.f32 %v3687_v52, %v824_v61  ;;  %v3802_v47 = vrot.slane %v3771_v27, %v2920_v33  ;;  %v3805_v61 = vmul.f32 %v3679_v28, %v692_v51  ;;  %v3808_v16 = vmul.f32 %v3683_v23, %v829_v44 }
 0x1ec   :  { %v3733_v58 = vpop.permute.xlu0 %561  ;;  %v3773_v25 = vpop.permute.xlu1 %1099  ;;  %v999_v40 = vmul.f32 %v3724_v48, %v960_v41  ;;  %v1120_v0 = vsel %vm1111_vm4, %v3552_v38, %v3558_v45  ;;  %v880_v60 = vadd.f32 %v864_v54, %v744_v24  ;;  %v697_v39 = vmul.f32 %v3229_v1, %v666_v11 }
 0x1ed   :  { %5358 = vst [vmem:[#allocation116_spill] sm:$0xff] %v3733_v58  ;;  %5360 = vst [vmem:[#allocation117_spill] sm:$0xff] %v3773_v25  ;;  %v1116_v51 = vsel %vm1111_vm4, %v3558_v45, %v3564_v55  ;;  %v3826_v44 = vrot.slane %v3771_v27, %v2924_v35  ;;  %v879_v41 = vadd.f32 %v863_v36, %v743_v56  ;;  %v3842_v45 = vld [vmem:[%s5013_s5 + $0x7] ss:$8 sm:$0xf] }
 0x1ee   :  { %v3829_v63 = vmul.f32 %v3209_v21, %v805_v14  ;;  %v539_v24 = vsel %vm528_vm1, %v3419_v6, %v3427_v3  ;;  %v670_v11 = vsel %vm655_vm0, %v3464_v49, %v3443_v26  ;;  %v1016_v54 = vadd.f32 %v1000_v2, %v880_v60 }
 0x1ef   :  { %v1144_v36 = vmul.f32 %v3512_v5, %v1120_v0  ;;  %v1252_v56 = vsel %vm1247_vm5, %v3574_v17, %v3578_v8  ;;  %v1256_v14 = vsel %vm1247_vm5, %v3600_v4, %v3574_v17  ;;  %v543_v26 = vsel %vm528_vm1, %v3434_v42, %v3419_v6 }
 0x1f0   :  { %v3775_v20 = vpop.permute.xlu0 %1227  ;;  %v3815_v62 = vpop.permute.xlu1 %1351  ;;  %v1015_v38 = vadd.f32 %v999_v40, %v879_v41  ;;  %v1145_v2 = vmul.f32 %v3512_v5, %v1116_v51  ;;  %v736_v8 = vmul.f32 %v3665_v43, %v697_v39  ;;  %v3864_v55 = vrot.slane %v3842_v45, %v2924_v35  ;;  %v3876_v40 = vld [vmem:[%s5013_s5 + $0x20] ss:$8 sm:$0xf] }
 0x1f1   :  { %5361 = vst [vmem:[#allocation118_spill] sm:$0xff] %v3815_v62  ;;  %v3868_v17 = vrot.slane %v3842_v45, %v2920_v33  ;;  %5364 = vst [vmem:[#allocation121_spill] sm:$0xff] %v3876_v40  ;;  %v696_v51 = vmul.f32 %v3229_v1, %v670_v11  ;;  %v1281_v39 = vmul.f32 %v3502_v12, %v1252_v56 }
 0x1f2   :  { %v1280_v41 = vmul.f32 %v3502_v12, %v1256_v14  ;;  %v941_v4 = vsel %vm927_vm3, %v3474_v10, %v3456_v15  ;;  %v1064_v5 = vadd.f32 %v3702_v29, %v1016_v54  ;;  %v573_v49 = vmul.f32 %v3675_v46, %v542_v59  ;;  %v5370_v10 = vld [vmem:[#allocation33_spill] sm:$0xff] }
 0x1f3   :  { %v1063_v3 = vadd.f32 %v3692_v19, %v1015_v38  ;;  %v1184_v11 = vmul.f32 %v3784_v37, %v1145_v2  ;;  %v3896_v12 = vrot.slane %v3876_v40, %v2924_v35  ;;  %v578_v42 = vmul.f32 %v3733_v58, %v539_v24  ;;  %v5367_v2 = vld [vmem:[#allocation69_spill] sm:$0xff] }
 0x1f4   :  { %v3817_v9 = vpop.permute.xlu0 %1235  ;;  %v1360_v0 = vpop.permute.xlu1 %1359  ;;  %v3907_v19 = vrot.slane %v3876_v40, %v2920_v33  ;;  %v1320_v38 = vmul.f32 %v3802_v47, %v1281_v39  ;;  %v1319_v35 = vmul.f32 %v3826_v44, %v1280_v41  ;;  %v611_v33 = vmul.f32 %v3657_v13, %v573_v49  ;;  %v5406_v40 = vld [vmem:[#allocation91_spill] sm:$0xff] }
 0x1f5   :  { %5362 = vst [vmem:[#allocation119_spill] sm:$0xff] %v3817_v9  ;;  %v1392_v6 = vsel %vm1383_vm6, %v3815_v62, %v1360_v0  ;;  %v1183_v62 = vmul.f32 %v3757_v53, %v1144_v36  ;;  %v5366_v36 = vld [vmem:[#allocation64_spill] sm:$0xff]  ;;  %v577_v39 = vmul.f32 %v3733_v58, %v543_v26  ;;  %v964_v21 = vmul.f32 %v5370_v10, %v941_v4  ;;  %v5373_v4 = vld [vmem:[#allocation78_spill] sm:$0xff] }
 0x1f6   :  { %v1416_v56 = vmul.f32 %v3554_v31, %v1392_v6  ;;  %v616_v49 = vmul.f32 %v3644_v30, %v578_v42  ;;  %v5374_v58 = vld [vmem:[#allocation76_spill] sm:$0xff]  ;;  %v747_v42 = vadd.f32 %v3805_v61, %v611_v33 }
 0x1f7   :  { %v1199_v6 = vadd.f32 %v1183_v62, %v1063_v3  ;;  %v5371_v3 = vld [vmem:[#allocation66_spill] sm:$0xff] }
 0x1f8   :  { %v3859_v60 = vpop.permute.xlu0 %1487  ;;  %v3892_v14 = vpop.permute.xlu1 %1367  ;;  %v1455_v41 = vmul.f32 %v3864_v55, %v1416_v56 }
 0x1f9   :  { %5363 = vst [vmem:[#allocation120_spill] sm:$0xff] %v3859_v60  ;;  %5365 = vst [vmem:[#allocation122_spill] sm:$0xff] %v3892_v14  ;;  %v1388_v29 = vsel %vm1383_vm6, %v1360_v0, %v3892_v14  ;;  %v802_v0 = vsel %vm791_vm2, %v5367_v2, %v5366_v36  ;;  %v1200_v14 = vadd.f32 %v1184_v11, %v1064_v5 }
 0x1fa   :  { %v1417_v54 = vmul.f32 %v3554_v31, %v1388_v29  ;;  %v1335_v26 = vadd.f32 %v1319_v35, %v1199_v6  ;;  %v735_v6 = vmul.f32 %v3679_v28, %v696_v51  ;;  %v5379_v51 = vld [vmem:[#allocation5_spill] sm:$0xff] }
 0x1fb   :  { %v1336_v62 = vadd.f32 %v1320_v38, %v1200_v14 }
 0x1fc   :  { %v1496_v1 = vpop.permute.xlu0 %1495  ;;  %v1456_v29 = vmul.f32 %v3868_v17, %v1417_v54  ;;  %v3923_v31 = vpop.permute.xlu1 %1545  ;;  %v5372_v54 = vld [vmem:[#allocation15_spill] sm:$0xff] }
 0x1fd   :  { %v1528_v59 = vsel %vm1519_vm7, %v3859_v60, %v1496_v1  ;;  %v574_v60 = vmul.f32 %v3675_v46, %v3763_v34  ;;  %5368 = vst [vmem:[#allocation69_spill] sm:$0xff] %v3923_v31  ;;  %v806_v34 = vsel %vm791_vm2, %v5371_v3, %v5367_v2  ;;  %v833_v36 = vmul.f32 %v5372_v54, %v802_v0 }
 0x1fe   :  { %v1552_v24 = vmul.f32 %v3596_v22, %v1528_v59  ;;  %v938_v46 = vsel %vm927_vm3, %v5374_v58, %v5373_v4  ;;  %v615_v3 = vmul.f32 %v3657_v13, %v577_v39  ;;  %v1472_v14 = vadd.f32 %v1456_v29, %v1336_v62  ;;  %v5378_v39 = vld [vmem:[#allocation80_spill] sm:$0xff] }
 0x1ff   :  { %v612_v2 = vmul.f32 %v3644_v30, %v574_v60  ;;  %v867_v0 = vmul.f32 %v3687_v52, %v3829_v63  ;;  %v752_v60 = vadd.f32 %v736_v8, %v616_v49  ;;  %v832_v33 = vmul.f32 %v5372_v54, %v806_v34  ;;  %v5390_v54 = vld [vmem:[#allocation115_spill] sm:$0xff] }
 0x200   :  { %v3925_v59 = vpop.permute.xlu0 %1503  ;;  %v1591_v11 = vmul.f32 %v3896_v12, %v1552_v24  ;;  %v3946_v38 = vpop.permute.xlu1 %1219  ;;  %v872_v63 = vmul.f32 %v3683_v23, %v833_v36  ;;  %v751_v34 = vadd.f32 %v735_v6, %v615_v3  ;;  %v5382_v36 = vld [vmem:[#allocation90_spill] sm:$0xff]  ;;  %v5384_v3 = vld [vmem:[#allocation17_spill] sm:$0xff] }
 0x201   :  { %5369 = vst [vmem:[#allocation123_spill] sm:$0xff] %v3925_v59  ;;  %v1524_v5 = vsel %vm1519_vm7, %v1496_v1, %v3925_v59  ;;  %v1471_v1 = vadd.f32 %v1455_v41, %v1335_v26  ;;  %5375 = vst [vmem:[#allocation76_spill] sm:$0xff] %v3946_v38  ;;  %v942_v41 = vsel %vm927_vm3, %v5378_v39, %v5374_v58 }
 0x202   :  { %v1553_v56 = vmul.f32 %v3596_v22, %v1524_v5  ;;  %v5377_v5 = vld [vmem:[#allocation61_spill] sm:$0xff]  ;;  %v969_v26 = vmul.f32 %v5379_v51, %v938_v46  ;;  %v883_v22 = vadd.f32 %v867_v0, %v747_v42  ;;  %v5385_v42 = vld [vmem:[#allocation8_spill] sm:$0xff]  ;;  %v871_v6 = vmul.f32 %v3687_v52, %v832_v33 }
 0x203   :  { %v937_v61 = vsel %vm927_vm3, %v3456_v15, %v5377_v5  ;;  %v3963_v29 = vadd.f32 %v1591_v11, %v1471_v1  ;;  %v1003_v15 = vmul.f32 %v3724_v48, %v964_v21  ;;  %v968_v11 = vmul.f32 %v5379_v51, %v942_v41  ;;  %v5381_v1 = vld [vmem:[#allocation92_spill] sm:$0xff]  ;;  %v5388_v51 = vld [vmem:[#allocation102_spill] sm:$0xff] }
 0x204   :  { %v1592_v35 = vmul.f32 %v3907_v19, %v1553_v56  ;;  %v3949_v24 = vpop.permute.xlu0 %1355  ;;  %v748_v56 = vadd.f32 %v3793_v57, %v612_v2  ;;  %v965_v8 = vmul.f32 %v5370_v10, %v937_v61  ;;  %v3972_v49 = vpop.permute.xlu1 %1221  ;;  %v1121_v46 = vsel %vm1111_vm4, %v5382_v36, %v5381_v1  ;;  %v5383_v57 = vld [vmem:[#allocation93_spill] sm:$0xff]  ;;  %v5387_v41 = vld [vmem:[#allocation104_spill] sm:$0xff] }
 0x205   :  { %5376 = vst [vmem:[#allocation124_spill] sm:$0xff] %v3949_v24  ;;  %5380 = vst [vmem:[#allocation125_spill] sm:$0xff] %v3972_v49  ;;  %v1117_v2 = vsel %vm1111_vm4, %v5381_v1, %v5383_v57  ;;  %v888_v21 = vadd.f32 %v872_v63, %v752_v60  ;;  %v1008_v61 = vmul.f32 %v3711_v7, %v969_v26  ;;  %v5389_v60 = vld [vmem:[#allocation35_spill] sm:$0xff]  ;;  %v5393_v57 = vld [vmem:[#allocation68_spill] sm:$0xff] }
 0x206   :  { %v3965_v62 = vadd.f32 %v1592_v35, %v1472_v14  ;;  %v1051_v14 = vmul.f32 %v5385_v42, %v5384_v3  ;;  %v5386_v35 = vld [vmem:[#allocation18_spill] sm:$0xff]  ;;  %v1257_v4 = vsel %vm1247_vm5, %v5388_v51, %v5387_v41  ;;  %v884_v39 = vadd.f32 %v3808_v16, %v748_v56  ;;  %v5392_v51 = vld [vmem:[#allocation24_spill] sm:$0xff] }
 0x207   :  { %v1052_v0 = vmul.f32 %v5385_v42, %v5386_v35  ;;  %v1019_v1 = vadd.f32 %v1003_v15, %v883_v22  ;;  %v1148_v63 = vmul.f32 %v5389_v60, %v1121_v46  ;;  %v1149_v3 = vmul.f32 %v5389_v60, %v1117_v2  ;;  %v5394_v15 = vld [vmem:[#allocation74_spill] sm:$0xff]  ;;  %v5395_v2 = vld [vmem:[#allocation103_spill] sm:$0xff]  ;;  %v5396_v60 = vld [vmem:[#allocation101_spill] sm:$0xff] }
 0x208   :  { %v1364_v59 = vpop.permute.xlu0 %1363  ;;  %v1638_v58 = vadd.f32 %v3965_v62, %v3963_v29  ;;  %v1118_v33 = vsel %vm1111_vm4, %v5390_v54, %v3773_v25  ;;  %v4002_v35 = vpop.permute.xlu1 %1229  ;;  %v1004_v36 = vmul.f32 %v3711_v7, %v965_v8  ;;  %v1056_v16 = vmul.f32 %v5393_v57, %v5392_v51  ;;  %v5398_v8 = vld [vmem:[#allocation79_spill] sm:$0xff] }
 0x209   :  { %v1007_v22 = vmul.f32 %v3724_v48, %v968_v11  ;;  %v1024_v56 = vadd.f32 %v1008_v61, %v888_v21  ;;  %v1284_v46 = vmul.f32 %v5394_v15, %v1257_v4  ;;  %v1393_v25 = vsel %vm1383_vm6, %v5396_v60, %v5395_v2  ;;  %v5399_v60 = vld [vmem:[#allocation23_spill] sm:$0xff] }
 0x20a   :  { %1639 = vadd.xlane.f32.xlu0 %v1638_v58  ;;  %v887_v58 = vadd.f32 %v871_v6, %v751_v34  ;;  %v5397_v34 = vld [vmem:[#allocation113_spill] sm:$0xff]  ;;  %v1254_v51 = vsel %vm1247_vm5, %v3775_v20, %v3817_v9  ;;  %v1153_v11 = vmul.f32 %v5398_v8, %v1118_v33  ;;  %v1020_v21 = vadd.f32 %v1004_v36, %v884_v39  ;;  %v5402_v39 = vld [vmem:[#allocation86_spill] sm:$0xff] }
 0x20b   :  { %v1122_v6 = vsel %vm1111_vm4, %v5397_v34, %v5390_v54  ;;  %v1258_v4 = vsel %vm1247_vm5, %v3946_v38, %v3775_v20  ;;  %v1067_v61 = vadd.f32 %v1051_v14, %v1019_v1  ;;  %v1055_v10 = vmul.f32 %v5393_v57, %v5399_v60  ;;  %v5403_v1 = vld [vmem:[#allocation106_spill] sm:$0xff]  ;;  %v5405_v38 = vld [vmem:[#allocation105_spill] sm:$0xff] }
 0x20c   :  { %v4004_v26 = vpop.permute.xlu0 %1371  ;;  %v1187_v5 = vmul.f32 %v3757_v53, %v1148_v63  ;;  %v1188_v54 = vmul.f32 %v3784_v37, %v1149_v3  ;;  %v1023_v34 = vadd.f32 %v1007_v22, %v887_v58  ;;  %v4032_v18 = vpop.permute.xlu1 %1237  ;;  %v1072_v33 = vadd.f32 %v1056_v16, %v1024_v56  ;;  %v5404_v63 = vld [vmem:[#allocation83_spill] sm:$0xff] }
 0x20d   :  { %5391 = vst [vmem:[#allocation92_spill] sm:$0xff] %v4004_v26  ;;  %5400 = vst [vmem:[#allocation17_spill] sm:$0xff] %v4032_v18  ;;  %v1289_v36 = vmul.f32 %v5402_v39, %v1254_v51  ;;  %v1394_v20 = vsel %vm1383_vm6, %v3949_v24, %v1364_v59  ;;  %v1390_v14 = vsel %vm1383_vm6, %v1364_v59, %v4004_v26 }
 0x20e   :  { %v1253_v60 = vsel %vm1247_vm5, %v5387_v41, %v5403_v1  ;;  %v1420_v3 = vmul.f32 %v5404_v63, %v1393_v25  ;;  %v1152_v58 = vmul.f32 %v5398_v8, %v1122_v6  ;;  %v1288_v16 = vmul.f32 %v5402_v39, %v1258_v4 }
 0x20f   :  { %v1323_v22 = vmul.f32 %v3826_v44, %v1284_v46  ;;  %v1192_v56 = vmul.f32 %v3784_v37, %v1153_v11  ;;  %v1068_v51 = vadd.f32 %v1052_v0, %v1020_v21  ;;  %v1203_v24 = vadd.f32 %v1187_v5, %v1067_v61  ;;  %v5408_v0 = vld [vmem:[#allocation50_spill] sm:$0xff]  ;;  %v5409_v21 = vld [vmem:[#allocation48_spill] sm:$0xff] }
 0x210   :  { %v4034_v9 = vpop.permute.xlu0 %1491  ;;  %v1389_v59 = vsel %vm1383_vm6, %v5395_v2, %v5405_v38  ;;  %v1071_v26 = vadd.f32 %v1055_v10, %v1023_v34  ;;  %v1424_v41 = vmul.f32 %v5406_v40, %v1394_v20  ;;  %v4057_v1 = vpop.permute.xlu1 %1489  ;;  %v1425_v25 = vmul.f32 %v5406_v40, %v1390_v14  ;;  %v5410_v20 = vld [vmem:[#allocation53_spill] sm:$0xff] }
 0x211   :  { %5401 = vst [vmem:[#allocation8_spill] sm:$0xff] %v4034_v9  ;;  %5407 = vst [vmem:[#allocation18_spill] sm:$0xff] %v4057_v1  ;;  %v1285_v4 = vmul.f32 %v5394_v15, %v1253_v60  ;;  %v1208_v46 = vadd.f32 %v1192_v56, %v1072_v33  ;;  %v1328_v11 = vmul.f32 %v3802_v47, %v1289_v36  ;;  %v5411_v14 = vld [vmem:[#allocation57_spill] sm:$0xff] }
 0x212   :  { %v540_v10 = vsel %vm528_vm1, %v5409_v21, %v5408_v0  ;;  %v1191_v2 = vmul.f32 %v3757_v53, %v1152_v58  ;;  %v1327_v34 = vmul.f32 %v3826_v44, %v1288_v16  ;;  %v671_v33 = vsel %vm655_vm0, %v5411_v14, %v5410_v20 }
 0x213   :  { %v1459_v36 = vmul.f32 %v3864_v55, %v1420_v3  ;;  %v1204_v60 = vadd.f32 %v1188_v54, %v1068_v51  ;;  %v1339_v56 = vadd.f32 %v1323_v22, %v1203_v24  ;;  %v1463_v39 = vmul.f32 %v3864_v55, %v1424_v41 }
 0x214   :  { %v1500_v6 = vpop.permute.xlu0 %1499  ;;  %v1207_v40 = vadd.f32 %v1191_v2, %v1071_v26  ;;  %v1464_v58 = vmul.f32 %v3868_v17, %v1425_v25  ;;  %v1498_v8 = vpop.permute.xlu1 %1497  ;;  %v1344_v38 = vadd.f32 %v1328_v11, %v1208_v46  ;;  %v5413_v26 = vld [vmem:[#allocation94_spill] sm:$0xff]  ;;  %v5415_v25 = vld [vmem:[#allocation71_spill] sm:$0xff] }
 0x215   :  { %v1530_v5 = vsel %vm1519_vm7, %v4034_v9, %v1500_v6  ;;  %v1421_v9 = vmul.f32 %v5404_v63, %v1389_v59  ;;  %v1529_v15 = vsel %vm1519_vm7, %v4057_v1, %v1498_v8  ;;  %v5414_v59 = vld [vmem:[#allocation52_spill] sm:$0xff]  ;;  %v1475_v2 = vadd.f32 %v1459_v36, %v1339_v56 }
 0x216   :  { %v1560_v61 = vmul.f32 %v3923_v31, %v1530_v5  ;;  %v1324_v5 = vmul.f32 %v3802_v47, %v1285_v4  ;;  %v1343_v54 = vadd.f32 %v1327_v34, %v1207_v40  ;;  %v1556_v3 = vmul.f32 %v5413_v26, %v1529_v15  ;;  %v5416_v4 = vld [vmem:[#allocation75_spill] sm:$0xff] }
 0x217   :  { %v544_v41 = vsel %vm528_vm1, %v5414_v59, %v5409_v21  ;;  %v807_v46 = vsel %vm791_vm2, %v5416_v4, %v5415_v25  ;;  %v1480_v40 = vadd.f32 %v1464_v58, %v1344_v38  ;;  %v1460_v1 = vmul.f32 %v3868_v17, %v1421_v9  ;;  %v5420_v58 = vld [vmem:[#allocation30_spill] sm:$0xff] }
 0x218   :  { %v4080_v16 = vpop.permute.xlu0 %1507  ;;  %v1599_v22 = vmul.f32 %v3896_v12, %v1560_v61  ;;  %v1340_v11 = vadd.f32 %v1324_v5, %v1204_v60  ;;  %v1595_v15 = vmul.f32 %v3896_v12, %v1556_v3  ;;  %v4101_v34 = vpop.permute.xlu1 %1505  ;;  %v581_v5 = vmul.f32 %v5420_v58, %v544_v41  ;;  %v5422_v9 = vld [vmem:[#allocation6_spill] sm:$0xff]  ;;  %v5423_v3 = vld [vmem:[#allocation85_spill] sm:$0xff] }
 0x219   :  { %5412 = vst [vmem:[#allocation104_spill] sm:$0xff] %v4080_v16  ;;  %v1526_v24 = vsel %vm1519_vm7, %v1500_v6, %v4080_v16  ;;  %v1479_v6 = vadd.f32 %v1463_v39, %v1343_v54  ;;  %5417 = vst [vmem:[#allocation115_spill] sm:$0xff] %v4101_v34  ;;  %v1525_v39 = vsel %vm1519_vm7, %v1498_v8, %v4101_v34  ;;  %v5421_v54 = vld [vmem:[#allocation73_spill] sm:$0xff] }
 0x21a   :  { %v1561_v51 = vmul.f32 %v3923_v31, %v1526_v24  ;;  %v5418_v24 = vld [vmem:[#allocation56_spill] sm:$0xff]  ;;  %v1557_v38 = vmul.f32 %v5413_v26, %v1525_v39  ;;  %v4114_v36 = vadd.f32 %v1595_v15, %v1475_v2  ;;  %v5426_v15 = vld [vmem:[#allocation7_spill] sm:$0xff] }
 0x21b   :  { %v667_v21 = vsel %vm655_vm0, %v5410_v20, %v5418_v24  ;;  %v5419_v31 = vld [vmem:[#allocation12_spill] sm:$0xff]  ;;  %v4116_v60 = vadd.f32 %v1599_v22, %v1479_v6  ;;  %v803_v20 = vsel %vm791_vm2, %v5415_v25, %v5421_v54  ;;  %v1476_v6 = vadd.f32 %v1460_v1, %v1340_v11  ;;  %v5427_v1 = vld [vmem:[#allocation87_spill] sm:$0xff] }
 0x21c   :  { %v1600_v61 = vmul.f32 %v3907_v19, %v1561_v51  ;;  %v700_v16 = vmul.f32 %v5419_v31, %v671_v33  ;;  %v836_v33 = vmul.f32 %v5422_v9, %v807_v46  ;;  %v5424_v51 = vld [vmem:[#allocation88_spill] sm:$0xff]  ;;  %v1596_v2 = vmul.f32 %v3907_v19, %v1557_v38  ;;  %v4131_v22 = vpop.permute.xlu1 %1357 }
 0x21d   :  { %v943_v8 = vsel %vm927_vm3, %v5424_v51, %v5423_v3  ;;  %5425 = vst [vmem:[#allocation24_spill] sm:$0xff] %v4131_v22  ;;  %v701_v25 = vmul.f32 %v5419_v31, %v667_v21  ;;  %v582_v38 = vmul.f32 %v5420_v58, %v540_v10  ;;  %v837_v26 = vmul.f32 %v5422_v9, %v803_v20  ;;  %v5429_v20 = vld [vmem:[#allocation96_spill] sm:$0xff] }
 0x21e   :  { %v4118_v56 = vadd.f32 %v1600_v61, %v1480_v40  ;;  %v739_v46 = vmul.f32 %v3679_v28, %v700_v16  ;;  %v972_v61 = vmul.f32 %v5426_v15, %v943_v8  ;;  %v4140_v39 = vadd.f32 %v1596_v2, %v1476_v6  ;;  %v5428_v8 = vld [vmem:[#allocation97_spill] sm:$0xff] }
 0x21f   :  { %v939_v11 = vsel %vm927_vm3, %v5423_v3, %v5427_v1  ;;  %v619_v40 = vmul.f32 %v3657_v13, %v581_v5  ;;  %v875_v21 = vmul.f32 %v3687_v52, %v836_v33  ;;  %v740_v10 = vmul.f32 %v3665_v43, %v701_v25 }
 0x220   :  { %v1644_v41 = vadd.f32 %v4118_v56, %v4116_v60  ;;  %v1366_v34 = vpop.permute.xlu1 %1365  ;;  %v1641_v28 = vadd.f32 %v4140_v39, %v4114_v36  ;;  %v1123_v2 = vsel %vm1111_vm4, %v5429_v20, %v5428_v8  ;;  %v973_v3 = vmul.f32 %v5426_v15, %v939_v11 }
 0x221   :  { %v755_v6 = vadd.f32 %v739_v46, %v619_v40  ;;  %v1011_v13 = vmul.f32 %v3724_v48, %v972_v61  ;;  %v620_v52 = vmul.f32 %v3644_v30, %v582_v38  ;;  %v876_v5 = vmul.f32 %v3683_v23, %v837_v26  ;;  %v5432_v46 = vld [vmem:[#allocation99_spill] sm:$0xff] }
 0x222   :  { %1645 = vadd.xlane.f32.xlu0 %v1644_v41  ;;  %1642 = vadd.xlane.f32.xlu1 %v1641_v28  ;;  %v1259_v43 = vsel %vm1247_vm5, %v3972_v49, %v4002_v35  ;;  %v5430_v41 = vld [vmem:[#allocation72_spill] sm:$0xff]  ;;  %v1119_v48 = vsel %vm1111_vm4, %v5428_v8, %v5432_v46  ;;  %v1395_v30 = vsel %vm1383_vm6, %v4131_v22, %v1366_v34  ;;  %v5433_v61 = vld [vmem:[#allocation95_spill] sm:$0xff] }
 0x223   :  { %v891_v33 = vadd.f32 %v875_v21, %v755_v6  ;;  %v1156_v25 = vmul.f32 %v5430_v41, %v1123_v2  ;;  %v756_v40 = vadd.f32 %v740_v10, %v620_v52  ;;  %v1012_v23 = vmul.f32 %v3711_v7, %v973_v3  ;;  %v5434_v28 = vld [vmem:[#allocation20_spill] sm:$0xff]  ;;  %v5435_v10 = vld [vmem:[#allocation77_spill] sm:$0xff] }
 0x224   :  { %v4168_v16 = vpop.permute.xlu1 %1373  ;;  %v1292_v38 = vmul.f32 %v5433_v61, %v1259_v43  ;;  %v1255_v21 = vsel %vm1247_vm5, %v4002_v35, %v4032_v18  ;;  %v1059_v2 = vmul.f32 %v5435_v10, %v5434_v28  ;;  %v1157_v6 = vmul.f32 %v5430_v41, %v1119_v48  ;;  %v5436_v52 = vld [vmem:[#allocation109_spill] sm:$0xff] }
 0x225   :  { %5431 = vst [vmem:[#allocation68_spill] sm:$0xff] %v4168_v16  ;;  %v1027_v26 = vadd.f32 %v1011_v13, %v891_v33  ;;  %v892_v11 = vadd.f32 %v876_v5, %v756_v40  ;;  %v1195_v8 = vmul.f32 %v3757_v53, %v1156_v25  ;;  %v1428_v22 = vmul.f32 %v5436_v52, %v1395_v30  ;;  %v5438_v43 = vld [vmem:[#allocation21_spill] sm:$0xff] }
 0x226   :  { %v1391_v7 = vsel %vm1383_vm6, %v1366_v34, %v4168_v16  ;;  %v1331_v5 = vmul.f32 %v3826_v44, %v1292_v38  ;;  %v1293_v35 = vmul.f32 %v5433_v61, %v1255_v21  ;;  %v1060_v33 = vmul.f32 %v5435_v10, %v5438_v43  ;;  %v5439_v38 = vld [vmem:[#allocation107_spill] sm:$0xff]  ;;  %v5463_v43 = vld [vmem:[#allocation112_spill] sm:$0xff]  ;;  %v5468_v16 = vld [vmem:[#allocation37_spill] sm:$0xff] }
 0x227   :  { %v1028_v3 = vadd.f32 %v1012_v23, %v892_v11  ;;  %v1075_v13 = vadd.f32 %v1059_v2, %v1027_v26  ;;  %v1196_v25 = vmul.f32 %v3784_v37, %v1157_v6  ;;  %v1467_v40 = vmul.f32 %v3864_v55, %v1428_v22  ;;  %v5486_v41 = vld [vmem:[#allocation33_spill] sm:$0xff] }
 0x228   :  { %v4188_v49 = vpop.permute.xlu1 %1493  ;;  %v1429_v48 = vmul.f32 %v5436_v52, %v1391_v7  ;;  %v1332_v44 = vmul.f32 %v3802_v47, %v1293_v35  ;;  %v5441_v47 = vld [vmem:[#allocation34_spill] sm:$0xff] }
 0x229   :  { %5437 = vst [vmem:[#allocation103_spill] sm:$0xff] %v4188_v49  ;;  %v1211_v53 = vadd.f32 %v1195_v8, %v1075_v13  ;;  %v1076_v23 = vadd.f32 %v1060_v33, %v1028_v3  ;;  %v5443_v33 = vld [vmem:[#allocation47_spill] sm:$0xff] }
 0x22a   :  { %v1468_v2 = vmul.f32 %v3868_v17, %v1429_v48  ;;  %v5446_v48 = vld [vmem:[#allocation22_spill] sm:$0xff] }
 0x22b   :  { %v1347_v26 = vadd.f32 %v1331_v5, %v1211_v53  ;;  %v1212_v21 = vadd.f32 %v1196_v25, %v1076_v23  ;;  %v5206_v5 = vmov 0.0|0.0   ;;  %v5208_v53 = vmov 0.0   ;;  %v5444_v25 = vld [vmem:[#allocation19_spill] sm:$0xff] }
 0x22c   :  { %v1502_v30 = vpop.permute.xlu1 %1501  ;;  %2612 = vmatprep.subr.bf16.mxu0 %v5206_v5  ;;  %2560 = vmatprep.mubr.msk.f32.mxu0 %vm2755_vm8, %v5208_v53 }
 0x22d   :  { %v1531_v34 = vsel %vm1519_vm7, %v4188_v49, %v1502_v30  ;;  %v1483_v28 = vadd.f32 %v1467_v40, %v1347_v26  ;;  %v1348_v8 = vadd.f32 %v1332_v44, %v1212_v21  ;;  %v5445_v40 = vld [vmem:[#allocation58_spill] sm:$0xff]  ;;  %v4294_v44 = vld [vmem:[%s5012_s4] sm:$0xff]  ;;  %v5464_v49 = vld [vmem:[#allocation25_spill] sm:$0xff] }
 0x22e   :  { %v1564_v11 = vmul.f32 %v5439_v38, %v1531_v34  ;;  %v5448_v34 = vld [vmem:[#allocation26_spill] sm:$0xff]  ;;  %5449 = vst [vmem:[#allocation50_spill] sm:$0xff] %v4294_v44 }
 0x22f   :  { %v1484_v3 = vadd.f32 %v1468_v2, %v1348_v8 }
 0x230   :  { %v1603_v37 = vmul.f32 %v3896_v12, %v1564_v11  ;;  %v4207_v55 = vpop.permute.xlu1 %1509  ;;  %v4299_v11 = vld [vmem:[%s5012_s4 + $0x8] sm:$0xff] }
 0x231   :  { %5440 = vst [vmem:[#allocation23_spill] sm:$0xff] %v4207_v55  ;;  %v1527_v22 = vsel %vm1519_vm7, %v1502_v30, %v4207_v55  ;;  %v5447_v30 = vld [vmem:[#allocation16_spill] sm:$0xff]  ;;  %5450 = vst [vmem:[#allocation48_spill] sm:$0xff] %v4299_v11  ;;  %v4386_v55 = vld [vmem:[%s5012_s4 + $0x10] sm:$0xff] }
 0x232   :  { %v1565_v6 = vmul.f32 %v5439_v38, %v1527_v22  ;;  %v4213_v7 = vadd.f32 %v1603_v37, %v1483_v28  ;;  %5465 = vst [vmem:[#allocation75_spill] sm:$0xff] %v4386_v55 }
 0x233   :  { %510 = vrot.lane.b32.xlu1 %v5441_v47, %s2744_s28 }
 0x234   :  { %v1604_v13 = vmul.f32 %v3907_v19, %v1565_v6  ;;  %v5442_v19 = vld [vmem:[#allocation42_spill] sm:$0xff] }
 0x236   :  { %v4220_v17 = vadd.f32 %v1604_v13, %v1484_v3  ;;  %v5451_v13 = vld [vmem:[#allocation9_spill] sm:$0xff] }
 0x237   :  { %639 = vrot.lane.b32.xlu1 %v5441_v47, %s2745_s29 }
 0x238   :  { %v1647_v35 = vadd.f32 %v4220_v17, %v4213_v7 }
 0x23a   :  { %1648 = vadd.xlane.f32.xlu0 %v1647_v35  ;;  %v4306_v35 = vmul.f32 %v5451_v13, %v5441_v47 }
 0x23b   :  { %641 = vrot.lane.b32.xlu1 %v5442_v19, %s2745_s29 }
 0x23c   :  { %5452 = vst [vmem:[#allocation53_spill] sm:$0xff] %v4306_v35 }
 0x23f   :  { %777 = vrot.lane.b32.xlu1 %v5442_v19, %s2746_s30 }
 0x243   :  { %516 = vrot.lane.b32.xlu1 %v5443_v33, %s2744_s28 }
 0x247   :  { %645 = vrot.lane.b32.xlu1 %v5443_v33, %s2745_s29 }
 0x24b   :  { %913 = vrot.lane.b32.xlu1 %v5442_v19, %s2747_s13 }
 0x24f   :  { %781 = vrot.lane.b32.xlu1 %v5443_v33, %s2746_s30 }
 0x250   :  { %512 = vrot.lane.b32.xlu0 %v5442_v19, %s2744_s28 }
 0x253   :  { %917 = vrot.lane.b32.xlu1 %v5443_v33, %s2747_s13 }
 0x254   :  { %775 = vrot.lane.b32.xlu0 %v5441_v47, %s2746_s30 }
 0x257   :  { %1105 = vrot.lane.b32.xlu1 %v5444_v25, %s2749_s14 }
 0x258   :  { %514 = vrot.lane.b32.xlu0 %v5445_v40, %s2744_s28 }
 0x25b   :  { %1241 = vrot.lane.b32.xlu1 %v5444_v25, %s2750_s15 }
 0x25c   :  { %643 = vrot.lane.b32.xlu0 %v5445_v40, %s2745_s29 }
 0x25f   :  { %1109 = vrot.lane.b32.xlu1 %v5446_v48, %s2749_s14 }
 0x260   :  { %911 = vrot.lane.b32.xlu0 %v5441_v47, %s2747_s13  ;;  %v4326_v47 = vmul.f32 %v5393_v57, %v5448_v34 }
 0x262   :  { %5455 = vst [vmem:[#allocation71_spill] sm:$0xff] %v4326_v47  ;;  %v5467_v47 = vld [vmem:[#allocation27_spill] sm:$0xff] }
 0x263   :  { %1377 = vrot.lane.b32.xlu1 %v5444_v25, %s2752_s16 }
 0x264   :  { %779 = vrot.lane.b32.xlu0 %v5445_v40, %s2746_s30 }
 0x267   :  { %1245 = vrot.lane.b32.xlu1 %v5446_v48, %s2750_s15 }
 0x268   :  { %915 = vrot.lane.b32.xlu0 %v5445_v40, %s2747_s13 }
 0x26b   :  { %1513 = vrot.lane.b32.xlu1 %v5444_v25, %s2753_s1 }
 0x26c   :  { %1103 = vrot.lane.b32.xlu0 %v5447_v30, %s2749_s14 }
 0x26f   :  { %1381 = vrot.lane.b32.xlu1 %v5446_v48, %s2752_s16 }
 0x270   :  { %1239 = vrot.lane.b32.xlu0 %v5447_v30, %s2750_s15 }
 0x273   :  { %1517 = vrot.lane.b32.xlu1 %v5446_v48, %s2753_s1 }
 0x274   :  { %1107 = vrot.lane.b32.xlu0 %v5448_v34, %s2749_s14 }
 0x278   :  { %1375 = vrot.lane.b32.xlu0 %v5447_v30, %s2752_s16 }
 0x27c   :  { %1243 = vrot.lane.b32.xlu0 %v5448_v34, %s2750_s15 }
 0x280   :  { %1511 = vrot.lane.b32.xlu0 %v5447_v30, %s2753_s1 }
 0x284   :  { %1379 = vrot.lane.b32.xlu0 %v5448_v34, %s2752_s16  ;;  %s2757_s16 = smov [#allocation2]  }
 0x288   :  { %1515 = vrot.lane.b32.xlu0 %v5448_v34, %s2753_s1 }
 0x297   :  { %v1640_v23 = vpop.xlane.xlu0 %1639 }
 0x298   :  { %v1651_v26 = vmul.f32 0.00390625, %v1640_v23  ;;  %v4310_v23 = vmul.f32 %v5451_v13, %v5447_v30  ;;  %v4330_v30 = vmul.f32 %v5435_v10, %v5443_v33  ;;  %v5459_v13 = vld [vmem:[#allocation36_spill] sm:$0xff]  ;;  %v5460_v33 = vld [vmem:[#allocation110_spill] sm:$0xff] }
 0x29a   :  { %v1655_v2 = vadd.f32 %v1651_v26, %v4294_v44  ;;  %5453 = vst [vmem:[#allocation57_spill] sm:$0xff] %v4310_v23  ;;  %v4314_v26 = vmul.f32 %v5385_v42, %v5442_v19  ;;  %v4334_v19 = vmul.f32 %v5435_v10, %v5446_v48 }
 0x2af   :  { %v1643_v21 = vpop.xlane.xlu1 %1642 }
 0x2b0   :  { %v1652_v28 = vmul.f32 0.00390625, %v1643_v21  ;;  %v4318_v21 = vmul.f32 %v5385_v42, %v5444_v25  ;;  %v1646_v25 = vpop.xlane.xlu0 %1645 }
 0x2b1   :  { %v1653_v44 = vmul.f32 0.00390625, %v1646_v25  ;;  %v5466_v25 = vld [vmem:[#allocation41_spill] sm:$0xff] }
 0x2b2   :  { %v1656_v37 = vadd.f32 %v1652_v28, %v4299_v11  ;;  %v4322_v28 = vmul.f32 %v5393_v57, %v5445_v40 }
 0x2b3   :  { %v511_v22 = vpop.permute.xlu1 %510  ;;  %v1657_v61 = vadd.f32 %v1653_v44, %v4386_v55 }
 0x2b4   :  { %v2613_v8 = vpack.c.bf16 %v1656_v37, %v1655_v2  ;;  %5454 = vst [vmem:[#allocation52_spill] sm:$0xff] %v4322_v28  ;;  %v5456_v2 = vld [vmem:[#allocation13_spill] sm:$0xff]  ;;  %v5457_v37 = vld [vmem:[#allocation108_spill] sm:$0xff]  ;;  %v533_v57 = vsel %vm528_vm1, %v5459_v13, %v511_v22 }
 0x2b5   :  { %v4338_v42 = vrot.slane %v5457_v37, %v5456_v2  ;;  %v4349_v34 = vrot.slane %v5460_v33, %v5456_v2  ;;  %v4368_v11 = vrot.slane %v5463_v43, %v5456_v2  ;;  %v4394_v52 = vrot.slane %v3771_v27, %v5456_v2 }
 0x2b6   :  { %2614 = vmatpush3.bf16.msra.mxu0 %v2613_v8  ;;  %v5458_v8 = vld [vmem:[#allocation14_spill] sm:$0xff]  ;;  %v4405_v35 = vrot.slane %v3842_v45, %v5456_v2 }
 0x2b7   :  { %v640_v6 = vpop.permute.xlu1 %639  ;;  %2615 = vmatprep.subr.bf16.mxu0 %v5206_v5  ;;  %v4342_v40 = vrot.slane %v5457_v37, %v5458_v8  ;;  %v5461_v5 = vld [vmem:[#allocation39_spill] sm:$0xff]  ;;  %v4356_v12 = vrot.slane %v5460_v33, %v5458_v8  ;;  %v4376_v33 = vrot.slane %v3729_v32, %v5456_v2  ;;  %v4380_v38 = vrot.slane %v3729_v32, %v5458_v8 }
 0x2b8   :  { %v660_v10 = vsel %vm655_vm0, %v5461_v5, %v640_v6  ;;  %v5462_v37 = vld [vmem:[#allocation111_spill] sm:$0xff]  ;;  %v4372_v5 = vrot.slane %v5463_v43, %v5458_v8  ;;  %v656_v43 = vsel %vm655_vm0, %v640_v6, %v5466_v25  ;;  %v529_v32 = vsel %vm528_vm1, %v511_v22, %v5468_v16  ;;  %5469 = vst [vmem:[#allocation56_spill] sm:$0xff] %v4405_v35  ;;  %v5471_v22 = vld [vmem:[#allocation121_spill] sm:$0xff] }
 0x2b9   :  { %v4360_v53 = vrot.slane %v5462_v37, %v5456_v2  ;;  %v4364_v13 = vrot.slane %v5462_v37, %v5458_v8  ;;  %v571_v37 = vmul.f32 %v5464_v49, %v533_v57  ;;  %v690_v28 = vmul.f32 %v5467_v47, %v660_v10  ;;  %v5480_v35 = vld [vmem:[#allocation29_spill] sm:$0xff] }
 0x2ba   :  { %v4401_v23 = vrot.slane %v3771_v27, %v5458_v8  ;;  %v4409_v6 = vrot.slane %v3842_v45, %v5458_v8  ;;  %v4419_v27 = vrot.slane %v5471_v22, %v5456_v2  ;;  %v4423_v25 = vrot.slane %v5471_v22, %v5458_v8  ;;  %v5474_v2 = vld [vmem:[#allocation43_spill] sm:$0xff]  ;;  %v5475_v8 = vld [vmem:[#allocation45_spill] sm:$0xff]  ;;  %v5476_v22 = vld [vmem:[#allocation46_spill] sm:$0xff] }
 0x2bb   :  { %v642_v3 = vpop.permute.xlu1 %641  ;;  %v691_v45 = vmul.f32 %v5467_v47, %v656_v43 }
 0x2bc   :  { %5470 = vst [vmem:[#allocation12_spill] sm:$0xff] %v4409_v6  ;;  %5472 = vst [vmem:[#allocation30_spill] sm:$0xff] %v4419_v27  ;;  %v572_v6 = vmul.f32 %v5464_v49, %v529_v32  ;;  %v661_v27 = vsel %vm655_vm0, %v5474_v2, %v642_v3  ;;  %v657_v44 = vsel %vm655_vm0, %v642_v3, %v5475_v8  ;;  %v5478_v32 = vld [vmem:[#allocation44_spill] sm:$0xff]  ;;  %v5479_v2 = vld [vmem:[#allocation11_spill] sm:$0xff] }
 0x2bd   :  { %5473 = vst [vmem:[#allocation73_spill] sm:$0xff] %v4423_v25  ;;  %v694_v8 = vmul.f32 %v5479_v2, %v661_v27  ;;  %v695_v25 = vmul.f32 %v5479_v2, %v657_v44 }
 0x2bf   :  { %v778_v48 = vpop.permute.xlu1 %777  ;;  %v734_v2 = vmul.f32 %v4356_v12, %v695_v25 }
 0x2c0   :  { %v793_v47 = vsel %vm791_vm2, %v778_v48, %v5476_v22 }
 0x2c3   :  { %v517_v57 = vpop.permute.xlu1 %516 }
 0x2c4   :  { %v532_v10 = vsel %vm528_vm1, %v517_v57, %v5414_v59  ;;  %v536_v16 = vsel %vm528_vm1, %v5408_v0, %v517_v57  ;;  %v609_v0 = vmul.f32 %v4338_v42, %v571_v37  ;;  %v729_v57 = vmul.f32 %v4349_v34, %v690_v28  ;;  %v4446_v28 = vld [vmem:[%s5012_s4 + $0x18] sm:$0xff]  ;;  %s2493_s4 = sshll.u32 %s2757_s16, 4  ;;  %s2494_s4 = int_to_ptr.vmem [resolvable:$true] %s2493_s4 }
 0x2c5   :  { %v583_v18 = vmul.f32 %v5420_v58, %v536_v16  ;;  %v584_v59 = vmul.f32 %v5420_v58, %v532_v10  ;;  %5477 = vst [vmem:[#allocation6_spill] sm:$0xff] %v4446_v28  ;;  %v797_v10 = vsel %vm791_vm2, %v5478_v32, %v778_v48  ;;  %v610_v48 = vmul.f32 %v4342_v40, %v572_v6  ;;  %v5482_v6 = vld [vmem:[#allocation61_spill] sm:$0xff]  ;;  %s2713_s1 = scalar_lea.vmem %s2494_s4, 256  ;;  %p2718_p1 = scmp.lt.s32.totalorder %s2494_s4, %s2494_s4 }
 0x2c6   :  { %v745_v32 = vadd.f32 %v729_v57, %v609_v0  ;;  %v830_v63 = vmul.f32 %v5480_v35, %v797_v10  ;;  %v5483_v57 = vld [vmem:[#allocation40_spill] sm:$0xff]  ;;  %v5484_v10 = vld [vmem:[#allocation38_spill] sm:$0xff]  ;;  %p2714_p0 = scmp.ne.s32.totalorder %s2494_s4, %s2713_s1  ;;  %p2719_p2 = scmp.lt.s32.totalorder %s2713_s1, %s2713_s1 }
 0x2c7   :  { %v621_v58 = vmul.f32 %v4338_v42, %v583_v18  ;;  %v622_v49 = vmul.f32 %v4342_v40, %v584_v59  ;;  %v646_v43 = vpop.permute.xlu1 %645  ;;  %v1649_v37 = vpop.xlane.xlu0 %1648  ;;  %v730_v59 = vmul.f32 %v4356_v12, %v691_v45 }
 0x2c8   :  { %v659_v3 = vsel %vm655_vm0, %v646_v43, %v5411_v14  ;;  %v663_v18 = vsel %vm655_vm0, %v5418_v24, %v646_v43  ;;  %v1654_v16 = vmul.f32 0.00390625, %v1649_v37  ;;  %v831_v24 = vmul.f32 %v5480_v35, %v793_v47  ;;  %p2720_p3 = por %p2719_p2, %p2718_p1 }
 0x2c9   :  { %v702_v22 = vmul.f32 %v5419_v31, %v663_v18  ;;  %v703_v55 = vmul.f32 %v5419_v31, %v659_v3  ;;  %v5481_v18 = vld [vmem:[#allocation62_spill] sm:$0xff]  ;;  %v746_v47 = vadd.f32 %v730_v59, %v610_v48 }
 0x2ca   :  { %v1658_v14 = vadd.f32 %v1654_v16, %v4446_v28  ;;  %p2721_p4 = pnand %p2720_p3, %p2714_p0 }
 0x2cb   :  { %v741_v43 = vmul.f32 %v4349_v34, %v702_v22  ;;  %v742_v45 = vmul.f32 %v4356_v12, %v703_v55  ;;  %v914_v27 = vpop.permute.xlu1 %913  ;;  %v513_v37 = vpop.permute.xlu0 %512  ;;  %v733_v55 = vmul.f32 %v4349_v34, %v694_v8  ;;  %v5485_v22 = vld [vmem:[#allocation114_spill] sm:$0xff] }
 0x2cc   :  { %v929_v31 = vsel %vm927_vm3, %v914_v27, %v5481_v18  ;;  %v933_v0 = vsel %vm927_vm3, %v5482_v6, %v914_v27  ;;  %v530_v44 = vsel %vm528_vm1, %v513_v37, %v5483_v57  ;;  %v534_v35 = vsel %vm528_vm1, %v5484_v10, %v513_v37 }
 0x2cd   :  { %v757_v3 = vadd.f32 %v741_v43, %v621_v58  ;;  %v758_v16 = vadd.f32 %v742_v45, %v622_v49  ;;  %v575_v18 = vmul.f32 %v5485_v22, %v534_v35  ;;  %v576_v28 = vmul.f32 %v5485_v22, %v530_v44 }
 0x2ce   :  { %v2616_v27 = vpack.c.bf16 %v1658_v14, %v1657_v61  ;;  %v869_v6 = vmul.f32 %v4360_v53, %v830_v63  ;;  %v870_v57 = vmul.f32 %v4364_v13, %v831_v24  ;;  %v966_v20 = vmul.f32 %v5486_v41, %v933_v0  ;;  %v4499_v61 = vld [vmem:[%s5014_s6] sm:$0xff]  ;;  %v5489_v24 = vld [vmem:[#allocation49_spill] sm:$0xff] }
 0x2cf   :  { %v967_v37 = vmul.f32 %v5486_v41, %v929_v31  ;;  %v782_v59 = vpop.permute.xlu1 %781  ;;  %v776_v48 = vpop.permute.xlu0 %775  ;;  %v613_v58 = vmul.f32 %v4338_v42, %v575_v18  ;;  %v614_v49 = vmul.f32 %v4342_v40, %v576_v28  ;;  %v5487_v28 = vpack.c.bf16 %v4140_v39, %v3965_v62  ;;  %v5488_v14 = vld [vmem:[#allocation51_spill] sm:$0xff]  ;;  %v5490_v31 = vld [vmem:[#allocation28_spill] sm:$0xff] }
 0x2d0   :  { %2617 = vmatpush3.bf16.msra.mxu0 %v2616_v27  ;;  %v795_v25 = vsel %vm791_vm2, %v782_v59, %v5416_v4  ;;  %v799_v63 = vsel %vm791_vm2, %v5421_v54, %v782_v59  ;;  %v792_v4 = vsel %vm791_vm2, %v776_v48, %v5488_v14  ;;  %v796_v54 = vsel %vm791_vm2, %v5489_v24, %v776_v48 }
 0x2d1   :  { %v838_v41 = vmul.f32 %v5422_v9, %v799_v63  ;;  %v839_v8 = vmul.f32 %v5422_v9, %v795_v25  ;;  %2625 = vmatprep.subr.bf16.mxu0 %v5487_v28  ;;  %v749_v43 = vadd.f32 %v733_v55, %v613_v58  ;;  %v750_v45 = vadd.f32 %v734_v2, %v614_v49  ;;  %v5495_v25 = vld [vmem:[#allocation54_spill] sm:$0xff] }
 0x2d2   :  { %v826_v0 = vmul.f32 %v5490_v31, %v796_v54  ;;  %v827_v44 = vmul.f32 %v5490_v31, %v792_v4  ;;  %v1005_v9 = vmul.f32 %v4368_v11, %v966_v20  ;;  %v1006_v10 = vmul.f32 %v4372_v5, %v967_v37  ;;  %v5498_v54 = vld [vmem:[#allocation93_spill] sm:$0xff] }
 0x2d3   :  { %v877_v62 = vmul.f32 %v4360_v53, %v838_v41  ;;  %v878_v39 = vmul.f32 %v4364_v13, %v839_v8  ;;  %2561 = vmatmul.mubr.msk.f32.vlgmr.msra.gmra.mrb[0].mxu0 %vm1661_vm9, %v4499_v61  ;;  %v918_v35 = vpop.permute.xlu1 %917  ;;  %v515_v22 = vpop.permute.xlu0 %514  ;;  %v885_v18 = vadd.f32 %v869_v6, %v749_v43  ;;  %v886_v55 = vadd.f32 %v870_v57, %v750_v45  ;;  %v5496_v8 = vld [vmem:[#allocation116_spill] sm:$0xff]  ;;  %v5499_v45 = vld [vmem:[#allocation90_spill] sm:$0xff] }
 0x2d4   :  { %v865_v2 = vmul.f32 %v4360_v53, %v826_v0  ;;  %v866_v27 = vmul.f32 %v4364_v13, %v827_v44  ;;  %v5491_v20 = vpack.c.bf16 %v4114_v36, %v3963_v29  ;;  %v931_v48 = vsel %vm927_vm3, %v918_v35, %v5424_v51 }
 0x2d5   :  { %v893_v37 = vadd.f32 %v877_v62, %v757_v3  ;;  %v894_v59 = vadd.f32 %v878_v39, %v758_v16  ;;  %v935_v58 = vsel %vm927_vm3, %v5427_v1, %v918_v35  ;;  %v5492_v6 = vpack.c.bf16 %v4220_v17, %v4118_v56  ;;  %v5494_v16 = vld [vmem:[#allocation55_spill] sm:$0xff]  ;;  %v5501_v62 = vld [vmem:[#allocation60_spill] sm:$0xff] }
 0x2d6   :  { %2627 = vmatpush1.bf16.msra.mxu0 %v5491_v20  ;;  %v4534_v57 = vadd.f32 %v865_v2, %v745_v32  ;;  %v4536_v49 = vadd.f32 %v866_v27, %v746_v47  ;;  %v974_v29 = vmul.f32 %v5426_v15, %v935_v58  ;;  %v975_v36 = vmul.f32 %v5426_v15, %v931_v48  ;;  %v5502_v39 = vld [vmem:[#allocation59_spill] sm:$0xff]  ;;  %v5504_v27 = vld [vmem:[#allocation106_spill] sm:$0xff] }
 0x2d7   :  { %2629 = vmatprep.subr.bf16.mxu0 %v5492_v6  ;;  %v5493_v3 = vmov 0.0   ;;  %v531_v51 = vsel %vm528_vm1, %v515_v22, %v5494_v16  ;;  %v535_v1 = vsel %vm528_vm1, %v5495_v25, %v515_v22  ;;  %v1106_v56 = vpop.permute.xlu1 %1105  ;;  %v1021_v17 = vadd.f32 %v1005_v9, %v885_v18  ;;  %v644_v63 = vpop.permute.xlu0 %643  ;;  %v5505_v20 = vld [vmem:[#allocation102_spill] sm:$0xff] }
 0x2d8   :  { %2038 = vmatprep.mubr.f32.mxu0 %v5493_v3  ;;  %v1022_v32 = vadd.f32 %v1006_v10, %v886_v55  ;;  %v1013_v47 = vmul.f32 %v4368_v11, %v974_v29  ;;  %v1014_v41 = vmul.f32 %v4372_v5, %v975_v36  ;;  %v579_v15 = vmul.f32 %v5496_v8, %v535_v1  ;;  %v5503_v55 = vld [vmem:[#allocation31_spill] sm:$0xff]  ;;  %v5506_v58 = vld [vmem:[#allocation74_spill] sm:$0xff] }
 0x2d9   :  { %v580_v28 = vmul.f32 %v5496_v8, %v531_v51  ;;  %v5497_v14 = vpack.c.bf16 %v4213_v7, %v4116_v60  ;;  %v1069_v4 = vadd.f32 %v4314_v26, %v1021_v17  ;;  %v1113_v43 = vsel %vm1111_vm4, %v5498_v54, %v1106_v56  ;;  %v5500_v60 = vld [vmem:[#allocation35_spill] sm:$0xff]  ;;  %v5507_v51 = vld [vmem:[#allocation65_spill] sm:$0xff] }
 0x2da   :  { %v1070_v24 = vadd.f32 %v4318_v21, %v1022_v32  ;;  %v1125_v31 = vsel %vm1111_vm4, %v1106_v56, %v5499_v45  ;;  %v1029_v0 = vadd.f32 %v1013_v47, %v893_v37  ;;  %v1030_v44 = vadd.f32 %v1014_v41, %v894_v59  ;;  %v5508_v1 = vld [vmem:[#allocation63_spill] sm:$0xff] }
 0x2db   :  { %2631 = vmatpush1.bf16.msra.mxu0 %v5497_v14  ;;  %v617_v9 = vmul.f32 %v4338_v42, %v579_v15  ;;  %v618_v10 = vmul.f32 %v4342_v40, %v580_v28  ;;  %v1150_v7 = vmul.f32 %v5500_v60, %v1113_v43  ;;  %v1151_v26 = vmul.f32 %v5500_v60, %v1125_v31  ;;  %v1242_v22 = vpop.permute.xlu1 %1241  ;;  %v912_v18 = vpop.permute.xlu0 %911  ;;  %v5509_v28 = vld [vmem:[#allocation32_spill] sm:$0xff] }
 0x2dc   :  { %v658_v21 = vsel %vm655_vm0, %v644_v63, %v5501_v62  ;;  %v662_v35 = vsel %vm655_vm0, %v5502_v39, %v644_v63  ;;  %v1249_v40 = vsel %vm1247_vm5, %v5504_v27, %v1242_v22  ;;  %v1261_v37 = vsel %vm1247_vm5, %v1242_v22, %v5505_v20  ;;  %v5514_v22 = vld [vmem:[#allocation15_spill] sm:$0xff]  ;;  %v5515_v27 = vld [vmem:[#allocation105_spill] sm:$0xff] }
 0x2dd   :  { %v698_v2 = vmul.f32 %v5503_v55, %v662_v35  ;;  %v699_v42 = vmul.f32 %v5503_v55, %v658_v21  ;;  %v1189_v59 = vmul.f32 %v4376_v33, %v1150_v7  ;;  %v1190_v48 = vmul.f32 %v4380_v38, %v1151_v26  ;;  %v5511_v7 = vld [vmem:[#allocation72_spill] sm:$0xff]  ;;  %v5512_v21 = vld [vmem:[#allocation66_spill] sm:$0xff]  ;;  %v5516_v20 = vld [vmem:[#allocation101_spill] sm:$0xff] }
 0x2de   :  { %v1286_v6 = vmul.f32 %v5506_v58, %v1249_v40  ;;  %v1287_v29 = vmul.f32 %v5506_v58, %v1261_v37  ;;  %v928_v25 = vsel %vm927_vm3, %v912_v18, %v5507_v51  ;;  %v932_v56 = vsel %vm927_vm3, %v5508_v1, %v912_v18  ;;  %v5519_v51 = vld [vmem:[#allocation78_spill] sm:$0xff] }
 0x2df   :  { %v737_v36 = vmul.f32 %v4349_v34, %v698_v2  ;;  %v738_v16 = vmul.f32 %v4356_v12, %v699_v42  ;;  %v1205_v17 = vadd.f32 %v1189_v59, %v1069_v4  ;;  %v1206_v32 = vadd.f32 %v1190_v48, %v1070_v24  ;;  %v1110_v41 = vpop.permute.xlu1 %1109  ;;  %v780_v8 = vpop.permute.xlu0 %779  ;;  %v5517_v59 = vld [vmem:[#allocation83_spill] sm:$0xff] }
 0x2e0   :  { %v1325_v63 = vmul.f32 %v4394_v52, %v1286_v6  ;;  %v1326_v47 = vmul.f32 %v4401_v23, %v1287_v29  ;;  %v962_v12 = vmul.f32 %v5509_v28, %v932_v56  ;;  %v963_v14 = vmul.f32 %v5509_v28, %v928_v25 }
 0x2e1   :  { %v753_v15 = vadd.f32 %v737_v36, %v617_v9  ;;  %v754_v34 = vadd.f32 %v738_v16, %v618_v10  ;;  %v1077_v45 = vadd.f32 %v4330_v30, %v1029_v0  ;;  %v1078_v31 = vadd.f32 %v4334_v19, %v1030_v44  ;;  %v5510_v9 = vld [vmem:[#allocation96_spill] sm:$0xff] }
 0x2e2   :  { %v1341_v54 = vadd.f32 %v1325_v63, %v1205_v17  ;;  %v1342_v43 = vadd.f32 %v1326_v47, %v1206_v32  ;;  %v1001_v4 = vmul.f32 %v4368_v11, %v962_v12  ;;  %v1002_v24 = vmul.f32 %v4372_v5, %v963_v14  ;;  %v5513_v19 = vld [vmem:[#allocation64_spill] sm:$0xff]  ;;  %v5523_v12 = vld [vmem:[#allocation17_spill] sm:$0xff] }
 0x2e3   :  { %v1115_v60 = vsel %vm1111_vm4, %v5432_v46, %v1110_v41  ;;  %v1127_v10 = vsel %vm1111_vm4, %v1110_v41, %v5510_v9  ;;  %v794_v30 = vsel %vm791_vm2, %v780_v8, %v5512_v21  ;;  %v798_v0 = vsel %vm791_vm2, %v5513_v19, %v780_v8  ;;  %v1378_v44 = vpop.permute.xlu1 %1377  ;;  %v916_v39 = vpop.permute.xlu0 %915  ;;  %v5518_v36 = vld [vmem:[#allocation80_spill] sm:$0xff]  ;;  %v5522_v41 = vld [vmem:[#allocation5_spill] sm:$0xff] }
 0x2e4   :  { %v1158_v26 = vmul.f32 %v5511_v7, %v1115_v60  ;;  %v1159_v62 = vmul.f32 %v5511_v7, %v1127_v10  ;;  %v1017_v46 = vadd.f32 %v1001_v4, %v4534_v57  ;;  %v1018_v35 = vadd.f32 %v1002_v24, %v4536_v49  ;;  %v5520_v32 = vld [vmem:[#allocation56_spill] sm:$0xff]  ;;  %v5526_v7 = vld [vmem:[#allocation53_spill] sm:$0xff] }
 0x2e5   :  { %v834_v18 = vmul.f32 %v5514_v22, %v798_v0  ;;  %v835_v55 = vmul.f32 %v5514_v22, %v794_v30  ;;  %v1385_v40 = vsel %vm1383_vm6, %v5515_v27, %v1378_v44  ;;  %v1397_v37 = vsel %vm1383_vm6, %v1378_v44, %v5516_v20  ;;  %v5521_v63 = vld [vmem:[#allocation12_spill] sm:$0xff] }
 0x2e6   :  { %v1197_v2 = vmul.f32 %v4376_v33, %v1158_v26  ;;  %v1198_v42 = vmul.f32 %v4380_v38, %v1159_v62  ;;  %v1422_v48 = vmul.f32 %v5517_v59, %v1385_v40  ;;  %v1423_v58 = vmul.f32 %v5517_v59, %v1397_v37  ;;  %v5527_v62 = vld [vmem:[#allocation57_spill] sm:$0xff]  ;;  %v5532_v40 = vld [vmem:[#allocation18_spill] sm:$0xff] }
 0x2e7   :  { %v873_v57 = vmul.f32 %v4360_v53, %v834_v18  ;;  %v874_v49 = vmul.f32 %v4364_v13, %v835_v55  ;;  %v930_v16 = vsel %vm927_vm3, %v916_v39, %v5518_v36  ;;  %v934_v25 = vsel %vm927_vm3, %v5519_v51, %v916_v39  ;;  %v1246_v1 = vpop.permute.xlu1 %1245  ;;  %v1104_v56 = vpop.permute.xlu0 %1103  ;;  %v5529_v39 = vld [vmem:[#allocation81_spill] sm:$0xff]  ;;  %v5530_v18 = vld [vmem:[#allocation70_spill] sm:$0xff] }
 0x2e8   :  { %v1213_v6 = vadd.f32 %v1197_v2, %v1077_v45  ;;  %v1214_v29 = vadd.f32 %v1198_v42, %v1078_v31  ;;  %v1461_v13 = vmul.f32 %v5520_v32, %v1422_v48  ;;  %v1462_v47 = vmul.f32 %v5521_v63, %v1423_v58  ;;  %v5524_v45 = vld [vmem:[#allocation125_spill] sm:$0xff]  ;;  %v5531_v42 = vld [vmem:[#allocation115_spill] sm:$0xff] }
 0x2e9   :  { %v889_v17 = vadd.f32 %v873_v57, %v753_v15  ;;  %v890_v53 = vadd.f32 %v874_v49, %v754_v34  ;;  %v970_v8 = vmul.f32 %v5522_v41, %v934_v25  ;;  %v971_v28 = vmul.f32 %v5522_v41, %v930_v16  ;;  %v5525_v34 = vld [vmem:[#allocation95_spill] sm:$0xff]  ;;  %v5533_v49 = vld [vmem:[#allocation94_spill] sm:$0xff]  ;;  %v5535_v16 = vld [vmem:[#allocation100_spill] sm:$0xff] }
 0x2ea   :  { %v1251_v14 = vsel %vm1247_vm5, %v5523_v12, %v1246_v1  ;;  %v1263_v31 = vsel %vm1247_vm5, %v1246_v1, %v5524_v45  ;;  %v4646_v4 = vadd.f32 %v1461_v13, %v1341_v54  ;;  %v4648_v15 = vadd.f32 %v1462_v47, %v1342_v43  ;;  %v5528_v43 = vld [vmem:[#allocation84_spill] sm:$0xff]  ;;  %v5538_v47 = vld [vmem:[#allocation30_spill] sm:$0xff]  ;;  %v5540_v12 = vld [vmem:[#allocation67_spill] sm:$0xff] }
 0x2eb   :  { %v1294_v24 = vmul.f32 %v5525_v34, %v1251_v14  ;;  %v1295_v60 = vmul.f32 %v5525_v34, %v1263_v31  ;;  %v1009_v9 = vmul.f32 %v4368_v11, %v970_v8  ;;  %v1010_v10 = vmul.f32 %v4372_v5, %v971_v28  ;;  %v1514_v30 = vpop.permute.xlu1 %1513  ;;  %v1240_v19 = vpop.permute.xlu0 %1239  ;;  %v5536_v25 = vld [vmem:[#allocation68_spill] sm:$0xff]  ;;  %v5539_v8 = vld [vmem:[#allocation73_spill] sm:$0xff] }
 0x2ec   :  { %v1065_v26 = vadd.f32 %v5526_v7, %v1017_v46  ;;  %v1066_v21 = vadd.f32 %v5527_v62, %v1018_v35  ;;  %v1112_v44 = vsel %vm1111_vm4, %v5528_v43, %v1104_v56  ;;  %v1124_v11 = vsel %vm1111_vm4, %v1104_v56, %v5529_v39  ;;  %v5537_v56 = vld [vmem:[#allocation24_spill] sm:$0xff]  ;;  %v5541_v31 = vld [vmem:[#allocation109_spill] sm:$0xff] }
 0x2ed   :  { %v1333_v0 = vmul.f32 %v4394_v52, %v1294_v24  ;;  %v1334_v54 = vmul.f32 %v4401_v23, %v1295_v60  ;;  %v1025_v22 = vadd.f32 %v1009_v9, %v889_v17  ;;  %v1026_v5 = vadd.f32 %v1010_v10, %v890_v53  ;;  %v5542_v60 = vld [vmem:[#allocation52_spill] sm:$0xff]  ;;  %v5543_v10 = vld [vmem:[#allocation71_spill] sm:$0xff]  ;;  %v5544_v62 = vld [vmem:[#allocation117_spill] sm:$0xff] }
 0x2ee   :  { %v1146_v46 = vmul.f32 %v5530_v18, %v1112_v44  ;;  %v1147_v35 = vmul.f32 %v5530_v18, %v1124_v11  ;;  %v1521_v27 = vsel %vm1519_vm7, %v5531_v42, %v1514_v30  ;;  %v1533_v20 = vsel %vm1519_vm7, %v1514_v30, %v5532_v40  ;;  %v5546_v11 = vld [vmem:[#allocation79_spill] sm:$0xff] }
 0x2ef   :  { %v1349_v55 = vadd.f32 %v1333_v0, %v1213_v6  ;;  %v1350_v2 = vadd.f32 %v1334_v54, %v1214_v29  ;;  %v1558_v59 = vmul.f32 %v5533_v49, %v1521_v27  ;;  %v1559_v48 = vmul.f32 %v5533_v49, %v1533_v20  ;;  %v1382_v58 = vpop.permute.xlu1 %1381  ;;  %v1108_v36 = vpop.permute.xlu0 %1107  ;;  %v5534_v6 = vld [vmem:[#allocation89_spill] sm:$0xff]  ;;  %v5547_v18 = vld [vmem:[#allocation23_spill] sm:$0xff] }
 0x2f0   :  { %v1185_v37 = vmul.f32 %v4376_v33, %v1146_v46  ;;  %v1186_v57 = vmul.f32 %v4380_v38, %v1147_v35  ;;  %v1248_v29 = vsel %vm1247_vm5, %v5534_v6, %v1240_v19  ;;  %v1260_v51 = vsel %vm1247_vm5, %v1240_v19, %v5535_v16  ;;  %v5548_v35 = vld [vmem:[#allocation103_spill] sm:$0xff]  ;;  %v5550_v6 = vld [vmem:[#allocation122_spill] sm:$0xff] }
 0x2f1   :  { %v1387_v1 = vsel %vm1383_vm6, %v5536_v25, %v1382_v58  ;;  %v1399_v17 = vsel %vm1383_vm6, %v1382_v58, %v5537_v56  ;;  %v1597_v41 = vmul.f32 %v5538_v47, %v1558_v59  ;;  %v1598_v28 = vmul.f32 %v5539_v8, %v1559_v48  ;;  %v5549_v59 = vld [vmem:[#allocation107_spill] sm:$0xff]  ;;  %v5551_v16 = vld [vmem:[#allocation118_spill] sm:$0xff] }
 0x2f2   :  { %v1201_v53 = vadd.f32 %v1185_v37, %v1065_v26  ;;  %v1202_v13 = vadd.f32 %v1186_v57, %v1066_v21  ;;  %v1282_v14 = vmul.f32 %v5540_v12, %v1248_v29  ;;  %v1283_v45 = vmul.f32 %v5540_v12, %v1260_v51  ;;  %v5545_v21 = vld [vmem:[#allocation113_spill] sm:$0xff]  ;;  %v5552_v56 = vld [vmem:[#allocation82_spill] sm:$0xff]  ;;  %v5553_v12 = vld [vmem:[#allocation119_spill] sm:$0xff] }
 0x2f3   :  { %v1430_v34 = vmul.f32 %v5541_v31, %v1387_v1  ;;  %v1431_v24 = vmul.f32 %v5541_v31, %v1399_v17  ;;  %v1073_v9 = vadd.f32 %v5542_v60, %v1025_v22  ;;  %v1074_v7 = vadd.f32 %v5543_v10, %v1026_v5  ;;  %v1518_v19 = vpop.permute.xlu1 %1517  ;;  %v1376_v0 = vpop.permute.xlu0 %1375  ;;  %v5556_v10 = vld [vmem:[#allocation123_spill] sm:$0xff] }
 0x2f4   :  { %v1114_v26 = vsel %vm1111_vm4, %v5544_v62, %v1108_v36  ;;  %v1126_v30 = vsel %vm1111_vm4, %v1108_v36, %v5545_v21  ;;  %v1321_v54 = vmul.f32 %v4394_v52, %v1282_v14  ;;  %v1322_v43 = vmul.f32 %v4401_v23, %v1283_v45 }
 0x2f5   :  { %v1469_v44 = vmul.f32 %v5520_v32, %v1430_v34  ;;  %v1470_v39 = vmul.f32 %v5521_v63, %v1431_v24  ;;  %v1154_v22 = vmul.f32 %v5546_v11, %v1114_v26  ;;  %v1155_v5 = vmul.f32 %v5546_v11, %v1126_v30  ;;  %v5557_v26 = vld [vmem:[#allocation120_spill] sm:$0xff]  ;;  %v5558_v30 = vld [vmem:[#allocation98_spill] sm:$0xff] }
 0x2f6   :  { %v1523_v46 = vsel %vm1519_vm7, %v5547_v18, %v1518_v19  ;;  %v1535_v42 = vsel %vm1519_vm7, %v1518_v19, %v5548_v35  ;;  %v1337_v27 = vadd.f32 %v1321_v54, %v1201_v53  ;;  %v1338_v40 = vadd.f32 %v1322_v43, %v1202_v13 }
 0x2f7   :  { %v1485_v20 = vadd.f32 %v1469_v44, %v1349_v55  ;;  %v1486_v37 = vadd.f32 %v1470_v39, %v1350_v2  ;;  %v1193_v57 = vmul.f32 %v4376_v33, %v1154_v22  ;;  %v1194_v49 = vmul.f32 %v4380_v38, %v1155_v5  ;;  %v1244_v36 = vpop.permute.xlu0 %1243 }
 0x2f8   :  { %v1566_v48 = vmul.f32 %v5549_v59, %v1523_v46  ;;  %v1567_v58 = vmul.f32 %v5549_v59, %v1535_v42  ;;  %v1384_v29 = vsel %vm1383_vm6, %v5550_v6, %v1376_v0  ;;  %v1396_v51 = vsel %vm1383_vm6, %v1376_v0, %v5551_v16  ;;  %v5559_v46 = vld [vmem:[#allocation92_spill] sm:$0xff] }
 0x2f9   :  { %v4725_v55 = vadd.f32 %v1597_v41, %v4646_v4  ;;  %v4728_v33 = vadd.f32 %v1598_v28, %v4648_v15  ;;  %v1209_v38 = vadd.f32 %v1193_v57, %v1073_v9  ;;  %v1210_v2 = vadd.f32 %v1194_v49, %v1074_v7  ;;  %v5554_v41 = vld [vmem:[#allocation76_spill] sm:$0xff]  ;;  %v5555_v28 = vld [vmem:[#allocation86_spill] sm:$0xff] }
 0x2fa   :  { %v1605_v25 = vmul.f32 %v5538_v47, %v1566_v48  ;;  %v1606_v1 = vmul.f32 %v5539_v8, %v1567_v58  ;;  %v1418_v17 = vmul.f32 %v5552_v56, %v1384_v29  ;;  %v1419_v53 = vmul.f32 %v5552_v56, %v1396_v51  ;;  %v5560_v42 = vld [vmem:[#allocation124_spill] sm:$0xff] }
 0x2fb   :  { %v2067_v13 = vadd.f32 %v4728_v33, %v4725_v55  ;;  %v1250_v4 = vsel %vm1247_vm5, %v5553_v12, %v1244_v36  ;;  %v1262_v15 = vsel %vm1247_vm5, %v1244_v36, %v5554_v41  ;;  %v1512_v45 = vpop.permute.xlu0 %1511  ;;  %v5562_v36 = vld [vmem:[#allocation104_spill] sm:$0xff] }
 0x2fc   :  { %v1290_v14 = vmul.f32 %v5555_v28, %v1250_v4  ;;  %v4743_v31 = vadd.f32 %v1605_v25, %v1485_v20  ;;  %v4745_v34 = vadd.f32 %v1606_v1, %v1486_v37  ;;  %v1457_v24 = vmul.f32 %v5520_v32, %v1418_v17  ;;  %v5563_v29 = vld [vmem:[#allocation8_spill] sm:$0xff] }
 0x2fd   :  { %v1458_v60 = vmul.f32 %v5521_v63, %v1419_v53  ;;  %2068 = vadd.xlane.f32.xlu0 %v2067_v13  ;;  %v1291_v9 = vmul.f32 %v5555_v28, %v1262_v15  ;;  %v1520_v7 = vsel %vm1519_vm7, %v5556_v10, %v1512_v45  ;;  %v1532_v21 = vsel %vm1519_vm7, %v1512_v45, %v5557_v26  ;;  %v4809_v15 = vld [vmem:[%s5016_s8] sm:$0xff]  ;;  %v4826_v10 = vld [vmem:[%s5016_s8 + $0x8] sm:$0xff] }
 0x2fe   :  { %v1329_v62 = vmul.f32 %v4394_v52, %v1290_v14  ;;  %v1554_v19 = vmul.f32 %v5558_v30, %v1520_v7  ;;  %v4760_v0 = vadd.f32 %v4745_v34, %v4743_v31  ;;  %v1555_v43 = vmul.f32 %v5558_v30, %v1532_v21  ;;  %2565 = vmatprep.mubr.msk.f32.mxu1 %vm1744_vm10, %v4809_v15  ;;  %v4831_v7 = vld [vmem:[%s5016_s8 + $0x10] sm:$0xff]  ;;  %v5568_v26 = vld [vmem:[#allocation75_spill] sm:$0xff]  ;;  %v5569_v21 = vld [vmem:[#allocation6_spill] sm:$0xff] }
 0x2ff   :  { %v1330_v54 = vmul.f32 %v4401_v23, %v1291_v9  ;;  %v1473_v44 = vadd.f32 %v1457_v24, %v1337_v27  ;;  %v1474_v39 = vadd.f32 %v1458_v60, %v1338_v40  ;;  %v1380_v52 = vpop.permute.xlu0 %1379  ;;  %v5561_v23 = vld [vmem:[#allocation91_spill] sm:$0xff]  ;;  %v5565_v24 = vld [vmem:[#allocation50_spill] sm:$0xff]  ;;  %v5566_v60 = vld [vmem:[#allocation48_spill] sm:$0xff]  ;;  %v4838_v30 = vpack.c.bf16 %v5569_v21, %v5568_v26 }
 0x300   :  { %v1345_v11 = vadd.f32 %v1329_v62, %v1209_v38  ;;  %v1593_v22 = vmul.f32 %v5538_v47, %v1554_v19  ;;  %v1594_v18 = vmul.f32 %v5539_v8, %v1555_v43  ;;  %v1386_v35 = vsel %vm1383_vm6, %v5559_v46, %v1380_v52  ;;  %v4845_v19 = vld [vmem:[%s5016_s8 + $0x18] sm:$0xff]  ;;  %v4863_v43 = vld [vmem:[%s5017_s9] sm:$0xff] }
 0x301   :  { %v1346_v5 = vadd.f32 %v1330_v54, %v1210_v2  ;;  %v1398_v20 = vsel %vm1383_vm6, %v1380_v52, %v5560_v42  ;;  %v1426_v37 = vmul.f32 %v5561_v23, %v1386_v35  ;;  %v5564_v2 = vld [vmem:[#allocation69_spill] sm:$0xff]  ;;  %v4821_v9 = vpack.c.bf16 %v5566_v60, %v5565_v24  ;;  %v4858_v54 = vld [vmem:[%s5017_s9 + $0x8] sm:$0xff]  ;;  %v4870_v52 = vld [vmem:[%s5017_s9 + $0x18] sm:$0xff] }
 0x302   :  { %v1427_v27 = vmul.f32 %v5561_v23, %v1398_v20  ;;  %v4774_v40 = vadd.f32 %v1593_v22, %v1473_v44  ;;  %v4776_v57 = vadd.f32 %v1594_v18, %v1474_v39  ;;  %v5567_v62 = vmov 0.0|0.0   ;;  %v4875_v18 = vld [vmem:[%s5017_s9 + $0x10] sm:$0xff] }
 0x303   :  { %v1465_v49 = vmul.f32 %v5520_v32, %v1426_v37  ;;  %v1516_v48 = vpop.permute.xlu0 %1515 }
 0x304   :  { %v1466_v59 = vmul.f32 %v5521_v63, %v1427_v27  ;;  %v2646_v58 = vpack.c.bf16 %v4725_v55, %v4774_v40  ;;  %v1522_v6 = vsel %vm1519_vm7, %v5562_v36, %v1516_v48  ;;  %v1534_v16 = vsel %vm1519_vm7, %v1516_v48, %v5563_v29 }
 0x305   :  { %v2064_v51 = vadd.f32 %v4776_v57, %v4774_v40  ;;  %v2644_v32 = vpack.c.bf16 %v4728_v33, %v4776_v57  ;;  %v1481_v38 = vadd.f32 %v1465_v49, %v1345_v11  ;;  %v1562_v25 = vmul.f32 %v5564_v2, %v1522_v6 }
 0x306   :  { %v1482_v63 = vadd.f32 %v1466_v59, %v1346_v5  ;;  %v1563_v1 = vmul.f32 %v5564_v2, %v1534_v16 }
 0x307   :  { %2065 = vadd.xlane.f32.xlu1 %v2064_v51  ;;  %v1601_v56 = vmul.f32 %v5538_v47, %v1562_v25  ;;  %v4816_v47 = vld [vmem:[%s5015_s7] sm:$0xff] }
 0x308   :  { %v1602_v17 = vmul.f32 %v5539_v8, %v1563_v1  ;;  %v5570_v1 = vld [vmem:[#allocation10_spill] sm:$0xff] }
 0x309   :  { %v4796_v53 = vadd.f32 %v1601_v56, %v1481_v38  ;;  %v4881_v56 = vadd.s32 8, %v5570_v1  ;;  %vm1634_vm12 = vcmp.eq.s32.totalorder %v5570_v1, %v3613_v50 }
 0x30a   :  { %v4798_v13 = vadd.f32 %v1602_v17, %v1482_v63 }
 0x30b   :  { %v2650_v41 = vpack.c.bf16 %v4743_v31, %v4796_v53  ;;  %vm1635_vm11 = vcmp.eq.s32.totalorder %v4881_v56, %v3613_v50 }
 0x30c   :  { %v2070_v12 = vadd.f32 %v4798_v13, %v4796_v53  ;;  %v2648_v4 = vpack.c.bf16 %v4745_v34, %v4798_v13 }
 0x394   :  { %v2066_v17 = vpop.xlane.xlu1 %2065 }
 0x3a6   :  { %v1731_v8 = vpop.f32.mrb[0].mxu0 }
 0x3a7   :  { %v1732_v28 = vadd.f32 %v1731_v8, %v4816_v47  ;;  %v2562_v14 = vpop.f32.mrb[1].mxu0  ;;  %v2069_v8 = vpop.xlane.xlu0 %2068 }
 0x3a8   :  { %v4891_v14 = vadd.s32 24, %v5570_v1 }
 0x3a9   :  { %v1735_v45 = vmax.f32 %v1732_v28, 0.0  ;;  %v4888_v28 = vadd.s32 16, %v5570_v1 }
 0x3aa   :  { %vm1637_vm14 = vcmp.eq.s32.totalorder %v4891_v14, %v3613_v50 }
 0x3ab   :  { %2563 = vmatprep.subr.mxu1 %v1735_v45  ;;  %vm1636_vm13 = vcmp.eq.s32.totalorder %v4888_v28, %v3613_v50 }
 0x3ac   :  { %2564 = vmatpush3.msra.mxu1 %v1735_v45 }
 0x3ad   :  { %2566 = vmatmul.mubr.msk.f32.vlgmr.msra.gmra.mrb[0].mxu1 %vm1744_vm10, %v4826_v10  ;;  %2618 = vmatprep.subr.bf16.mxu1 %v5567_v62 }
 0x3ae   :  { %2568 = vmatprep.mubr.msk.f32.mxu1 %vm1744_vm10, %v4831_v7  ;;  %2620 = vmatpush3.bf16.msra.mxu1 %v4821_v9 }
 0x3af   :  { %2621 = vmatprep.subr.bf16.mxu1 %v5567_v62 }
 0x3b1   :  { %2569 = vmatmul.mubr.msk.f32.gmra.mrb[2].mxu1 %vm1744_vm10, %v4845_v19 }
 0x3b2   :  { %2623 = vmatpush3.bf16.msra.mxu1 %v4838_v30  ;;  %2579 = vmatprep.mubr.msk.f32.mxu1 %vm2755_vm8, %v5493_v3 }
 0x3b3   :  { %2632 = vmatprep.subr.bf16.mxu1 %v5567_v62 }
 0x480   :  { %v2567_v44 = vpop.f32.mrb[0].mxu1 }
 0x481   :  { %v1829_v39 = vadd.f32 %v2567_v44, %v4858_v54  ;;  %v1823_v11 = vpop.f32.mrb[1].mxu1 }
 0x482   :  { %v1824_v22 = vadd.f32 %v1823_v11, %v4863_v43 }
 0x483   :  { %v1843_v5 = vadd.f32 3.0, %v1829_v39 }
 0x484   :  { %v1842_v46 = vadd.f32 3.0, %v1824_v22  ;;  %v2570_v35 = vpop.f32.mrb[2].mxu1 }
 0x485   :  { %v1847_v42 = vmax.f32 %v1843_v5, 0.0  ;;  %v1839_v20 = vadd.f32 %v2570_v35, %v4870_v52  ;;  %v1833_v23 = vpop.f32.mrb[3].mxu1 }
 0x486   :  { %v1846_v37 = vmax.f32 %v1842_v46, 0.0  ;;  %v1834_v27 = vadd.f32 %v1833_v23, %v4875_v18 }
 0x487   :  { %v1851_v49 = vmin.f32 %v1847_v42, 6.0  ;;  %v1845_v59 = vadd.f32 3.0, %v1839_v20 }
 0x488   :  { %v1850_v48 = vmin.f32 %v1846_v37, 6.0  ;;  %v1844_v36 = vadd.f32 3.0, %v1834_v27 }
 0x489   :  { %v1855_v6 = vmul.f32 0.16666667, %v1851_v49  ;;  %v1849_v29 = vmax.f32 %v1845_v59, 0.0 }
 0x48a   :  { %v1854_v16 = vmul.f32 0.16666667, %v1850_v48  ;;  %v1848_v51 = vmax.f32 %v1844_v36, 0.0  ;;  %v2076_v36 = vmul.f32 0.00390625, %v2066_v17 }
 0x48b   :  { %v1853_v38 = vmin.f32 %v1849_v29, 6.0  ;;  %1865 = vperm.xlu1 %2708, %v1855_v6   ;;  %v2077_v29 = vmul.f32 0.00390625, %v2069_v8 }
 0x48c   :  { %v1852_v63 = vmin.f32 %v1848_v51, 6.0  ;;  %1860 = vperm.xlu0 %2707, %v1854_v16   ;;  %v2080_v51 = vadd.f32 %v2076_v36, %v5565_v24 }
 0x48d   :  { %v1857_v2 = vmul.f32 0.16666667, %v1853_v38  ;;  %v4917_v38 = vld [vmem:[%s5018_s10] sm:$0xf] }
 0x48e   :  { %v1856_v25 = vmul.f32 0.16666667, %v1852_v63 }
 0x490   :  { %1875 = vperm.xlu0 %2707, %v1857_v2   ;;  %1870 = vperm.xlu1 %2708, %v1856_v25   ;;  %v2081_v2 = vadd.f32 %v2077_v29, %v5566_v60 }
 0x4af   :  { %2071 = vadd.xlane.f32.xlu0 %v2070_v12 }
 0x4b4   :  { %2074 = vadd.xlane.f32.xlu1 %v4760_v0 }
 0x50a   :  { %v1866_v12 = vpop.permute.xlu1 %1865 }
 0x50b   :  { %v1879_v0 = vsel %vm1635_vm11, %v1866_v12, 0.0  ;;  %v1861_v45 = vpop.permute.xlu0 %1860  ;;  %v2633_v12 = vpack.c.bf16 %v2081_v2, %v2080_v51 }
 0x50c   :  { %v1878_v44 = vsel %vm1634_vm12, %v1861_v45, 0.0  ;;  %v1883_v39 = vsel %vm1661_vm9, %v1879_v0, 0.0 }
 0x50d   :  { %v1882_v11 = vsel %vm1661_vm9, %v1878_v44, 0.0 }
 0x50e   :  { %v1884_v46 = vadd.f32 %v1883_v39, %v1882_v11 }
 0x50f   :  { %v1871_v22 = vpop.permute.xlu1 %1870  ;;  %v1876_v5 = vpop.permute.xlu0 %1875 }
 0x510   :  { %v1880_v35 = vsel %vm1636_vm13, %v1871_v22, 0.0  ;;  %v1881_v42 = vsel %vm1637_vm14, %v1876_v5, 0.0 }
 0x511   :  { %v1885_v20 = vsel %vm1661_vm9, %v1880_v35, 0.0  ;;  %v1887_v37 = vsel %vm1661_vm9, %v1881_v42, 0.0 }
 0x512   :  { %v1886_v23 = vadd.f32 %v1885_v20, %v1884_v46 }
 0x514   :  { %v1888_v27 = vadd.f32 %v1887_v37, %v1886_v23 }
 0x516   :  { %v1889_v49 = vrot.slane %v1888_v27, 4 }
 0x518   :  { %v1890_v59 = vadd.f32 %v1889_v49, %v1888_v27 }
 0x51a   :  { %v1891_v48 = vrot.slane %v1890_v59, 2 }
 0x51c   :  { %v1892_v6 = vadd.f32 %v1891_v48, %v1890_v59 }
 0x51e   :  { %v1893_v16 = vrot.slane %v1892_v6, 1 }
 0x520   :  { %v1894_v63 = vadd.f32 %v1893_v16, %v1892_v6 }
 0x522   :  { %v1895_v25 = vmul.f32 %v1894_v63, %v4917_v38 }
 0x524   :  { %2580 = vmatmul.mubr.msk.f32.vlgmr.msra.gmra.mrb[4].mxu1 %vm1661_vm9, %v1895_v25  ;;  %2514 = vmatmul.mubr.msk.f32.vlgmr.msra.gmra.mrb[2].mxu0 %vm1661_vm9, %v1895_v25 }
 0x525   :  { %2634 = vmatpush3.bf16.msra.mxu1 %v2633_v12  ;;  %2590 = vmatprep.mubr.msk.f32.mxu1 %vm2755_vm8, %v5493_v3 }
 0x526   :  { %2635 = vmatprep.subr.bf16.mxu1 %v5567_v62  ;;  %2595 = vmatprep.mubr.msk.f32.mxu0 %vm1744_vm10, %v4809_v15 }
 0x53c   :  { %v2072_v24 = vpop.xlane.xlu0 %2071 }
 0x53d   :  { %v2078_v17 = vmul.f32 0.00390625, %v2072_v24 }
 0x53f   :  { %v2082_v0 = vadd.f32 %v2078_v17, %v5568_v26 }
 0x541   :  { %v2075_v8 = vpop.xlane.xlu1 %2074 }
 0x542   :  { %v2079_v60 = vmul.f32 0.00390625, %v2075_v8 }
 0x544   :  { %v2083_v45 = vadd.f32 %v2079_v60, %v5569_v21 }
 0x546   :  { %v2636_v44 = vpack.c.bf16 %v2083_v45, %v2082_v0 }
 0x548   :  { %2637 = vmatpush3.bf16.msra.mxu1 %v2636_v44  ;;  %v2711_v44 = vld [vmem:[%s5008_s0] sm:$0xff] }
 0x549   :  { %2638 = vmatprep.subr.bf16.mxu1 %v5567_v62 }
 0x54b   :  { %2591 = vmatmul.mubr.msk.f32.vlgmr.msra.gmra.mrb[6].mxu1 %vm1661_vm9, %v4499_v61 }
 0x54c   :  { %2640 = vmatpush3.bf16.msra.mxu1 %v4821_v9  ;;  %2609 = vmatprep.mubr.msk.f32.mxu1 %vm2755_vm8, %v5493_v3 }
 0x54d   :  { %2641 = vmatprep.subr.bf16.mxu1 %v5567_v62 }
 0x550   :  { %2643 = vmatpush3.bf16.msra.mxu1 %v4838_v30 }
 0x5f7   :  { %v1965_v15 = vpop.f32.mrb[4].mxu1  ;;  %v4938_v26 = vpop.f32.mrb[2].mxu0 }
 0x5f8   :  { %v2581_v21 = vpop.f32.mrb[5].mxu1  ;;  %v4940_v39 = vpop.f32.mrb[3].mxu0 }
 0x61e   :  { %v2155_v11 = vpop.f32.mrb[6].mxu1 }
 0x61f   :  { %v2156_v22 = vadd.f32 %v2155_v11, %v4816_v47  ;;  %v2592_v5 = vpop.f32.mrb[7].mxu1 }
 0x621   :  { %v2159_v61 = vmax.f32 %v2156_v22, 0.0 }
 0x623   :  { %2593 = vmatprep.subr.mxu0 %v2159_v61 }
 0x624   :  { %2594 = vmatpush3.msra.mxu0 %v2159_v61 }
 0x625   :  { %2596 = vmatmul.mubr.msk.f32.vlgmr.msra.gmra.mrb[4].mxu0 %vm1744_vm10, %v4826_v10  ;;  %2645 = vmatprep.subr.bf16.mxu0 %v2644_v32 }
 0x626   :  { %2647 = vmatpush1.bf16.msra.mxu0 %v2646_v58  ;;  %2598 = vmatprep.mubr.msk.f32.mxu0 %vm1744_vm10, %v4831_v7 }
 0x627   :  { %2649 = vmatprep.subr.bf16.mxu0 %v2648_v4 }
 0x629   :  { %2599 = vmatmul.mubr.msk.f32.gmra.mrb[6].mxu0 %vm1744_vm10, %v4845_v19 }
 0x62a   :  { %2651 = vmatpush1.bf16.msra.mxu0 %v2650_v41  ;;  %2461 = vmatprep.mubr.f32.mxu0 %v5493_v3 }
 0x6f8   :  { %v2597_v33 = vpop.f32.mrb[4].mxu0 }
 0x6f9   :  { %v2252_v55 = vadd.f32 %v2597_v33, %v4858_v54  ;;  %v2246_v40 = vpop.f32.mrb[5].mxu0 }
 0x6fa   :  { %v2247_v57 = vadd.f32 %v2246_v40, %v4863_v43 }
 0x6fb   :  { %v2266_v58 = vadd.f32 3.0, %v2252_v55 }
 0x6fc   :  { %v2265_v32 = vadd.f32 3.0, %v2247_v57  ;;  %v2600_v47 = vpop.f32.mrb[6].mxu0 }
 0x6fd   :  { %v2270_v34 = vmax.f32 %v2266_v58, 0.0  ;;  %v2262_v13 = vadd.f32 %v2600_v47, %v4870_v52  ;;  %v2256_v4 = vpop.f32.mrb[7].mxu0  ;;  %v1624_v52 = vld [vmem:[%s5019_s11] sm:$0xf] }
 0x6fe   :  { %v2269_v9 = vmax.f32 %v2265_v32, 0.0  ;;  %v2257_v10 = vadd.f32 %v2256_v4, %v4875_v18  ;;  %v1966_v18 = vadd.f32 %v1965_v15, %v1624_v52  ;;  %v2055_v15 = vcombine.high %v2711_v44, %v2711_v44 }
 0x6ff   :  { %v2274_v31 = vmin.f32 %v2270_v34, 6.0  ;;  %v2268_v53 = vadd.f32 3.0, %v2262_v13 }
 0x700   :  { %v2273_v41 = vmin.f32 %v2269_v9, 6.0  ;;  %v2267_v3 = vadd.f32 3.0, %v2257_v10 }
 0x701   :  { %v2278_v7 = vmul.f32 0.16666667, %v2274_v31  ;;  %v2272_v62 = vmax.f32 %v2268_v53, 0.0 }
 0x702   :  { %v2277_v30 = vmul.f32 0.16666667, %v2273_v41  ;;  %v2271_v19 = vmax.f32 %v2267_v3, 0.0 }
 0x703   :  { %v2276_v54 = vmin.f32 %v2272_v62, 6.0  ;;  %2288 = vperm.xlu1 %2708, %v2278_v7   ;;  %v2712_v7 = vld [vmem:[%s5008_s0 + $0x8] sm:$0xff] }
 0x704   :  { %v2275_v43 = vmin.f32 %v2271_v19, 6.0  ;;  %2283 = vperm.xlu0 %2707, %v2277_v30   ;;  %v2478_v62 = vcombine.high %v2712_v7, %v2712_v7 }
 0x705   :  { %v2280_v46 = vmul.f32 0.16666667, %v2276_v54 }
 0x706   :  { %v2279_v35 = vmul.f32 0.16666667, %v2275_v43 }
 0x708   :  { %2293 = vperm.xlu1 %2708, %v2279_v35   ;;  %2298 = vperm.xlu0 %2707, %v2280_v46  }
 0x70c   :  { %1971 = vperm.xlu1 %2708, %v1966_v18  }
 0x782   :  { %v2289_v42 = vpop.permute.xlu1 %2288 }
 0x783   :  { %v2302_v20 = vsel %vm1635_vm11, %v2289_v42, 0.0  ;;  %v2284_v23 = vpop.permute.xlu0 %2283 }
 0x784   :  { %v2301_v37 = vsel %vm1634_vm12, %v2284_v23, 0.0  ;;  %v2306_v27 = vsel %vm1661_vm9, %v2302_v20, 0.0 }
 0x785   :  { %v2305_v49 = vsel %vm1661_vm9, %v2301_v37, 0.0 }
 0x786   :  { %v2307_v36 = vadd.f32 %v2306_v27, %v2305_v49 }
 0x787   :  { %v2294_v59 = vpop.permute.xlu1 %2293  ;;  %v2299_v48 = vpop.permute.xlu0 %2298 }
 0x788   :  { %v2303_v6 = vsel %vm1636_vm13, %v2294_v59, 0.0  ;;  %v2304_v56 = vsel %vm1637_vm14, %v2299_v48, 0.0 }
 0x789   :  { %v2308_v29 = vsel %vm1661_vm9, %v2303_v6, 0.0  ;;  %v2310_v1 = vsel %vm1661_vm9, %v2304_v56, 0.0 }
 0x78a   :  { %v2309_v16 = vadd.f32 %v2308_v29, %v2307_v36 }
 0x78b   :  { %v1972_v51 = vpop.permute.xlu1 %1971 }
 0x78c   :  { %v2311_v63 = vadd.f32 %v2310_v1, %v2309_v16  ;;  %v2041_v2 = vadd.f32 %v4938_v26, %v1972_v51  ;;  %v2043_v25 = vadd.f32 %v4940_v39, %v1972_v51 }
 0x78e   :  { %v2312_v12 = vrot.slane %v2311_v63, 4  ;;  %v2045_v24 = vadd.f32 3.0, %v2041_v2  ;;  %v2046_v17 = vadd.f32 3.0, %v2043_v25 }
 0x790   :  { %v2313_v28 = vadd.f32 %v2312_v12, %v2311_v63  ;;  %v2047_v8 = vmax.f32 %v2045_v24, 0.0  ;;  %v2048_v60 = vmax.f32 %v2046_v17, 0.0 }
 0x792   :  { %v2314_v0 = vrot.slane %v2313_v28, 2  ;;  %v2049_v50 = vmin.f32 %v2047_v8, 6.0  ;;  %v2050_v14 = vmin.f32 %v2048_v60, 6.0 }
 0x794   :  { %v2315_v45 = vadd.f32 %v2314_v0, %v2313_v28  ;;  %v2051_v21 = vmul.f32 0.16666667, %v2049_v50  ;;  %v2052_v11 = vmul.f32 0.16666667, %v2050_v14 }
 0x796   :  { %v2316_v26 = vrot.slane %v2315_v45, 1  ;;  %v2053_v22 = vmul.f32 %v2051_v21, %v2041_v2  ;;  %v2054_v39 = vmul.f32 %v2052_v11, %v2043_v25 }
 0x798   :  { %v2317_v5 = vadd.f32 %v2316_v26, %v2315_v45  ;;  %v2057_v61 = vadd.f32 %v2711_v44, %v2053_v22  ;;  %v2058_v33 = vadd.f32 %v2055_v15, %v2054_v39 }
 0x79a   :  { %v2318_v55 = vmul.f32 %v2317_v5, %v4917_v38  ;;  %v2061_v40 = vcombine.low %v2057_v61, %v2058_v33 }
 0x79c   :  { %2610 = vmatmul.mubr.msk.f32.vlgmr.msra.gmra.mrb[8].mxu1 %vm1661_vm9, %v2318_v55  ;;  %2521 = vmatmul.mubr.msk.f32.vlgmr.msra.gmra.mrb[8].mxu0 %vm1661_vm9, %v2318_v55  ;;  %2063 = vst [vmem:[#allocation2] sm:$0xff] %v2061_v40 }
 0x86f   :  { %v2388_v57 = vpop.f32.mrb[8].mxu1  ;;  %v2463_v58 = vpop.f32.mrb[8].mxu0 }
 0x870   :  { %v2389_v32 = vadd.f32 %v2388_v57, %v1624_v52  ;;  %v2611_v47 = vpop.f32.mrb[9].mxu1  ;;  %v2465_v34 = vpop.f32.mrb[9].mxu0 }
 0x872   :  { %2394 = vperm.xlu0 %2707, %v2389_v32  }
 0x8f1   :  { %v2395_v13 = vpop.permute.xlu0 %2394 }
 0x8f2   :  { %v2464_v4 = vadd.f32 %v2463_v58, %v2395_v13  ;;  %v2466_v9 = vadd.f32 %v2465_v34, %v2395_v13 }
 0x8f4   :  { %v2468_v10 = vadd.f32 3.0, %v2464_v4  ;;  %v2469_v31 = vadd.f32 3.0, %v2466_v9 }
 0x8f6   :  { %v2470_v53 = vmax.f32 %v2468_v10, 0.0  ;;  %v2471_v41 = vmax.f32 %v2469_v31, 0.0 }
 0x8f8   :  { %v2472_v38 = vmin.f32 %v2470_v53, 6.0  ;;  %v2473_v3 = vmin.f32 %v2471_v41, 6.0 }
 0x8fa   :  { %v2474_v30 = vmul.f32 0.16666667, %v2472_v38  ;;  %v2475_v19 = vmul.f32 0.16666667, %v2473_v3 }
 0x8fc   :  { %v2476_v54 = vmul.f32 %v2474_v30, %v2464_v4  ;;  %v2477_v43 = vmul.f32 %v2475_v19, %v2466_v9 }
 0x8fe   :  { %v2480_v46 = vadd.f32 %v2712_v7, %v2476_v54  ;;  %v2481_v35 = vadd.f32 %v2478_v62, %v2477_v43 }
 0x900   :  { %v2484_v52 = vcombine.low %v2480_v46, %v2481_v35 }
 0x902   :  { %2486 = vst [vmem:[#allocation2 + $0x8] sm:$0xff] %v2484_v52 }
 0x903   :  { %2724 = shalt.err (!%p2721_p4)
}
 0x904   :  { %s2725_s20 = scalar_lea.hbm %s5020_s12, 256 }
 0x905   :  { %p2726_p5 = scmp.ne.s32.totalorder %s5020_s12, %s2725_s20  ;;  %p2729_p6 = scmp.lt.u32.totalorder %s2725_s20, %s5020_s12 }
 0x907   :  { %p2731_p7 = pnand %p2729_p6, %p2726_p5 }
 0x909   :  { %2734 = shalt.err (!%p2731_p7)
}
 0x90a   :  { %2496 = dma.vmem_to_hbm [thread:$0]  %s2494_s4, 256, %s5020_s12, [#allocation3]  }
 0x90b   :  { %2735 = dma.done.wait [#allocation3], 256  }
 0x90c   :  { %2736 = vsyncadd [#allocation3], 4294967040 }
 0x90d   :  { %2500 = vsyncpa [#allocation3], 1 }

</bundles_post_ra>
